<compile_context>
chip_gen: v6e
topology: v6e:2x2x1
jax: 0.10.0
libtpu: 0.0.40
codegen_flags: <defaults>
</compile_context>

<pallas_src>
import functools

import jax
import jax.numpy as jnp
from jax.experimental import pallas as pl
from jax.experimental.pallas import tpu as pltpu

_COUT_PAD = 128                       # lane-dense output slab width
_VMEM_LIMIT = 32 * 1024 * 1024        # safe on v5e/v6e/v7x


# ----------------------------------------------------------------------------
# Pallas kernels
# ----------------------------------------------------------------------------
def _conv3x3_row_kernel(x_ref, w_ref, b_ref, a_ref, o_ref, *, apply_prelu):
    """One output row of a 3x3 conv (NHWC), accumulated over the ky grid axis.

    x_ref : (W+2, Cin)        bf16  padded input row (h + ky)
    w_ref : (3, 3*Cin, 128)   bf16  resident weights, [ky, kx*Cin+cin, cout]
    b_ref : (1, 128)          f32   bias (zero-padded to 128 lanes)
    a_ref : (1, 128)          f32   PReLU slope
    o_ref : (W, 128)          f32   revisited across ky (accumulator)
    """
    ky = pl.program_id(2)
    w_out = o_ref.shape[0]
    cin = x_ref.shape[1]

    @pl.when(ky == 0)
    def _init():
        o_ref[...] = jnp.zeros_like(o_ref)

    x = x_ref[...]                    # (W+2, Cin) bf16
    wk = w_ref[ky]                    # (3*Cin, 128) bf16 (dynamic leading index)
    acc = o_ref[...]
    for kx in range(3):               # horizontal taps: 3 small MXU matmuls
        acc = acc + jnp.dot(x[kx:kx + w_out, :],
                            wk[kx * cin:(kx + 1) * cin, :],
                            preferred_element_type=jnp.float32)
    o_ref[...] = acc

    @pl.when(ky == 2)
    def _finalize():
        y = o_ref[...] + b_ref[...]
        if apply_prelu:
            y = jnp.where(y >= 0.0, y, a_ref[...] * y)
        o_ref[...] = y


def _convex_upsample_kernel(mask_ref, patch_ref, o_ref):
    """Softmax over the 9 taps + convex combination, lane axis = flattened HW.

    mask_ref : (9, P, T) f32, patch_ref: (c, 9, T) f32, o_ref: (c, P, T) f32
    """
    m = mask_ref[...]
    m = m - jnp.max(m, axis=0, keepdims=True)
    e = jnp.exp(m)
    soft = e * pl.reciprocal(jnp.sum(e, axis=0, keepdims=True), approx=True)
    p = patch_ref[...]
    o_ref[...] = jnp.sum(soft[None, :, :, :] * p[:, :, None, :], axis=1)


# ----------------------------------------------------------------------------
# Kernel wrappers
# ----------------------------------------------------------------------------
def prep_conv(w, b, alpha=None):
    """One-time weight re-layout: (Cout,Cin,3,3) -> (3, 3*Cin, 128) bf16."""
    cout, cin, _, _ = w.shape
    wk = jnp.transpose(w, (2, 3, 1, 0)).reshape(3, 3 * cin, cout)     # [ky, kx*Cin+ci, co]
    wk = jnp.pad(wk, ((0, 0), (0, 0), (0, _COUT_PAD - cout))).astype(jnp.bfloat16)
    bp = jnp.pad(b, (0, _COUT_PAD - cout)).reshape(1, _COUT_PAD).astype(jnp.float32)
    if alpha is None:
        ap = jnp.zeros((1, _COUT_PAD), jnp.float32)
        apply_prelu = False
    else:
        ap = jnp.pad(alpha, (0, _COUT_PAD - cout)).reshape(1, _COUT_PAD).astype(jnp.float32)
        apply_prelu = True
    return {'w': wk, 'b': bp, 'a': ap, 'cout': cout, 'apply_prelu': apply_prelu}


def conv3x3(x_nhwc, cp):
    """3x3 conv, stride 1, zero pad 1, optional PReLU. NHWC in -> NHWC out (f32)."""
    N, H, W, Cin = x_nhwc.shape
    Wp = W + 2
    xp = jnp.pad(x_nhwc, ((0, 0), (1, 1), (1, 1), (0, 0))).astype(jnp.bfloat16)

    out = pl.pallas_call(
        functools.partial(_conv3x3_row_kernel, apply_prelu=cp['apply_prelu']),
        out_shape=jax.ShapeDtypeStruct((N, H, W, _COUT_PAD), jnp.float32),
        grid=(N, H, 3),
        in_specs=[
            # padded input row h + ky, streamed (double-buffered) per grid step
            pl.BlockSpec((None, None, Wp, Cin), lambda n, h, ky: (n, h + ky, 0, 0)),
            # weights / bias / slope: full-extent blocks -> stay resident in VMEM
            pl.BlockSpec((3, 3 * Cin, _COUT_PAD), lambda n, h, ky: (0, 0, 0)),
            pl.BlockSpec((1, _COUT_PAD), lambda n, h, ky: (0, 0)),
            pl.BlockSpec((1, _COUT_PAD), lambda n, h, ky: (0, 0)),
        ],
        out_specs=pl.BlockSpec((None, None, W, _COUT_PAD), lambda n, h, ky: (n, h, 0, 0)),
        compiler_params=pltpu.CompilerParams(
            dimension_semantics=("parallel", "parallel", "arbitrary"),
            vmem_limit_bytes=_VMEM_LIMIT),
    )(xp, cp['w'], cp['b'], cp['a'])
    return out[:, :, :, :cp['cout']]


def _pick_hw_tile(hw, target=2048):
    """Lane-axis tile: full extent if small, else a 128-multiple divisor of HW."""
    if hw <= target:
        return hw
    t = target - target % 128
    while t >= 128:
        if hw % t == 0:
            return t
        t -= 128
    return hw


def upsample_input(inp_nchw, mask6, up):
    """Convex upsampling of inp (N,c,H,W) with mask6 (N,9,up,up,H,W) -> (N,c,up*H,up*W)."""
    N, c, H, W = inp_nchw.shape
    P = up * up
    HW = H * W
    # replicate pad + 3x3 patch extraction (matches F.pad(mode='replicate') + F.unfold)
    pad = jnp.pad(inp_nchw, ((0, 0), (0, 0), (1, 1), (1, 1)), mode="edge")
    patches = jnp.stack([pad[:, :, ky:ky + H, kx:kx + W]
                         for ky in range(3) for kx in range(3)], axis=2)     # (N,c,9,H,W)
    patches = patches.reshape(N, c, 9, HW).astype(jnp.float32)
    mask = mask6.reshape(N, 9, P, HW).astype(jnp.float32)

    T = _pick_hw_tile(HW)
    out = pl.pallas_call(
        _convex_upsample_kernel,
        out_shape=jax.ShapeDtypeStruct((N, c, P, HW), jnp.float32),
        grid=(N, HW // T),
        in_specs=[
            pl.BlockSpec((None, 9, P, T), lambda n, j: (n, 0, 0, j)),
            pl.BlockSpec((None, c, 9, T), lambda n, j: (n, 0, 0, j)),
        ],
        out_specs=pl.BlockSpec((None, c, P, T), lambda n, j: (n, 0, 0, j)),
        compiler_params=pltpu.CompilerParams(
            dimension_semantics=("parallel", "parallel"),
            vmem_limit_bytes=_VMEM_LIMIT),
    )(mask, patches)

    out = out.reshape(N, c, up, up, H, W).transpose(0, 1, 4, 2, 5, 3)
    return out.reshape(N, c, up * H, up * W)


# ----------------------------------------------------------------------------
# Plain-JAX glue (gather / interpolation / layout shuffles)
# ----------------------------------------------------------------------------
def _to_nhwc(x):
    return jnp.transpose(x, (0, 2, 3, 1))


def pixel_shuffle_nhwc(x, r):
    N, H, W, C = x.shape
    x = x.reshape(N, H, W, C // (r * r), r, r)
    x = x.transpose(0, 1, 4, 2, 5, 3)
    return x.reshape(N, H * r, W * r, C // (r * r))


def split_mask(mask_nhwc, up, H, W):
    """NHWC conv output (N, up*H, up*W, 18) -> two (N, 9, up, up, H, W) halves."""
    N = mask_nhwc.shape[0]
    m = mask_nhwc.reshape(N, H, up, W, up, 18)
    m = m.transpose(0, 5, 2, 4, 1, 3)                  # (N, 18, up, up, H, W)
    return m[:, :9], m[:, 9:]


def upsample_bilinear(x, s):
    """PyTorch F.interpolate(mode='bilinear', align_corners=False), integer scale s."""
    if s == 1:
        return x
    N, C, H, W = x.shape
    Ho, Wo = H * s, W * s

    def idx_weights(out_size, in_size):
        src = (jnp.arange(out_size, dtype=jnp.float32) + 0.5) / float(s) - 0.5
        src = jnp.clip(src, 0.0, None)
        i0 = jnp.minimum(jnp.floor(src).astype(jnp.int32), in_size - 1)
        i1 = jnp.minimum(i0 + 1, in_size - 1)
        w1 = src - i0.astype(jnp.float32)
        return i0, i1, 1.0 - w1, w1

    y0, y1, wy0, wy1 = idx_weights(Ho, H)
    x0, x1, wx0, wx1 = idx_weights(Wo, W)
    r0 = x[:, :, y0, :]
    r1 = x[:, :, y1, :]
    rows = r0 * wy0[None, None, :, None] + r1 * wy1[None, None, :, None]
    c0 = rows[:, :, :, x0]
    c1 = rows[:, :, :, x1]
    return c0 * wx0[None, None, None, :] + c1 * wx1[None, None, None, :]


def backwarp(img, flow):
    # TODO(synk): `backwarp` is defined outside caun.py; a standard bilinear
    # grid-sample (pixel grid + flow, zeros padding) is assumed here.
    N, C, H, W = img.shape
    gx = jnp.arange(W, dtype=jnp.float32)[None, None, :] + flow[:, 0]
    gy = jnp.arange(H, dtype=jnp.float32)[None, :, None] + flow[:, 1]
    x0f = jnp.floor(gx)
    y0f = jnp.floor(gy)
    wx1 = gx - x0f
    wx0 = 1.0 - wx1
    wy1 = gy - y0f
    wy0 = 1.0 - wy1
    img_flat = img.reshape(N, C, H * W)

    def sample(yf, xf):
        valid = ((xf >= 0) & (xf <= W - 1) & (yf >= 0) & (yf <= H - 1)).astype(img.dtype)
        xi = jnp.clip(xf, 0, W - 1).astype(jnp.int32)
        yi = jnp.clip(yf, 0, H - 1).astype(jnp.int32)
        idx = jnp.broadcast_to((yi * W + xi).reshape(N, 1, H * W), (N, C, H * W))
        g = jnp.take_along_axis(img_flat, idx, axis=2).reshape(N, C, H, W)
        return g * valid[:, None, :, :]

    return ((wy0 * wx0)[:, None] * sample(y0f, x0f)
            + (wy0 * wx1)[:, None] * sample(y0f, x0f + 1.0)
            + (wy1 * wx0)[:, None] * sample(y0f + 1.0, x0f)
            + (wy1 * wx1)[:, None] * sample(y0f + 1.0, x0f + 1.0))


# ----------------------------------------------------------------------------
# CAUN forward (activations kept NHWC between convs)
# ----------------------------------------------------------------------------
def caun_forward(params, flow, feat0, feat1, last_occ):
    N, _, H, W = flow.shape
    f0w, f1w = [], []
    for i in range(3):
        s = 2 ** i
        flow_bi = upsample_bilinear(flow * float(s), s)
        f0w.append(_to_nhwc(backwarp(feat0[2 - i], flow_bi[:, :2])))
        f1w.append(_to_nhwc(backwarp(feat1[2 - i], flow_bi[:, 2:])))

    feature = jnp.concatenate([f0w[0], f1w[0]], axis=-1)
    feature0 = conv3x3(feature, params['enc0'])
    feature1 = conv3x3(
        jnp.concatenate([pixel_shuffle_nhwc(feature0, 2), f0w[1], f1w[1]], axis=-1),
        params['enc1'])
    feature2 = conv3x3(
        jnp.concatenate([pixel_shuffle_nhwc(feature1, 2), f0w[2], f1w[2]], axis=-1),
        params['enc2'])

    h2 = conv3x3(feature1, params['kx2_0'])
    mask_x2 = conv3x3(h2, params['kx2_1'])
    h4 = conv3x3(feature2, params['kx4_0'])
    mask_x4 = conv3x3(h4, params['kx4_1'])

    m20, m21 = split_mask(mask_x2, 2, H, W)
    m40, m41 = split_mask(mask_x4, 4, H, W)

    up20 = upsample_input(flow[:, :2] * 2.0, m20, 2)
    up21 = upsample_input(flow[:, 2:] * 2.0, m21, 2)
    up40 = upsample_input(flow[:, :2] * 4.0, m40, 4)
    up41 = upsample_input(flow[:, 2:] * 4.0, m41, 4)

    up_flow_x2 = jnp.concatenate([up20, up21], axis=1)
    up_flow_x4 = jnp.concatenate([up40, up41], axis=1)
    up_occ = upsample_bilinear(last_occ, 4)
    return [up_flow_x4, up_flow_x2, flow], up_occ


# ----------------------------------------------------------------------------
# Main
# ----------------------------------------------------------------------------
if __name__ == "__main__":
    key = jax.random.PRNGKey(0)
    C = 4                      # feat_channels
    N, H, W = 2, 8, 8          # coarse flow resolution

    def init_conv(k, cout, cin):
        k1, k2 = jax.random.split(k)
        w = 0.1 * jax.random.normal(k1, (cout, cin, 3, 3), jnp.float32)
        b = 0.05 * jax.random.normal(k2, (cout,), jnp.float32)
        return w, b

    def prelu(c):
        return jnp.full((c,), 0.25, jnp.float32)

    keys = jax.random.split(key, 16)
    raw = {
        'enc0':  init_conv(keys[0], 4 * C, 8 * C) + (prelu(4 * C),),
        'enc1':  init_conv(keys[1], 4 * C, 5 * C) + (prelu(4 * C),),
        'enc2':  init_conv(keys[2], 1 * C, 3 * C) + (prelu(1 * C),),
        'kx2_0': init_conv(keys[3], 2 * C, 4 * C) + (prelu(2 * C),),
        'kx2_1': init_conv(keys[4], 18, 2 * C) + (None,),
        'kx4_0': init_conv(keys[5], 1 * C, 1 * C) + (prelu(1 * C),),
        'kx4_1': init_conv(keys[6], 18, 1 * C) + (None,),
    }
    params = {k: prep_conv(*v) for k, v in raw.items()}   # one-time weight re-layout

    flow = jax.random.normal(keys[7], (N, 4, H, W), jnp.float32)
    feat0 = (jax.random.normal(keys[8], (N, C, 4 * H, 4 * W), jnp.float32),
             jax.random.normal(keys[9], (N, 2 * C, 2 * H, 2 * W), jnp.float32),
             jax.random.normal(keys[10], (N, 4 * C, H, W), jnp.float32))
    feat1 = (jax.random.normal(keys[11], (N, C, 4 * H, 4 * W), jnp.float32),
             jax.random.normal(keys[12], (N, 2 * C, 2 * H, 2 * W), jnp.float32),
             jax.random.normal(keys[13], (N, 4 * C, H, W), jnp.float32))
    last_occ = jax.random.normal(keys[14], (N, 1, H, W), jnp.float32)

    fwd = jax.jit(functools.partial(caun_forward, params))
    flows, up_occ = fwd(flow, feat0, feat1, last_occ)
    jax.block_until_ready(flows)
    jax.block_until_ready(up_occ)

    assert flows[0].shape == (N, 4, 4 * H, 4 * W)
    assert flows[1].shape == (N, 4, 2 * H, 2 * W)
    assert flows[2].shape == (N, 4, H, W)
    assert up_occ.shape == (N, 1, 4 * H, 4 * W)
    print("KERNEL_OK")
</pallas_src>

<mosaic_0001>
module attributes {stable_mosaic.version = 11 : i64} {
  func.func @_conv3x3_row_kernel(%arg0: i32, %arg1: i32, %arg2: i32, %arg3: memref<1x1x10x32xbf16, #tpu.memory_space<vmem>>, %arg4: memref<3x96x128xbf16, #tpu.memory_space<vmem>>, %arg5: memref<1x128xf32, #tpu.memory_space<vmem>>, %arg6: memref<1x128xf32, #tpu.memory_space<vmem>>, %arg7: memref<1x1x8x128xf32, #tpu.memory_space<vmem>>) attributes {dimension_semantics = [#tpu.dimension_semantics<parallel>, #tpu.dimension_semantics<parallel>, #tpu.dimension_semantics<arbitrary>], iteration_bounds = array<i64: 2, 8, 3>, scalar_prefetch = 0 : i64, scratch_operands = 0 : i64, tpu.core_type = #tpu.core_type<tc>, window_params = [{transform_indices = @transform_0, window_bounds = array<i64: 1, 1, 10, 32>}, {pipeline_mode = #tpu.pipeline_mode<synchronous>, transform_indices = @transform_1, window_bounds = array<i64: 3, 96, 128>}, {pipeline_mode = #tpu.pipeline_mode<synchronous>, transform_indices = @transform_2, window_bounds = array<i64: 1, 128>}, {pipeline_mode = #tpu.pipeline_mode<synchronous>, transform_indices = @transform_3, window_bounds = array<i64: 1, 128>}, {transform_indices = @transform_4, window_bounds = array<i64: 1, 1, 8, 128>}]} {
    %c0_i32 = arith.constant 0 : i32
    %0 = arith.cmpi eq, %arg2, %c0_i32 : i32
    %1 = arith.extui %0 : i1 to i32
    %c0_i32_0 = arith.constant 0 : i32
    %2 = arith.cmpi ne, %1, %c0_i32_0 : i32
    scf.if %2 {
      %cst_17 = arith.constant 0.000000e+00 : f32
      %28 = vector.broadcast %cst_17 : f32 to vector<8x128xf32>
      %c0_18 = arith.constant 0 : index
      %c0_19 = arith.constant 0 : index
      %c0_20 = arith.constant 0 : index
      %c0_21 = arith.constant 0 : index
      %29 = vector.load %arg7[%c0_18, %c0_19, %c0_20, %c0_21] : memref<1x1x8x128xf32, #tpu.memory_space<vmem>>, vector<1x1x8x128xf32>
      %30 = vector.shape_cast %29 : vector<1x1x8x128xf32> to vector<8x128xf32>
      %31 = vector.shape_cast %28 : vector<8x128xf32> to vector<1x1x8x128xf32>
      tpu.vector_store %arg7[%c0_18, %c0_19, %c0_20, %c0_21], %31 {strides = array<i32>} : memref<1x1x8x128xf32, #tpu.memory_space<vmem>>, vector<1x1x8x128xf32>,
    } else {
    }
    %c0 = arith.constant 0 : index
    %c0_1 = arith.constant 0 : index
    %c0_2 = arith.constant 0 : index
    %c0_3 = arith.constant 0 : index
    %3 = vector.load %arg3[%c0, %c0_1, %c0_2, %c0_3] : memref<1x1x10x32xbf16, #tpu.memory_space<vmem>>, vector<1x1x10x32xbf16>
    %4 = vector.shape_cast %3 : vector<1x1x10x32xbf16> to vector<10x32xbf16>
    %5 = arith.index_cast %arg2 : i32 to index
    %c0_4 = arith.constant 0 : index
    %c0_5 = arith.constant 0 : index
    %6 = vector.load %arg4[%5, %c0_4, %c0_5] : memref<3x96x128xbf16, #tpu.memory_space<vmem>>, vector<1x96x128xbf16>
    %7 = vector.shape_cast %6 : vector<1x96x128xbf16> to vector<96x128xbf16>
    %c0_6 = arith.constant 0 : index
    %c0_7 = arith.constant 0 : index
    %c0_8 = arith.constant 0 : index
    %c0_9 = arith.constant 0 : index
    %8 = vector.load %arg7[%c0_6, %c0_7, %c0_8, %c0_9] : memref<1x1x8x128xf32, #tpu.memory_space<vmem>>, vector<1x1x8x128xf32>
    %9 = vector.shape_cast %8 : vector<1x1x8x128xf32> to vector<8x128xf32>
    %10 = vector.extract_strided_slice %4 {offsets = [0, 0], sizes = [8, 32], strides = [1, 1]} : vector<10x32xbf16> to vector<8x32xbf16>
    %11 = vector.extract_strided_slice %7 {offsets = [0, 0], sizes = [32, 128], strides = [1, 1]} : vector<96x128xbf16> to vector<32x128xbf16>
    %cst = arith.constant dense<0.000000e+00> : vector<8x128xf32>
    %12 = tpu.matmul %10, %11, %cst {dimension_numbers = #tpu.dot_dimension_numbers<[1], [0], [0], [1], [0, 0, 1, 1], [], []>} : vector<8x32xbf16>, vector<32x128xbf16>, vector<8x128xf32> -> vector<8x128xf32>
    %13 = arith.addf %9, %12 : vector<8x128xf32>
    %14 = vector.extract_strided_slice %4 {offsets = [1, 0], sizes = [8, 32], strides = [1, 1]} : vector<10x32xbf16> to vector<8x32xbf16>
    %15 = vector.extract_strided_slice %7 {offsets = [32, 0], sizes = [32, 128], strides = [1, 1]} : vector<96x128xbf16> to vector<32x128xbf16>
    %cst_10 = arith.constant dense<0.000000e+00> : vector<8x128xf32>
    %16 = tpu.matmul %14, %15, %cst_10 {dimension_numbers = #tpu.dot_dimension_numbers<[1], [0], [0], [1], [0, 0, 1, 1], [], []>} : vector<8x32xbf16>, vector<32x128xbf16>, vector<8x128xf32> -> vector<8x128xf32>
    %17 = arith.addf %13, %16 : vector<8x128xf32>
    %18 = vector.extract_strided_slice %4 {offsets = [2, 0], sizes = [8, 32], strides = [1, 1]} : vector<10x32xbf16> to vector<8x32xbf16>
    %19 = vector.extract_strided_slice %7 {offsets = [64, 0], sizes = [32, 128], strides = [1, 1]} : vector<96x128xbf16> to vector<32x128xbf16>
    %cst_11 = arith.constant dense<0.000000e+00> : vector<8x128xf32>
    %20 = tpu.matmul %18, %19, %cst_11 {dimension_numbers = #tpu.dot_dimension_numbers<[1], [0], [0], [1], [0, 0, 1, 1], [], []>} : vector<8x32xbf16>, vector<32x128xbf16>, vector<8x128xf32> -> vector<8x128xf32>
    %21 = arith.addf %17, %20 : vector<8x128xf32>
    %c0_12 = arith.constant 0 : index
    %c0_13 = arith.constant 0 : index
    %c0_14 = arith.constant 0 : index
    %c0_15 = arith.constant 0 : index
    %22 = vector.load %arg7[%c0_12, %c0_13, %c0_14, %c0_15] : memref<1x1x8x128xf32, #tpu.memory_space<vmem>>, vector<1x1x8x128xf32>
    %23 = vector.shape_cast %22 : vector<1x1x8x128xf32> to vector<8x128xf32>
    %24 = vector.shape_cast %21 : vector<8x128xf32> to vector<1x1x8x128xf32>
    tpu.vector_store %arg7[%c0_12, %c0_13, %c0_14, %c0_15], %24 {strides = array<i32>} : memref<1x1x8x128xf32, #tpu.memory_space<vmem>>, vector<1x1x8x128xf32>,
    %c2_i32 = arith.constant 2 : i32
    %25 = arith.cmpi eq, %arg2, %c2_i32 : i32
    %26 = arith.extui %25 : i1 to i32
    %c0_i32_16 = arith.constant 0 : i32
    %27 = arith.cmpi ne, %26, %c0_i32_16 : i32
    scf.if %27 {
      %c0_17 = arith.constant 0 : index
      %c0_18 = arith.constant 0 : index
      %c0_19 = arith.constant 0 : index
      %c0_20 = arith.constant 0 : index
      %28 = vector.load %arg7[%c0_17, %c0_18, %c0_19, %c0_20] : memref<1x1x8x128xf32, #tpu.memory_space<vmem>>, vector<1x1x8x128xf32>
      %29 = vector.shape_cast %28 : vector<1x1x8x128xf32> to vector<8x128xf32>
      %c0_21 = arith.constant 0 : index
      %c0_22 = arith.constant 0 : index
      %30 = vector.load %arg5[%c0_21, %c0_22] : memref<1x128xf32, #tpu.memory_space<vmem>>, vector<1x128xf32>
      %31 = vector.broadcast %30 : vector<1x128xf32> to vector<8x128xf32>
      %32 = arith.addf %29, %31 : vector<8x128xf32>
      %cst_23 = arith.constant 0.000000e+00 : f32
      %33 = vector.broadcast %cst_23 : f32 to vector<8x128xf32>
      %34 = arith.cmpf oge, %32, %33 : vector<8x128xf32>
      %c0_24 = arith.constant 0 : index
      %c0_25 = arith.constant 0 : index
      %35 = vector.load %arg6[%c0_24, %c0_25] : memref<1x128xf32, #tpu.memory_space<vmem>>, vector<1x128xf32>
      %36 = vector.broadcast %35 : vector<1x128xf32> to vector<8x128xf32>
      %37 = arith.mulf %36, %32 : vector<8x128xf32>
      %38 = arith.select %34, %32, %37 : vector<8x128xi1>, vector<8x128xf32>
      %c0_26 = arith.constant 0 : index
      %c0_27 = arith.constant 0 : index
      %c0_28 = arith.constant 0 : index
      %c0_29 = arith.constant 0 : index
      %39 = vector.load %arg7[%c0_26, %c0_27, %c0_28, %c0_29] : memref<1x1x8x128xf32, #tpu.memory_space<vmem>>, vector<1x1x8x128xf32>
      %40 = vector.shape_cast %39 : vector<1x1x8x128xf32> to vector<8x128xf32>
      %41 = vector.shape_cast %38 : vector<8x128xf32> to vector<1x1x8x128xf32>
      tpu.vector_store %arg7[%c0_26, %c0_27, %c0_28, %c0_29], %41 {strides = array<i32>} : memref<1x1x8x128xf32, #tpu.memory_space<vmem>>, vector<1x1x8x128xf32>,
    } else {
    }
    return
  }
  func.func @transform_0(%arg0: i32, %arg1: i32, %arg2: i32) -> (i32, i32, i32, i32) {
    %0 = arith.addi %arg1, %arg2 : i32
    %c0_i32 = arith.constant 0 : i32
    %c0_i32_0 = arith.constant 0 : i32
    %c0_i32_1 = arith.constant 0 : i32
    return %arg0, %0, %c0_i32, %c0_i32_0 : i32, i32, i32, i32
  }
  func.func @transform_1(%arg0: i32, %arg1: i32, %arg2: i32) -> (i32, i32, i32) {
    %c0_i32 = arith.constant 0 : i32
    %c0_i32_0 = arith.constant 0 : i32
    %c0_i32_1 = arith.constant 0 : i32
    %c0_i32_2 = arith.constant 0 : i32
    return %c0_i32, %c0_i32_0, %c0_i32_1 : i32, i32, i32
  }
  func.func @transform_2(%arg0: i32, %arg1: i32, %arg2: i32) -> (i32, i32) {
    %c0_i32 = arith.constant 0 : i32
    %c0_i32_0 = arith.constant 0 : i32
    %c0_i32_1 = arith.constant 0 : i32
    return %c0_i32, %c0_i32_0 : i32, i32
  }
  func.func @transform_3(%arg0: i32, %arg1: i32, %arg2: i32) -> (i32, i32) {
    %c0_i32 = arith.constant 0 : i32
    %c0_i32_0 = arith.constant 0 : i32
    %c0_i32_1 = arith.constant 0 : i32
    return %c0_i32, %c0_i32_0 : i32, i32
  }
  func.func @transform_4(%arg0: i32, %arg1: i32, %arg2: i32) -> (i32, i32, i32, i32) {
    %c0_i32 = arith.constant 0 : i32
    %c0_i32_0 = arith.constant 0 : i32
    %c0_i32_1 = arith.constant 0 : i32
    return %arg0, %arg1, %c0_i32, %c0_i32_0 : i32, i32, i32, i32
  }
}

module attributes {stable_mosaic.version = 11 : i64} {
  func.func @_conv3x3_row_kernel(%arg0: i32, %arg1: i32, %arg2: i32, %arg3: memref<1x1x18x20xbf16, #tpu.memory_space<vmem>>, %arg4: memref<3x60x128xbf16, #tpu.memory_space<vmem>>, %arg5: memref<1x128xf32, #tpu.memory_space<vmem>>, %arg6: memref<1x128xf32, #tpu.memory_space<vmem>>, %arg7: memref<1x1x16x128xf32, #tpu.memory_space<vmem>>) attributes {dimension_semantics = [#tpu.dimension_semantics<parallel>, #tpu.dimension_semantics<parallel>, #tpu.dimension_semantics<arbitrary>], iteration_bounds = array<i64: 2, 16, 3>, scalar_prefetch = 0 : i64, scratch_operands = 0 : i64, tpu.core_type = #tpu.core_type<tc>, window_params = [{transform_indices = @transform_0, window_bounds = array<i64: 1, 1, 18, 20>}, {pipeline_mode = #tpu.pipeline_mode<synchronous>, transform_indices = @transform_1, window_bounds = array<i64: 3, 60, 128>}, {pipeline_mode = #tpu.pipeline_mode<synchronous>, transform_indices = @transform_2, window_bounds = array<i64: 1, 128>}, {pipeline_mode = #tpu.pipeline_mode<synchronous>, transform_indices = @transform_3, window_bounds = array<i64: 1, 128>}, {transform_indices = @transform_4, window_bounds = array<i64: 1, 1, 16, 128>}]} {
    %c0_i32 = arith.constant 0 : i32
    %0 = arith.cmpi eq, %arg2, %c0_i32 : i32
    %1 = arith.extui %0 : i1 to i32
    %c0_i32_0 = arith.constant 0 : i32
    %2 = arith.cmpi ne, %1, %c0_i32_0 : i32
    scf.if %2 {
      %cst_17 = arith.constant 0.000000e+00 : f32
      %28 = vector.broadcast %cst_17 : f32 to vector<16x128xf32>
      %c0_18 = arith.constant 0 : index
      %c0_19 = arith.constant 0 : index
      %c0_20 = arith.constant 0 : index
      %c0_21 = arith.constant 0 : index
      %29 = vector.load %arg7[%c0_18, %c0_19, %c0_20, %c0_21] : memref<1x1x16x128xf32, #tpu.memory_space<vmem>>, vector<1x1x16x128xf32>
      %30 = vector.shape_cast %29 : vector<1x1x16x128xf32> to vector<16x128xf32>
      %31 = vector.shape_cast %28 : vector<16x128xf32> to vector<1x1x16x128xf32>
      tpu.vector_store %arg7[%c0_18, %c0_19, %c0_20, %c0_21], %31 {strides = array<i32>} : memref<1x1x16x128xf32, #tpu.memory_space<vmem>>, vector<1x1x16x128xf32>,
    } else {
    }
    %c0 = arith.constant 0 : index
    %c0_1 = arith.constant 0 : index
    %c0_2 = arith.constant 0 : index
    %c0_3 = arith.constant 0 : index
    %3 = vector.load %arg3[%c0, %c0_1, %c0_2, %c0_3] : memref<1x1x18x20xbf16, #tpu.memory_space<vmem>>, vector<1x1x18x20xbf16>
    %4 = vector.shape_cast %3 : vector<1x1x18x20xbf16> to vector<18x20xbf16>
    %5 = arith.index_cast %arg2 : i32 to index
    %c0_4 = arith.constant 0 : index
    %c0_5 = arith.constant 0 : index
    %6 = vector.load %arg4[%5, %c0_4, %c0_5] : memref<3x60x128xbf16, #tpu.memory_space<vmem>>, vector<1x60x128xbf16>
    %7 = vector.shape_cast %6 : vector<1x60x128xbf16> to vector<60x128xbf16>
    %c0_6 = arith.constant 0 : index
    %c0_7 = arith.constant 0 : index
    %c0_8 = arith.constant 0 : index
    %c0_9 = arith.constant 0 : index
    %8 = vector.load %arg7[%c0_6, %c0_7, %c0_8, %c0_9] : memref<1x1x16x128xf32, #tpu.memory_space<vmem>>, vector<1x1x16x128xf32>
    %9 = vector.shape_cast %8 : vector<1x1x16x128xf32> to vector<16x128xf32>
    %10 = vector.extract_strided_slice %4 {offsets = [0, 0], sizes = [16, 20], strides = [1, 1]} : vector<18x20xbf16> to vector<16x20xbf16>
    %11 = vector.extract_strided_slice %7 {offsets = [0, 0], sizes = [20, 128], strides = [1, 1]} : vector<60x128xbf16> to vector<20x128xbf16>
    %cst = arith.constant dense<0.000000e+00> : vector<16x128xf32>
    %12 = tpu.matmul %10, %11, %cst {dimension_numbers = #tpu.dot_dimension_numbers<[1], [0], [0], [1], [0, 0, 1, 1], [], []>} : vector<16x20xbf16>, vector<20x128xbf16>, vector<16x128xf32> -> vector<16x128xf32>
    %13 = arith.addf %9, %12 : vector<16x128xf32>
    %14 = vector.extract_strided_slice %4 {offsets = [1, 0], sizes = [16, 20], strides = [1, 1]} : vector<18x20xbf16> to vector<16x20xbf16>
    %15 = vector.extract_strided_slice %7 {offsets = [20, 0], sizes = [20, 128], strides = [1, 1]} : vector<60x128xbf16> to vector<20x128xbf16>
    %cst_10 = arith.constant dense<0.000000e+00> : vector<16x128xf32>
    %16 = tpu.matmul %14, %15, %cst_10 {dimension_numbers = #tpu.dot_dimension_numbers<[1], [0], [0], [1], [0, 0, 1, 1], [], []>} : vector<16x20xbf16>, vector<20x128xbf16>, vector<16x128xf32> -> vector<16x128xf32>
    %17 = arith.addf %13, %16 : vector<16x128xf32>
    %18 = vector.extract_strided_slice %4 {offsets = [2, 0], sizes = [16, 20], strides = [1, 1]} : vector<18x20xbf16> to vector<16x20xbf16>
    %19 = vector.extract_strided_slice %7 {offsets = [40, 0], sizes = [20, 128], strides = [1, 1]} : vector<60x128xbf16> to vector<20x128xbf16>
    %cst_11 = arith.constant dense<0.000000e+00> : vector<16x128xf32>
    %20 = tpu.matmul %18, %19, %cst_11 {dimension_numbers = #tpu.dot_dimension_numbers<[1], [0], [0], [1], [0, 0, 1, 1], [], []>} : vector<16x20xbf16>, vector<20x128xbf16>, vector<16x128xf32> -> vector<16x128xf32>
    %21 = arith.addf %17, %20 : vector<16x128xf32>
    %c0_12 = arith.constant 0 : index
    %c0_13 = arith.constant 0 : index
    %c0_14 = arith.constant 0 : index
    %c0_15 = arith.constant 0 : index
    %22 = vector.load %arg7[%c0_12, %c0_13, %c0_14, %c0_15] : memref<1x1x16x128xf32, #tpu.memory_space<vmem>>, vector<1x1x16x128xf32>
    %23 = vector.shape_cast %22 : vector<1x1x16x128xf32> to vector<16x128xf32>
    %24 = vector.shape_cast %21 : vector<16x128xf32> to vector<1x1x16x128xf32>
    tpu.vector_store %arg7[%c0_12, %c0_13, %c0_14, %c0_15], %24 {strides = array<i32>} : memref<1x1x16x128xf32, #tpu.memory_space<vmem>>, vector<1x1x16x128xf32>,
    %c2_i32 = arith.constant 2 : i32
    %25 = arith.cmpi eq, %arg2, %c2_i32 : i32
    %26 = arith.extui %25 : i1 to i32
    %c0_i32_16 = arith.constant 0 : i32
    %27 = arith.cmpi ne, %26, %c0_i32_16 : i32
    scf.if %27 {
      %c0_17 = arith.constant 0 : index
      %c0_18 = arith.constant 0 : index
      %c0_19 = arith.constant 0 : index
      %c0_20 = arith.constant 0 : index
      %28 = vector.load %arg7[%c0_17, %c0_18, %c0_19, %c0_20] : memref<1x1x16x128xf32, #tpu.memory_space<vmem>>, vector<1x1x16x128xf32>
      %29 = vector.shape_cast %28 : vector<1x1x16x128xf32> to vector<16x128xf32>
      %c0_21 = arith.constant 0 : index
      %c0_22 = arith.constant 0 : index
      %30 = vector.load %arg5[%c0_21, %c0_22] : memref<1x128xf32, #tpu.memory_space<vmem>>, vector<1x128xf32>
      %31 = vector.broadcast %30 : vector<1x128xf32> to vector<16x128xf32>
      %32 = arith.addf %29, %31 : vector<16x128xf32>
      %cst_23 = arith.constant 0.000000e+00 : f32
      %33 = vector.broadcast %cst_23 : f32 to vector<16x128xf32>
      %34 = arith.cmpf oge, %32, %33 : vector<16x128xf32>
      %c0_24 = arith.constant 0 : index
      %c0_25 = arith.constant 0 : index
      %35 = vector.load %arg6[%c0_24, %c0_25] : memref<1x128xf32, #tpu.memory_space<vmem>>, vector<1x128xf32>
      %36 = vector.broadcast %35 : vector<1x128xf32> to vector<16x128xf32>
      %37 = arith.mulf %36, %32 : vector<16x128xf32>
      %38 = arith.select %34, %32, %37 : vector<16x128xi1>, vector<16x128xf32>
      %c0_26 = arith.constant 0 : index
      %c0_27 = arith.constant 0 : index
      %c0_28 = arith.constant 0 : index
      %c0_29 = arith.constant 0 : index
      %39 = vector.load %arg7[%c0_26, %c0_27, %c0_28, %c0_29] : memref<1x1x16x128xf32, #tpu.memory_space<vmem>>, vector<1x1x16x128xf32>
      %40 = vector.shape_cast %39 : vector<1x1x16x128xf32> to vector<16x128xf32>
      %41 = vector.shape_cast %38 : vector<16x128xf32> to vector<1x1x16x128xf32>
      tpu.vector_store %arg7[%c0_26, %c0_27, %c0_28, %c0_29], %41 {strides = array<i32>} : memref<1x1x16x128xf32, #tpu.memory_space<vmem>>, vector<1x1x16x128xf32>,
    } else {
    }
    return
  }
  func.func @transform_0(%arg0: i32, %arg1: i32, %arg2: i32) -> (i32, i32, i32, i32) {
    %0 = arith.addi %arg1, %arg2 : i32
    %c0_i32 = arith.constant 0 : i32
    %c0_i32_0 = arith.constant 0 : i32
    %c0_i32_1 = arith.constant 0 : i32
    return %arg0, %0, %c0_i32, %c0_i32_0 : i32, i32, i32, i32
  }
  func.func @transform_1(%arg0: i32, %arg1: i32, %arg2: i32) -> (i32, i32, i32) {
    %c0_i32 = arith.constant 0 : i32
    %c0_i32_0 = arith.constant 0 : i32
    %c0_i32_1 = arith.constant 0 : i32
    %c0_i32_2 = arith.constant 0 : i32
    return %c0_i32, %c0_i32_0, %c0_i32_1 : i32, i32, i32
  }
  func.func @transform_2(%arg0: i32, %arg1: i32, %arg2: i32) -> (i32, i32) {
    %c0_i32 = arith.constant 0 : i32
    %c0_i32_0 = arith.constant 0 : i32
    %c0_i32_1 = arith.constant 0 : i32
    return %c0_i32, %c0_i32_0 : i32, i32
  }
  func.func @transform_3(%arg0: i32, %arg1: i32, %arg2: i32) -> (i32, i32) {
    %c0_i32 = arith.constant 0 : i32
    %c0_i32_0 = arith.constant 0 : i32
    %c0_i32_1 = arith.constant 0 : i32
    return %c0_i32, %c0_i32_0 : i32, i32
  }
  func.func @transform_4(%arg0: i32, %arg1: i32, %arg2: i32) -> (i32, i32, i32, i32) {
    %c0_i32 = arith.constant 0 : i32
    %c0_i32_0 = arith.constant 0 : i32
    %c0_i32_1 = arith.constant 0 : i32
    return %arg0, %arg1, %c0_i32, %c0_i32_0 : i32, i32, i32, i32
  }
}

module attributes {stable_mosaic.version = 11 : i64} {
  func.func @_conv3x3_row_kernel(%arg0: i32, %arg1: i32, %arg2: i32, %arg3: memref<1x1x34x12xbf16, #tpu.memory_space<vmem>>, %arg4: memref<3x36x128xbf16, #tpu.memory_space<vmem>>, %arg5: memref<1x128xf32, #tpu.memory_space<vmem>>, %arg6: memref<1x128xf32, #tpu.memory_space<vmem>>, %arg7: memref<1x1x32x128xf32, #tpu.memory_space<vmem>>) attributes {dimension_semantics = [#tpu.dimension_semantics<parallel>, #tpu.dimension_semantics<parallel>, #tpu.dimension_semantics<arbitrary>], iteration_bounds = array<i64: 2, 32, 3>, scalar_prefetch = 0 : i64, scratch_operands = 0 : i64, tpu.core_type = #tpu.core_type<tc>, window_params = [{transform_indices = @transform_0, window_bounds = array<i64: 1, 1, 34, 12>}, {pipeline_mode = #tpu.pipeline_mode<synchronous>, transform_indices = @transform_1, window_bounds = array<i64: 3, 36, 128>}, {pipeline_mode = #tpu.pipeline_mode<synchronous>, transform_indices = @transform_2, window_bounds = array<i64: 1, 128>}, {pipeline_mode = #tpu.pipeline_mode<synchronous>, transform_indices = @transform_3, window_bounds = array<i64: 1, 128>}, {transform_indices = @transform_4, window_bounds = array<i64: 1, 1, 32, 128>}]} {
    %c0_i32 = arith.constant 0 : i32
    %0 = arith.cmpi eq, %arg2, %c0_i32 : i32
    %1 = arith.extui %0 : i1 to i32
    %c0_i32_0 = arith.constant 0 : i32
    %2 = arith.cmpi ne, %1, %c0_i32_0 : i32
    scf.if %2 {
      %cst_17 = arith.constant 0.000000e+00 : f32
      %28 = vector.broadcast %cst_17 : f32 to vector<32x128xf32>
      %c0_18 = arith.constant 0 : index
      %c0_19 = arith.constant 0 : index
      %c0_20 = arith.constant 0 : index
      %c0_21 = arith.constant 0 : index
      %29 = vector.load %arg7[%c0_18, %c0_19, %c0_20, %c0_21] : memref<1x1x32x128xf32, #tpu.memory_space<vmem>>, vector<1x1x32x128xf32>
      %30 = vector.shape_cast %29 : vector<1x1x32x128xf32> to vector<32x128xf32>
      %31 = vector.shape_cast %28 : vector<32x128xf32> to vector<1x1x32x128xf32>
      tpu.vector_store %arg7[%c0_18, %c0_19, %c0_20, %c0_21], %31 {strides = array<i32>} : memref<1x1x32x128xf32, #tpu.memory_space<vmem>>, vector<1x1x32x128xf32>,
    } else {
    }
    %c0 = arith.constant 0 : index
    %c0_1 = arith.constant 0 : index
    %c0_2 = arith.constant 0 : index
    %c0_3 = arith.constant 0 : index
    %3 = vector.load %arg3[%c0, %c0_1, %c0_2, %c0_3] : memref<1x1x34x12xbf16, #tpu.memory_space<vmem>>, vector<1x1x34x12xbf16>
    %4 = vector.shape_cast %3 : vector<1x1x34x12xbf16> to vector<34x12xbf16>
    %5 = arith.index_cast %arg2 : i32 to index
    %c0_4 = arith.constant 0 : index
    %c0_5 = arith.constant 0 : index
    %6 = vector.load %arg4[%5, %c0_4, %c0_5] : memref<3x36x128xbf16, #tpu.memory_space<vmem>>, vector<1x36x128xbf16>
    %7 = vector.shape_cast %6 : vector<1x36x128xbf16> to vector<36x128xbf16>
    %c0_6 = arith.constant 0 : index
    %c0_7 = arith.constant 0 : index
    %c0_8 = arith.constant 0 : index
    %c0_9 = arith.constant 0 : index
    %8 = vector.load %arg7[%c0_6, %c0_7, %c0_8, %c0_9] : memref<1x1x32x128xf32, #tpu.memory_space<vmem>>, vector<1x1x32x128xf32>
    %9 = vector.shape_cast %8 : vector<1x1x32x128xf32> to vector<32x128xf32>
    %10 = vector.extract_strided_slice %4 {offsets = [0, 0], sizes = [32, 12], strides = [1, 1]} : vector<34x12xbf16> to vector<32x12xbf16>
    %11 = vector.extract_strided_slice %7 {offsets = [0, 0], sizes = [12, 128], strides = [1, 1]} : vector<36x128xbf16> to vector<12x128xbf16>
    %cst = arith.constant dense<0.000000e+00> : vector<32x128xf32>
    %12 = tpu.matmul %10, %11, %cst {dimension_numbers = #tpu.dot_dimension_numbers<[1], [0], [0], [1], [0, 0, 1, 1], [], []>} : vector<32x12xbf16>, vector<12x128xbf16>, vector<32x128xf32> -> vector<32x128xf32>
    %13 = arith.addf %9, %12 : vector<32x128xf32>
    %14 = vector.extract_strided_slice %4 {offsets = [1, 0], sizes = [32, 12], strides = [1, 1]} : vector<34x12xbf16> to vector<32x12xbf16>
    %15 = vector.extract_strided_slice %7 {offsets = [12, 0], sizes = [12, 128], strides = [1, 1]} : vector<36x128xbf16> to vector<12x128xbf16>
    %cst_10 = arith.constant dense<0.000000e+00> : vector<32x128xf32>
    %16 = tpu.matmul %14, %15, %cst_10 {dimension_numbers = #tpu.dot_dimension_numbers<[1], [0], [0], [1], [0, 0, 1, 1], [], []>} : vector<32x12xbf16>, vector<12x128xbf16>, vector<32x128xf32> -> vector<32x128xf32>
    %17 = arith.addf %13, %16 : vector<32x128xf32>
    %18 = vector.extract_strided_slice %4 {offsets = [2, 0], sizes = [32, 12], strides = [1, 1]} : vector<34x12xbf16> to vector<32x12xbf16>
    %19 = vector.extract_strided_slice %7 {offsets = [24, 0], sizes = [12, 128], strides = [1, 1]} : vector<36x128xbf16> to vector<12x128xbf16>
    %cst_11 = arith.constant dense<0.000000e+00> : vector<32x128xf32>
    %20 = tpu.matmul %18, %19, %cst_11 {dimension_numbers = #tpu.dot_dimension_numbers<[1], [0], [0], [1], [0, 0, 1, 1], [], []>} : vector<32x12xbf16>, vector<12x128xbf16>, vector<32x128xf32> -> vector<32x128xf32>
    %21 = arith.addf %17, %20 : vector<32x128xf32>
    %c0_12 = arith.constant 0 : index
    %c0_13 = arith.constant 0 : index
    %c0_14 = arith.constant 0 : index
    %c0_15 = arith.constant 0 : index
    %22 = vector.load %arg7[%c0_12, %c0_13, %c0_14, %c0_15] : memref<1x1x32x128xf32, #tpu.memory_space<vmem>>, vector<1x1x32x128xf32>
    %23 = vector.shape_cast %22 : vector<1x1x32x128xf32> to vector<32x128xf32>
    %24 = vector.shape_cast %21 : vector<32x128xf32> to vector<1x1x32x128xf32>
    tpu.vector_store %arg7[%c0_12, %c0_13, %c0_14, %c0_15], %24 {strides = array<i32>} : memref<1x1x32x128xf32, #tpu.memory_space<vmem>>, vector<1x1x32x128xf32>,
    %c2_i32 = arith.constant 2 : i32
    %25 = arith.cmpi eq, %arg2, %c2_i32 : i32
    %26 = arith.extui %25 : i1 to i32
    %c0_i32_16 = arith.constant 0 : i32
    %27 = arith.cmpi ne, %26, %c0_i32_16 : i32
    scf.if %27 {
      %c0_17 = arith.constant 0 : index
      %c0_18 = arith.constant 0 : index
      %c0_19 = arith.constant 0 : index
      %c0_20 = arith.constant 0 : index
      %28 = vector.load %arg7[%c0_17, %c0_18, %c0_19, %c0_20] : memref<1x1x32x128xf32, #tpu.memory_space<vmem>>, vector<1x1x32x128xf32>
      %29 = vector.shape_cast %28 : vector<1x1x32x128xf32> to vector<32x128xf32>
      %c0_21 = arith.constant 0 : index
      %c0_22 = arith.constant 0 : index
      %30 = vector.load %arg5[%c0_21, %c0_22] : memref<1x128xf32, #tpu.memory_space<vmem>>, vector<1x128xf32>
      %31 = vector.broadcast %30 : vector<1x128xf32> to vector<32x128xf32>
      %32 = arith.addf %29, %31 : vector<32x128xf32>
      %cst_23 = arith.constant 0.000000e+00 : f32
      %33 = vector.broadcast %cst_23 : f32 to vector<32x128xf32>
      %34 = arith.cmpf oge, %32, %33 : vector<32x128xf32>
      %c0_24 = arith.constant 0 : index
      %c0_25 = arith.constant 0 : index
      %35 = vector.load %arg6[%c0_24, %c0_25] : memref<1x128xf32, #tpu.memory_space<vmem>>, vector<1x128xf32>
      %36 = vector.broadcast %35 : vector<1x128xf32> to vector<32x128xf32>
      %37 = arith.mulf %36, %32 : vector<32x128xf32>
      %38 = arith.select %34, %32, %37 : vector<32x128xi1>, vector<32x128xf32>
      %c0_26 = arith.constant 0 : index
      %c0_27 = arith.constant 0 : index
      %c0_28 = arith.constant 0 : index
      %c0_29 = arith.constant 0 : index
      %39 = vector.load %arg7[%c0_26, %c0_27, %c0_28, %c0_29] : memref<1x1x32x128xf32, #tpu.memory_space<vmem>>, vector<1x1x32x128xf32>
      %40 = vector.shape_cast %39 : vector<1x1x32x128xf32> to vector<32x128xf32>
      %41 = vector.shape_cast %38 : vector<32x128xf32> to vector<1x1x32x128xf32>
      tpu.vector_store %arg7[%c0_26, %c0_27, %c0_28, %c0_29], %41 {strides = array<i32>} : memref<1x1x32x128xf32, #tpu.memory_space<vmem>>, vector<1x1x32x128xf32>,
    } else {
    }
    return
  }
  func.func @transform_0(%arg0: i32, %arg1: i32, %arg2: i32) -> (i32, i32, i32, i32) {
    %0 = arith.addi %arg1, %arg2 : i32
    %c0_i32 = arith.constant 0 : i32
    %c0_i32_0 = arith.constant 0 : i32
    %c0_i32_1 = arith.constant 0 : i32
    return %arg0, %0, %c0_i32, %c0_i32_0 : i32, i32, i32, i32
  }
  func.func @transform_1(%arg0: i32, %arg1: i32, %arg2: i32) -> (i32, i32, i32) {
    %c0_i32 = arith.constant 0 : i32
    %c0_i32_0 = arith.constant 0 : i32
    %c0_i32_1 = arith.constant 0 : i32
    %c0_i32_2 = arith.constant 0 : i32
    return %c0_i32, %c0_i32_0, %c0_i32_1 : i32, i32, i32
  }
  func.func @transform_2(%arg0: i32, %arg1: i32, %arg2: i32) -> (i32, i32) {
    %c0_i32 = arith.constant 0 : i32
    %c0_i32_0 = arith.constant 0 : i32
    %c0_i32_1 = arith.constant 0 : i32
    return %c0_i32, %c0_i32_0 : i32, i32
  }
  func.func @transform_3(%arg0: i32, %arg1: i32, %arg2: i32) -> (i32, i32) {
    %c0_i32 = arith.constant 0 : i32
    %c0_i32_0 = arith.constant 0 : i32
    %c0_i32_1 = arith.constant 0 : i32
    return %c0_i32, %c0_i32_0 : i32, i32
  }
  func.func @transform_4(%arg0: i32, %arg1: i32, %arg2: i32) -> (i32, i32, i32, i32) {
    %c0_i32 = arith.constant 0 : i32
    %c0_i32_0 = arith.constant 0 : i32
    %c0_i32_1 = arith.constant 0 : i32
    return %arg0, %arg1, %c0_i32, %c0_i32_0 : i32, i32, i32, i32
  }
}

module attributes {stable_mosaic.version = 11 : i64} {
  func.func @_conv3x3_row_kernel(%arg0: i32, %arg1: i32, %arg2: i32, %arg3: memref<1x1x34x4xbf16, #tpu.memory_space<vmem>>, %arg4: memref<3x12x128xbf16, #tpu.memory_space<vmem>>, %arg5: memref<1x128xf32, #tpu.memory_space<vmem>>, %arg6: memref<1x128xf32, #tpu.memory_space<vmem>>, %arg7: memref<1x1x32x128xf32, #tpu.memory_space<vmem>>) attributes {dimension_semantics = [#tpu.dimension_semantics<parallel>, #tpu.dimension_semantics<parallel>, #tpu.dimension_semantics<arbitrary>], iteration_bounds = array<i64: 2, 32, 3>, scalar_prefetch = 0 : i64, scratch_operands = 0 : i64, tpu.core_type = #tpu.core_type<tc>, window_params = [{transform_indices = @transform_0, window_bounds = array<i64: 1, 1, 34, 4>}, {pipeline_mode = #tpu.pipeline_mode<synchronous>, transform_indices = @transform_1, window_bounds = array<i64: 3, 12, 128>}, {pipeline_mode = #tpu.pipeline_mode<synchronous>, transform_indices = @transform_2, window_bounds = array<i64: 1, 128>}, {pipeline_mode = #tpu.pipeline_mode<synchronous>, transform_indices = @transform_3, window_bounds = array<i64: 1, 128>}, {transform_indices = @transform_4, window_bounds = array<i64: 1, 1, 32, 128>}]} {
    %c0_i32 = arith.constant 0 : i32
    %0 = arith.cmpi eq, %arg2, %c0_i32 : i32
    %1 = arith.extui %0 : i1 to i32
    %c0_i32_0 = arith.constant 0 : i32
    %2 = arith.cmpi ne, %1, %c0_i32_0 : i32
    scf.if %2 {
      %cst_17 = arith.constant 0.000000e+00 : f32
      %28 = vector.broadcast %cst_17 : f32 to vector<32x128xf32>
      %c0_18 = arith.constant 0 : index
      %c0_19 = arith.constant 0 : index
      %c0_20 = arith.constant 0 : index
      %c0_21 = arith.constant 0 : index
      %29 = vector.load %arg7[%c0_18, %c0_19, %c0_20, %c0_21] : memref<1x1x32x128xf32, #tpu.memory_space<vmem>>, vector<1x1x32x128xf32>
      %30 = vector.shape_cast %29 : vector<1x1x32x128xf32> to vector<32x128xf32>
      %31 = vector.shape_cast %28 : vector<32x128xf32> to vector<1x1x32x128xf32>
      tpu.vector_store %arg7[%c0_18, %c0_19, %c0_20, %c0_21], %31 {strides = array<i32>} : memref<1x1x32x128xf32, #tpu.memory_space<vmem>>, vector<1x1x32x128xf32>,
    } else {
    }
    %c0 = arith.constant 0 : index
    %c0_1 = arith.constant 0 : index
    %c0_2 = arith.constant 0 : index
    %c0_3 = arith.constant 0 : index
    %3 = vector.load %arg3[%c0, %c0_1, %c0_2, %c0_3] : memref<1x1x34x4xbf16, #tpu.memory_space<vmem>>, vector<1x1x34x4xbf16>
    %4 = vector.shape_cast %3 : vector<1x1x34x4xbf16> to vector<34x4xbf16>
    %5 = arith.index_cast %arg2 : i32 to index
    %c0_4 = arith.constant 0 : index
    %c0_5 = arith.constant 0 : index
    %6 = vector.load %arg4[%5, %c0_4, %c0_5] : memref<3x12x128xbf16, #tpu.memory_space<vmem>>, vector<1x12x128xbf16>
    %7 = vector.shape_cast %6 : vector<1x12x128xbf16> to vector<12x128xbf16>
    %c0_6 = arith.constant 0 : index
    %c0_7 = arith.constant 0 : index
    %c0_8 = arith.constant 0 : index
    %c0_9 = arith.constant 0 : index
    %8 = vector.load %arg7[%c0_6, %c0_7, %c0_8, %c0_9] : memref<1x1x32x128xf32, #tpu.memory_space<vmem>>, vector<1x1x32x128xf32>
    %9 = vector.shape_cast %8 : vector<1x1x32x128xf32> to vector<32x128xf32>
    %10 = vector.extract_strided_slice %4 {offsets = [0, 0], sizes = [32, 4], strides = [1, 1]} : vector<34x4xbf16> to vector<32x4xbf16>
    %11 = vector.extract_strided_slice %7 {offsets = [0, 0], sizes = [4, 128], strides = [1, 1]} : vector<12x128xbf16> to vector<4x128xbf16>
    %cst = arith.constant dense<0.000000e+00> : vector<32x128xf32>
    %12 = tpu.matmul %10, %11, %cst {dimension_numbers = #tpu.dot_dimension_numbers<[1], [0], [0], [1], [0, 0, 1, 1], [], []>} : vector<32x4xbf16>, vector<4x128xbf16>, vector<32x128xf32> -> vector<32x128xf32>
    %13 = arith.addf %9, %12 : vector<32x128xf32>
    %14 = vector.extract_strided_slice %4 {offsets = [1, 0], sizes = [32, 4], strides = [1, 1]} : vector<34x4xbf16> to vector<32x4xbf16>
    %15 = vector.extract_strided_slice %7 {offsets = [4, 0], sizes = [4, 128], strides = [1, 1]} : vector<12x128xbf16> to vector<4x128xbf16>
    %cst_10 = arith.constant dense<0.000000e+00> : vector<32x128xf32>
    %16 = tpu.matmul %14, %15, %cst_10 {dimension_numbers = #tpu.dot_dimension_numbers<[1], [0], [0], [1], [0, 0, 1, 1], [], []>} : vector<32x4xbf16>, vector<4x128xbf16>, vector<32x128xf32> -> vector<32x128xf32>
    %17 = arith.addf %13, %16 : vector<32x128xf32>
    %18 = vector.extract_strided_slice %4 {offsets = [2, 0], sizes = [32, 4], strides = [1, 1]} : vector<34x4xbf16> to vector<32x4xbf16>
    %19 = vector.extract_strided_slice %7 {offsets = [8, 0], sizes = [4, 128], strides = [1, 1]} : vector<12x128xbf16> to vector<4x128xbf16>
    %cst_11 = arith.constant dense<0.000000e+00> : vector<32x128xf32>
    %20 = tpu.matmul %18, %19, %cst_11 {dimension_numbers = #tpu.dot_dimension_numbers<[1], [0], [0], [1], [0, 0, 1, 1], [], []>} : vector<32x4xbf16>, vector<4x128xbf16>, vector<32x128xf32> -> vector<32x128xf32>
    %21 = arith.addf %17, %20 : vector<32x128xf32>
    %c0_12 = arith.constant 0 : index
    %c0_13 = arith.constant 0 : index
    %c0_14 = arith.constant 0 : index
    %c0_15 = arith.constant 0 : index
    %22 = vector.load %arg7[%c0_12, %c0_13, %c0_14, %c0_15] : memref<1x1x32x128xf32, #tpu.memory_space<vmem>>, vector<1x1x32x128xf32>
    %23 = vector.shape_cast %22 : vector<1x1x32x128xf32> to vector<32x128xf32>
    %24 = vector.shape_cast %21 : vector<32x128xf32> to vector<1x1x32x128xf32>
    tpu.vector_store %arg7[%c0_12, %c0_13, %c0_14, %c0_15], %24 {strides = array<i32>} : memref<1x1x32x128xf32, #tpu.memory_space<vmem>>, vector<1x1x32x128xf32>,
    %c2_i32 = arith.constant 2 : i32
    %25 = arith.cmpi eq, %arg2, %c2_i32 : i32
    %26 = arith.extui %25 : i1 to i32
    %c0_i32_16 = arith.constant 0 : i32
    %27 = arith.cmpi ne, %26, %c0_i32_16 : i32
    scf.if %27 {
      %c0_17 = arith.constant 0 : index
      %c0_18 = arith.constant 0 : index
      %c0_19 = arith.constant 0 : index
      %c0_20 = arith.constant 0 : index
      %28 = vector.load %arg7[%c0_17, %c0_18, %c0_19, %c0_20] : memref<1x1x32x128xf32, #tpu.memory_space<vmem>>, vector<1x1x32x128xf32>
      %29 = vector.shape_cast %28 : vector<1x1x32x128xf32> to vector<32x128xf32>
      %c0_21 = arith.constant 0 : index
      %c0_22 = arith.constant 0 : index
      %30 = vector.load %arg5[%c0_21, %c0_22] : memref<1x128xf32, #tpu.memory_space<vmem>>, vector<1x128xf32>
      %31 = vector.broadcast %30 : vector<1x128xf32> to vector<32x128xf32>
      %32 = arith.addf %29, %31 : vector<32x128xf32>
      %cst_23 = arith.constant 0.000000e+00 : f32
      %33 = vector.broadcast %cst_23 : f32 to vector<32x128xf32>
      %34 = arith.cmpf oge, %32, %33 : vector<32x128xf32>
      %c0_24 = arith.constant 0 : index
      %c0_25 = arith.constant 0 : index
      %35 = vector.load %arg6[%c0_24, %c0_25] : memref<1x128xf32, #tpu.memory_space<vmem>>, vector<1x128xf32>
      %36 = vector.broadcast %35 : vector<1x128xf32> to vector<32x128xf32>
      %37 = arith.mulf %36, %32 : vector<32x128xf32>
      %38 = arith.select %34, %32, %37 : vector<32x128xi1>, vector<32x128xf32>
      %c0_26 = arith.constant 0 : index
      %c0_27 = arith.constant 0 : index
      %c0_28 = arith.constant 0 : index
      %c0_29 = arith.constant 0 : index
      %39 = vector.load %arg7[%c0_26, %c0_27, %c0_28, %c0_29] : memref<1x1x32x128xf32, #tpu.memory_space<vmem>>, vector<1x1x32x128xf32>
      %40 = vector.shape_cast %39 : vector<1x1x32x128xf32> to vector<32x128xf32>
      %41 = vector.shape_cast %38 : vector<32x128xf32> to vector<1x1x32x128xf32>
      tpu.vector_store %arg7[%c0_26, %c0_27, %c0_28, %c0_29], %41 {strides = array<i32>} : memref<1x1x32x128xf32, #tpu.memory_space<vmem>>, vector<1x1x32x128xf32>,
    } else {
    }
    return
  }
  func.func @transform_0(%arg0: i32, %arg1: i32, %arg2: i32) -> (i32, i32, i32, i32) {
    %0 = arith.addi %arg1, %arg2 : i32
    %c0_i32 = arith.constant 0 : i32
    %c0_i32_0 = arith.constant 0 : i32
    %c0_i32_1 = arith.constant 0 : i32
    return %arg0, %0, %c0_i32, %c0_i32_0 : i32, i32, i32, i32
  }
  func.func @transform_1(%arg0: i32, %arg1: i32, %arg2: i32) -> (i32, i32, i32) {
    %c0_i32 = arith.constant 0 : i32
    %c0_i32_0 = arith.constant 0 : i32
    %c0_i32_1 = arith.constant 0 : i32
    %c0_i32_2 = arith.constant 0 : i32
    return %c0_i32, %c0_i32_0, %c0_i32_1 : i32, i32, i32
  }
  func.func @transform_2(%arg0: i32, %arg1: i32, %arg2: i32) -> (i32, i32) {
    %c0_i32 = arith.constant 0 : i32
    %c0_i32_0 = arith.constant 0 : i32
    %c0_i32_1 = arith.constant 0 : i32
    return %c0_i32, %c0_i32_0 : i32, i32
  }
  func.func @transform_3(%arg0: i32, %arg1: i32, %arg2: i32) -> (i32, i32) {
    %c0_i32 = arith.constant 0 : i32
    %c0_i32_0 = arith.constant 0 : i32
    %c0_i32_1 = arith.constant 0 : i32
    return %c0_i32, %c0_i32_0 : i32, i32
  }
  func.func @transform_4(%arg0: i32, %arg1: i32, %arg2: i32) -> (i32, i32, i32, i32) {
    %c0_i32 = arith.constant 0 : i32
    %c0_i32_0 = arith.constant 0 : i32
    %c0_i32_1 = arith.constant 0 : i32
    return %arg0, %arg1, %c0_i32, %c0_i32_0 : i32, i32, i32, i32
  }
}

module attributes {stable_mosaic.version = 11 : i64} {
  func.func @_conv3x3_row_kernel(%arg0: i32, %arg1: i32, %arg2: i32, %arg3: memref<1x1x34x4xbf16, #tpu.memory_space<vmem>>, %arg4: memref<3x12x128xbf16, #tpu.memory_space<vmem>>, %arg5: memref<1x128xf32, #tpu.memory_space<vmem>>, %arg6: memref<1x128xf32, #tpu.memory_space<vmem>>, %arg7: memref<1x1x32x128xf32, #tpu.memory_space<vmem>>) attributes {dimension_semantics = [#tpu.dimension_semantics<parallel>, #tpu.dimension_semantics<parallel>, #tpu.dimension_semantics<arbitrary>], iteration_bounds = array<i64: 2, 32, 3>, scalar_prefetch = 0 : i64, scratch_operands = 0 : i64, tpu.core_type = #tpu.core_type<tc>, window_params = [{transform_indices = @transform_0, window_bounds = array<i64: 1, 1, 34, 4>}, {pipeline_mode = #tpu.pipeline_mode<synchronous>, transform_indices = @transform_1, window_bounds = array<i64: 3, 12, 128>}, {pipeline_mode = #tpu.pipeline_mode<synchronous>, transform_indices = @transform_2, window_bounds = array<i64: 1, 128>}, {pipeline_mode = #tpu.pipeline_mode<synchronous>, transform_indices = @transform_3, window_bounds = array<i64: 1, 128>}, {transform_indices = @transform_4, window_bounds = array<i64: 1, 1, 32, 128>}]} {
    %c0_i32 = arith.constant 0 : i32
    %0 = arith.cmpi eq, %arg2, %c0_i32 : i32
    %1 = arith.extui %0 : i1 to i32
    %c0_i32_0 = arith.constant 0 : i32
    %2 = arith.cmpi ne, %1, %c0_i32_0 : i32
    scf.if %2 {
      %cst_17 = arith.constant 0.000000e+00 : f32
      %28 = vector.broadcast %cst_17 : f32 to vector<32x128xf32>
      %c0_18 = arith.constant 0 : index
      %c0_19 = arith.constant 0 : index
      %c0_20 = arith.constant 0 : index
      %c0_21 = arith.constant 0 : index
      %29 = vector.load %arg7[%c0_18, %c0_19, %c0_20, %c0_21] : memref<1x1x32x128xf32, #tpu.memory_space<vmem>>, vector<1x1x32x128xf32>
      %30 = vector.shape_cast %29 : vector<1x1x32x128xf32> to vector<32x128xf32>
      %31 = vector.shape_cast %28 : vector<32x128xf32> to vector<1x1x32x128xf32>
      tpu.vector_store %arg7[%c0_18, %c0_19, %c0_20, %c0_21], %31 {strides = array<i32>} : memref<1x1x32x128xf32, #tpu.memory_space<vmem>>, vector<1x1x32x128xf32>,
    } else {
    }
    %c0 = arith.constant 0 : index
    %c0_1 = arith.constant 0 : index
    %c0_2 = arith.constant 0 : index
    %c0_3 = arith.constant 0 : index
    %3 = vector.load %arg3[%c0, %c0_1, %c0_2, %c0_3] : memref<1x1x34x4xbf16, #tpu.memory_space<vmem>>, vector<1x1x34x4xbf16>
    %4 = vector.shape_cast %3 : vector<1x1x34x4xbf16> to vector<34x4xbf16>
    %5 = arith.index_cast %arg2 : i32 to index
    %c0_4 = arith.constant 0 : index
    %c0_5 = arith.constant 0 : index
    %6 = vector.load %arg4[%5, %c0_4, %c0_5] : memref<3x12x128xbf16, #tpu.memory_space<vmem>>, vector<1x12x128xbf16>
    %7 = vector.shape_cast %6 : vector<1x12x128xbf16> to vector<12x128xbf16>
    %c0_6 = arith.constant 0 : index
    %c0_7 = arith.constant 0 : index
    %c0_8 = arith.constant 0 : index
    %c0_9 = arith.constant 0 : index
    %8 = vector.load %arg7[%c0_6, %c0_7, %c0_8, %c0_9] : memref<1x1x32x128xf32, #tpu.memory_space<vmem>>, vector<1x1x32x128xf32>
    %9 = vector.shape_cast %8 : vector<1x1x32x128xf32> to vector<32x128xf32>
    %10 = vector.extract_strided_slice %4 {offsets = [0, 0], sizes = [32, 4], strides = [1, 1]} : vector<34x4xbf16> to vector<32x4xbf16>
    %11 = vector.extract_strided_slice %7 {offsets = [0, 0], sizes = [4, 128], strides = [1, 1]} : vector<12x128xbf16> to vector<4x128xbf16>
    %cst = arith.constant dense<0.000000e+00> : vector<32x128xf32>
    %12 = tpu.matmul %10, %11, %cst {dimension_numbers = #tpu.dot_dimension_numbers<[1], [0], [0], [1], [0, 0, 1, 1], [], []>} : vector<32x4xbf16>, vector<4x128xbf16>, vector<32x128xf32> -> vector<32x128xf32>
    %13 = arith.addf %9, %12 : vector<32x128xf32>
    %14 = vector.extract_strided_slice %4 {offsets = [1, 0], sizes = [32, 4], strides = [1, 1]} : vector<34x4xbf16> to vector<32x4xbf16>
    %15 = vector.extract_strided_slice %7 {offsets = [4, 0], sizes = [4, 128], strides = [1, 1]} : vector<12x128xbf16> to vector<4x128xbf16>
    %cst_10 = arith.constant dense<0.000000e+00> : vector<32x128xf32>
    %16 = tpu.matmul %14, %15, %cst_10 {dimension_numbers = #tpu.dot_dimension_numbers<[1], [0], [0], [1], [0, 0, 1, 1], [], []>} : vector<32x4xbf16>, vector<4x128xbf16>, vector<32x128xf32> -> vector<32x128xf32>
    %17 = arith.addf %13, %16 : vector<32x128xf32>
    %18 = vector.extract_strided_slice %4 {offsets = [2, 0], sizes = [32, 4], strides = [1, 1]} : vector<34x4xbf16> to vector<32x4xbf16>
    %19 = vector.extract_strided_slice %7 {offsets = [8, 0], sizes = [4, 128], strides = [1, 1]} : vector<12x128xbf16> to vector<4x128xbf16>
    %cst_11 = arith.constant dense<0.000000e+00> : vector<32x128xf32>
    %20 = tpu.matmul %18, %19, %cst_11 {dimension_numbers = #tpu.dot_dimension_numbers<[1], [0], [0], [1], [0, 0, 1, 1], [], []>} : vector<32x4xbf16>, vector<4x128xbf16>, vector<32x128xf32> -> vector<32x128xf32>
    %21 = arith.addf %17, %20 : vector<32x128xf32>
    %c0_12 = arith.constant 0 : index
    %c0_13 = arith.constant 0 : index
    %c0_14 = arith.constant 0 : index
    %c0_15 = arith.constant 0 : index
    %22 = vector.load %arg7[%c0_12, %c0_13, %c0_14, %c0_15] : memref<1x1x32x128xf32, #tpu.memory_space<vmem>>, vector<1x1x32x128xf32>
    %23 = vector.shape_cast %22 : vector<1x1x32x128xf32> to vector<32x128xf32>
    %24 = vector.shape_cast %21 : vector<32x128xf32> to vector<1x1x32x128xf32>
    tpu.vector_store %arg7[%c0_12, %c0_13, %c0_14, %c0_15], %24 {strides = array<i32>} : memref<1x1x32x128xf32, #tpu.memory_space<vmem>>, vector<1x1x32x128xf32>,
    %c2_i32 = arith.constant 2 : i32
    %25 = arith.cmpi eq, %arg2, %c2_i32 : i32
    %26 = arith.extui %25 : i1 to i32
    %c0_i32_16 = arith.constant 0 : i32
    %27 = arith.cmpi ne, %26, %c0_i32_16 : i32
    scf.if %27 {
      %c0_17 = arith.constant 0 : index
      %c0_18 = arith.constant 0 : index
      %c0_19 = arith.constant 0 : index
      %c0_20 = arith.constant 0 : index
      %28 = vector.load %arg7[%c0_17, %c0_18, %c0_19, %c0_20] : memref<1x1x32x128xf32, #tpu.memory_space<vmem>>, vector<1x1x32x128xf32>
      %29 = vector.shape_cast %28 : vector<1x1x32x128xf32> to vector<32x128xf32>
      %c0_21 = arith.constant 0 : index
      %c0_22 = arith.constant 0 : index
      %30 = vector.load %arg5[%c0_21, %c0_22] : memref<1x128xf32, #tpu.memory_space<vmem>>, vector<1x128xf32>
      %31 = vector.broadcast %30 : vector<1x128xf32> to vector<32x128xf32>
      %32 = arith.addf %29, %31 : vector<32x128xf32>
      %c0_23 = arith.constant 0 : index
      %c0_24 = arith.constant 0 : index
      %c0_25 = arith.constant 0 : index
      %c0_26 = arith.constant 0 : index
      %33 = vector.load %arg7[%c0_23, %c0_24, %c0_25, %c0_26] : memref<1x1x32x128xf32, #tpu.memory_space<vmem>>, vector<1x1x32x128xf32>
      %34 = vector.shape_cast %33 : vector<1x1x32x128xf32> to vector<32x128xf32>
      %35 = vector.shape_cast %32 : vector<32x128xf32> to vector<1x1x32x128xf32>
      tpu.vector_store %arg7[%c0_23, %c0_24, %c0_25, %c0_26], %35 {strides = array<i32>} : memref<1x1x32x128xf32, #tpu.memory_space<vmem>>, vector<1x1x32x128xf32>,
    } else {
    }
    return
  }
  func.func @transform_0(%arg0: i32, %arg1: i32, %arg2: i32) -> (i32, i32, i32, i32) {
    %0 = arith.addi %arg1, %arg2 : i32
    %c0_i32 = arith.constant 0 : i32
    %c0_i32_0 = arith.constant 0 : i32
    %c0_i32_1 = arith.constant 0 : i32
    return %arg0, %0, %c0_i32, %c0_i32_0 : i32, i32, i32, i32
  }
  func.func @transform_1(%arg0: i32, %arg1: i32, %arg2: i32) -> (i32, i32, i32) {
    %c0_i32 = arith.constant 0 : i32
    %c0_i32_0 = arith.constant 0 : i32
    %c0_i32_1 = arith.constant 0 : i32
    %c0_i32_2 = arith.constant 0 : i32
    return %c0_i32, %c0_i32_0, %c0_i32_1 : i32, i32, i32
  }
  func.func @transform_2(%arg0: i32, %arg1: i32, %arg2: i32) -> (i32, i32) {
    %c0_i32 = arith.constant 0 : i32
    %c0_i32_0 = arith.constant 0 : i32
    %c0_i32_1 = arith.constant 0 : i32
    return %c0_i32, %c0_i32_0 : i32, i32
  }
  func.func @transform_3(%arg0: i32, %arg1: i32, %arg2: i32) -> (i32, i32) {
    %c0_i32 = arith.constant 0 : i32
    %c0_i32_0 = arith.constant 0 : i32
    %c0_i32_1 = arith.constant 0 : i32
    return %c0_i32, %c0_i32_0 : i32, i32
  }
  func.func @transform_4(%arg0: i32, %arg1: i32, %arg2: i32) -> (i32, i32, i32, i32) {
    %c0_i32 = arith.constant 0 : i32
    %c0_i32_0 = arith.constant 0 : i32
    %c0_i32_1 = arith.constant 0 : i32
    return %arg0, %arg1, %c0_i32, %c0_i32_0 : i32, i32, i32, i32
  }
}

module attributes {stable_mosaic.version = 11 : i64} {
  func.func @_convex_upsample_kernel(%arg0: i32, %arg1: i32, %arg2: memref<1x9x16x64xf32, #tpu.memory_space<vmem>>, %arg3: memref<1x2x9x64xf32, #tpu.memory_space<vmem>>, %arg4: memref<1x2x16x64xf32, #tpu.memory_space<vmem>>) attributes {dimension_semantics = [#tpu.dimension_semantics<parallel>, #tpu.dimension_semantics<parallel>], iteration_bounds = array<i64: 2, 1>, scalar_prefetch = 0 : i64, scratch_operands = 0 : i64, tpu.core_type = #tpu.core_type<tc>, window_params = [{transform_indices = @transform_0, window_bounds = array<i64: 1, 9, 16, 64>}, {transform_indices = @transform_1, window_bounds = array<i64: 1, 2, 9, 64>}, {transform_indices = @transform_2, window_bounds = array<i64: 1, 2, 16, 64>}]} {
    %c0 = arith.constant 0 : index
    %c0_0 = arith.constant 0 : index
    %c0_1 = arith.constant 0 : index
    %c0_2 = arith.constant 0 : index
    %0 = vector.load %arg2[%c0, %c0_0, %c0_1, %c0_2] : memref<1x9x16x64xf32, #tpu.memory_space<vmem>>, vector<1x9x16x64xf32>
    %1 = vector.shape_cast %0 : vector<1x9x16x64xf32> to vector<9x16x64xf32>
    %cst = arith.constant dense<0xFF800000> : vector<16x64xf32>
    %2 = vector.multi_reduction <maximumf>, %1, %cst [0] : vector<9x16x64xf32> to vector<16x64xf32>
    %3 = vector.shape_cast %2 : vector<16x64xf32> to vector<1x16x64xf32>
    %4 = vector.broadcast %3 : vector<1x16x64xf32> to vector<9x16x64xf32>
    %5 = arith.subf %1, %4 : vector<9x16x64xf32>
    %6 = math.exp %5 : vector<9x16x64xf32>
    %cst_3 = arith.constant dense<0.000000e+00> : vector<16x64xf32>
    %7 = vector.multi_reduction <add>, %6, %cst_3 [0] : vector<9x16x64xf32> to vector<16x64xf32>
    %8 = vector.shape_cast %7 : vector<16x64xf32> to vector<1x16x64xf32>
    %9 = tpu.reciprocal %8 {approx = true} : vector<1x16x64xf32> -> vector<1x16x64xf32>
    %10 = vector.broadcast %9 : vector<1x16x64xf32> to vector<9x16x64xf32>
    %11 = arith.mulf %6, %10 : vector<9x16x64xf32>
    %c0_4 = arith.constant 0 : index
    %c0_5 = arith.constant 0 : index
    %c0_6 = arith.constant 0 : index
    %c0_7 = arith.constant 0 : index
    %12 = vector.load %arg3[%c0_4, %c0_5, %c0_6, %c0_7] : memref<1x2x9x64xf32, #tpu.memory_space<vmem>>, vector<1x2x9x64xf32>
    %13 = vector.shape_cast %12 : vector<1x2x9x64xf32> to vector<2x9x64xf32>
    %14 = vector.shape_cast %11 : vector<9x16x64xf32> to vector<1x9x16x64xf32>
    %15 = vector.shape_cast %13 : vector<2x9x64xf32> to vector<2x9x1x64xf32>
    %16 = vector.broadcast %14 : vector<1x9x16x64xf32> to vector<2x9x16x64xf32>
    %17 = vector.broadcast %15 : vector<2x9x1x64xf32> to vector<2x9x16x64xf32>
    %18 = arith.mulf %16, %17 : vector<2x9x16x64xf32>
    %cst_8 = arith.constant dense<0.000000e+00> : vector<2x16x64xf32>
    %19 = vector.multi_reduction <add>, %18, %cst_8 [1] : vector<2x9x16x64xf32> to vector<2x16x64xf32>
    %c0_9 = arith.constant 0 : index
    %c0_10 = arith.constant 0 : index
    %c0_11 = arith.constant 0 : index
    %c0_12 = arith.constant 0 : index
    %20 = vector.load %arg4[%c0_9, %c0_10, %c0_11, %c0_12] : memref<1x2x16x64xf32, #tpu.memory_space<vmem>>, vector<1x2x16x64xf32>
    %21 = vector.shape_cast %20 : vector<1x2x16x64xf32> to vector<2x16x64xf32>
    %22 = vector.shape_cast %19 : vector<2x16x64xf32> to vector<1x2x16x64xf32>
    tpu.vector_store %arg4[%c0_9, %c0_10, %c0_11, %c0_12], %22 {strides = array<i32>} : memref<1x2x16x64xf32, #tpu.memory_space<vmem>>, vector<1x2x16x64xf32>,
    return
  }
  func.func @transform_0(%arg0: i32, %arg1: i32) -> (i32, i32, i32, i32) {
    %c0_i32 = arith.constant 0 : i32
    %c0_i32_0 = arith.constant 0 : i32
    %c0_i32_1 = arith.constant 0 : i32
    return %arg0, %c0_i32, %c0_i32_0, %arg1 : i32, i32, i32, i32
  }
  func.func @transform_1(%arg0: i32, %arg1: i32) -> (i32, i32, i32, i32) {
    %c0_i32 = arith.constant 0 : i32
    %c0_i32_0 = arith.constant 0 : i32
    %c0_i32_1 = arith.constant 0 : i32
    return %arg0, %c0_i32, %c0_i32_0, %arg1 : i32, i32, i32, i32
  }
  func.func @transform_2(%arg0: i32, %arg1: i32) -> (i32, i32, i32, i32) {
    %c0_i32 = arith.constant 0 : i32
    %c0_i32_0 = arith.constant 0 : i32
    %c0_i32_1 = arith.constant 0 : i32
    return %arg0, %c0_i32, %c0_i32_0, %arg1 : i32, i32, i32, i32
  }
}

module attributes {stable_mosaic.version = 11 : i64} {
  func.func @_conv3x3_row_kernel(%arg0: i32, %arg1: i32, %arg2: i32, %arg3: memref<1x1x18x16xbf16, #tpu.memory_space<vmem>>, %arg4: memref<3x48x128xbf16, #tpu.memory_space<vmem>>, %arg5: memref<1x128xf32, #tpu.memory_space<vmem>>, %arg6: memref<1x128xf32, #tpu.memory_space<vmem>>, %arg7: memref<1x1x16x128xf32, #tpu.memory_space<vmem>>) attributes {dimension_semantics = [#tpu.dimension_semantics<parallel>, #tpu.dimension_semantics<parallel>, #tpu.dimension_semantics<arbitrary>], iteration_bounds = array<i64: 2, 16, 3>, scalar_prefetch = 0 : i64, scratch_operands = 0 : i64, tpu.core_type = #tpu.core_type<tc>, window_params = [{transform_indices = @transform_0, window_bounds = array<i64: 1, 1, 18, 16>}, {pipeline_mode = #tpu.pipeline_mode<synchronous>, transform_indices = @transform_1, window_bounds = array<i64: 3, 48, 128>}, {pipeline_mode = #tpu.pipeline_mode<synchronous>, transform_indices = @transform_2, window_bounds = array<i64: 1, 128>}, {pipeline_mode = #tpu.pipeline_mode<synchronous>, transform_indices = @transform_3, window_bounds = array<i64: 1, 128>}, {transform_indices = @transform_4, window_bounds = array<i64: 1, 1, 16, 128>}]} {
    %c0_i32 = arith.constant 0 : i32
    %0 = arith.cmpi eq, %arg2, %c0_i32 : i32
    %1 = arith.extui %0 : i1 to i32
    %c0_i32_0 = arith.constant 0 : i32
    %2 = arith.cmpi ne, %1, %c0_i32_0 : i32
    scf.if %2 {
      %cst_17 = arith.constant 0.000000e+00 : f32
      %28 = vector.broadcast %cst_17 : f32 to vector<16x128xf32>
      %c0_18 = arith.constant 0 : index
      %c0_19 = arith.constant 0 : index
      %c0_20 = arith.constant 0 : index
      %c0_21 = arith.constant 0 : index
      %29 = vector.load %arg7[%c0_18, %c0_19, %c0_20, %c0_21] : memref<1x1x16x128xf32, #tpu.memory_space<vmem>>, vector<1x1x16x128xf32>
      %30 = vector.shape_cast %29 : vector<1x1x16x128xf32> to vector<16x128xf32>
      %31 = vector.shape_cast %28 : vector<16x128xf32> to vector<1x1x16x128xf32>
      tpu.vector_store %arg7[%c0_18, %c0_19, %c0_20, %c0_21], %31 {strides = array<i32>} : memref<1x1x16x128xf32, #tpu.memory_space<vmem>>, vector<1x1x16x128xf32>,
    } else {
    }
    %c0 = arith.constant 0 : index
    %c0_1 = arith.constant 0 : index
    %c0_2 = arith.constant 0 : index
    %c0_3 = arith.constant 0 : index
    %3 = vector.load %arg3[%c0, %c0_1, %c0_2, %c0_3] : memref<1x1x18x16xbf16, #tpu.memory_space<vmem>>, vector<1x1x18x16xbf16>
    %4 = vector.shape_cast %3 : vector<1x1x18x16xbf16> to vector<18x16xbf16>
    %5 = arith.index_cast %arg2 : i32 to index
    %c0_4 = arith.constant 0 : index
    %c0_5 = arith.constant 0 : index
    %6 = vector.load %arg4[%5, %c0_4, %c0_5] : memref<3x48x128xbf16, #tpu.memory_space<vmem>>, vector<1x48x128xbf16>
    %7 = vector.shape_cast %6 : vector<1x48x128xbf16> to vector<48x128xbf16>
    %c0_6 = arith.constant 0 : index
    %c0_7 = arith.constant 0 : index
    %c0_8 = arith.constant 0 : index
    %c0_9 = arith.constant 0 : index
    %8 = vector.load %arg7[%c0_6, %c0_7, %c0_8, %c0_9] : memref<1x1x16x128xf32, #tpu.memory_space<vmem>>, vector<1x1x16x128xf32>
    %9 = vector.shape_cast %8 : vector<1x1x16x128xf32> to vector<16x128xf32>
    %10 = vector.extract_strided_slice %4 {offsets = [0, 0], sizes = [16, 16], strides = [1, 1]} : vector<18x16xbf16> to vector<16x16xbf16>
    %11 = vector.extract_strided_slice %7 {offsets = [0, 0], sizes = [16, 128], strides = [1, 1]} : vector<48x128xbf16> to vector<16x128xbf16>
    %cst = arith.constant dense<0.000000e+00> : vector<16x128xf32>
    %12 = tpu.matmul %10, %11, %cst {dimension_numbers = #tpu.dot_dimension_numbers<[1], [0], [0], [1], [0, 0, 1, 1], [], []>} : vector<16x16xbf16>, vector<16x128xbf16>, vector<16x128xf32> -> vector<16x128xf32>
    %13 = arith.addf %9, %12 : vector<16x128xf32>
    %14 = vector.extract_strided_slice %4 {offsets = [1, 0], sizes = [16, 16], strides = [1, 1]} : vector<18x16xbf16> to vector<16x16xbf16>
    %15 = vector.extract_strided_slice %7 {offsets = [16, 0], sizes = [16, 128], strides = [1, 1]} : vector<48x128xbf16> to vector<16x128xbf16>
    %cst_10 = arith.constant dense<0.000000e+00> : vector<16x128xf32>
    %16 = tpu.matmul %14, %15, %cst_10 {dimension_numbers = #tpu.dot_dimension_numbers<[1], [0], [0], [1], [0, 0, 1, 1], [], []>} : vector<16x16xbf16>, vector<16x128xbf16>, vector<16x128xf32> -> vector<16x128xf32>
    %17 = arith.addf %13, %16 : vector<16x128xf32>
    %18 = vector.extract_strided_slice %4 {offsets = [2, 0], sizes = [16, 16], strides = [1, 1]} : vector<18x16xbf16> to vector<16x16xbf16>
    %19 = vector.extract_strided_slice %7 {offsets = [32, 0], sizes = [16, 128], strides = [1, 1]} : vector<48x128xbf16> to vector<16x128xbf16>
    %cst_11 = arith.constant dense<0.000000e+00> : vector<16x128xf32>
    %20 = tpu.matmul %18, %19, %cst_11 {dimension_numbers = #tpu.dot_dimension_numbers<[1], [0], [0], [1], [0, 0, 1, 1], [], []>} : vector<16x16xbf16>, vector<16x128xbf16>, vector<16x128xf32> -> vector<16x128xf32>
    %21 = arith.addf %17, %20 : vector<16x128xf32>
    %c0_12 = arith.constant 0 : index
    %c0_13 = arith.constant 0 : index
    %c0_14 = arith.constant 0 : index
    %c0_15 = arith.constant 0 : index
    %22 = vector.load %arg7[%c0_12, %c0_13, %c0_14, %c0_15] : memref<1x1x16x128xf32, #tpu.memory_space<vmem>>, vector<1x1x16x128xf32>
    %23 = vector.shape_cast %22 : vector<1x1x16x128xf32> to vector<16x128xf32>
    %24 = vector.shape_cast %21 : vector<16x128xf32> to vector<1x1x16x128xf32>
    tpu.vector_store %arg7[%c0_12, %c0_13, %c0_14, %c0_15], %24 {strides = array<i32>} : memref<1x1x16x128xf32, #tpu.memory_space<vmem>>, vector<1x1x16x128xf32>,
    %c2_i32 = arith.constant 2 : i32
    %25 = arith.cmpi eq, %arg2, %c2_i32 : i32
    %26 = arith.extui %25 : i1 to i32
    %c0_i32_16 = arith.constant 0 : i32
    %27 = arith.cmpi ne, %26, %c0_i32_16 : i32
    scf.if %27 {
      %c0_17 = arith.constant 0 : index
      %c0_18 = arith.constant 0 : index
      %c0_19 = arith.constant 0 : index
      %c0_20 = arith.constant 0 : index
      %28 = vector.load %arg7[%c0_17, %c0_18, %c0_19, %c0_20] : memref<1x1x16x128xf32, #tpu.memory_space<vmem>>, vector<1x1x16x128xf32>
      %29 = vector.shape_cast %28 : vector<1x1x16x128xf32> to vector<16x128xf32>
      %c0_21 = arith.constant 0 : index
      %c0_22 = arith.constant 0 : index
      %30 = vector.load %arg5[%c0_21, %c0_22] : memref<1x128xf32, #tpu.memory_space<vmem>>, vector<1x128xf32>
      %31 = vector.broadcast %30 : vector<1x128xf32> to vector<16x128xf32>
      %32 = arith.addf %29, %31 : vector<16x128xf32>
      %cst_23 = arith.constant 0.000000e+00 : f32
      %33 = vector.broadcast %cst_23 : f32 to vector<16x128xf32>
      %34 = arith.cmpf oge, %32, %33 : vector<16x128xf32>
      %c0_24 = arith.constant 0 : index
      %c0_25 = arith.constant 0 : index
      %35 = vector.load %arg6[%c0_24, %c0_25] : memref<1x128xf32, #tpu.memory_space<vmem>>, vector<1x128xf32>
      %36 = vector.broadcast %35 : vector<1x128xf32> to vector<16x128xf32>
      %37 = arith.mulf %36, %32 : vector<16x128xf32>
      %38 = arith.select %34, %32, %37 : vector<16x128xi1>, vector<16x128xf32>
      %c0_26 = arith.constant 0 : index
      %c0_27 = arith.constant 0 : index
      %c0_28 = arith.constant 0 : index
      %c0_29 = arith.constant 0 : index
      %39 = vector.load %arg7[%c0_26, %c0_27, %c0_28, %c0_29] : memref<1x1x16x128xf32, #tpu.memory_space<vmem>>, vector<1x1x16x128xf32>
      %40 = vector.shape_cast %39 : vector<1x1x16x128xf32> to vector<16x128xf32>
      %41 = vector.shape_cast %38 : vector<16x128xf32> to vector<1x1x16x128xf32>
      tpu.vector_store %arg7[%c0_26, %c0_27, %c0_28, %c0_29], %41 {strides = array<i32>} : memref<1x1x16x128xf32, #tpu.memory_space<vmem>>, vector<1x1x16x128xf32>,
    } else {
    }
    return
  }
  func.func @transform_0(%arg0: i32, %arg1: i32, %arg2: i32) -> (i32, i32, i32, i32) {
    %0 = arith.addi %arg1, %arg2 : i32
    %c0_i32 = arith.constant 0 : i32
    %c0_i32_0 = arith.constant 0 : i32
    %c0_i32_1 = arith.constant 0 : i32
    return %arg0, %0, %c0_i32, %c0_i32_0 : i32, i32, i32, i32
  }
  func.func @transform_1(%arg0: i32, %arg1: i32, %arg2: i32) -> (i32, i32, i32) {
    %c0_i32 = arith.constant 0 : i32
    %c0_i32_0 = arith.constant 0 : i32
    %c0_i32_1 = arith.constant 0 : i32
    %c0_i32_2 = arith.constant 0 : i32
    return %c0_i32, %c0_i32_0, %c0_i32_1 : i32, i32, i32
  }
  func.func @transform_2(%arg0: i32, %arg1: i32, %arg2: i32) -> (i32, i32) {
    %c0_i32 = arith.constant 0 : i32
    %c0_i32_0 = arith.constant 0 : i32
    %c0_i32_1 = arith.constant 0 : i32
    return %c0_i32, %c0_i32_0 : i32, i32
  }
  func.func @transform_3(%arg0: i32, %arg1: i32, %arg2: i32) -> (i32, i32) {
    %c0_i32 = arith.constant 0 : i32
    %c0_i32_0 = arith.constant 0 : i32
    %c0_i32_1 = arith.constant 0 : i32
    return %c0_i32, %c0_i32_0 : i32, i32
  }
  func.func @transform_4(%arg0: i32, %arg1: i32, %arg2: i32) -> (i32, i32, i32, i32) {
    %c0_i32 = arith.constant 0 : i32
    %c0_i32_0 = arith.constant 0 : i32
    %c0_i32_1 = arith.constant 0 : i32
    return %arg0, %arg1, %c0_i32, %c0_i32_0 : i32, i32, i32, i32
  }
}

module attributes {stable_mosaic.version = 11 : i64} {
  func.func @_conv3x3_row_kernel(%arg0: i32, %arg1: i32, %arg2: i32, %arg3: memref<1x1x18x8xbf16, #tpu.memory_space<vmem>>, %arg4: memref<3x24x128xbf16, #tpu.memory_space<vmem>>, %arg5: memref<1x128xf32, #tpu.memory_space<vmem>>, %arg6: memref<1x128xf32, #tpu.memory_space<vmem>>, %arg7: memref<1x1x16x128xf32, #tpu.memory_space<vmem>>) attributes {dimension_semantics = [#tpu.dimension_semantics<parallel>, #tpu.dimension_semantics<parallel>, #tpu.dimension_semantics<arbitrary>], iteration_bounds = array<i64: 2, 16, 3>, scalar_prefetch = 0 : i64, scratch_operands = 0 : i64, tpu.core_type = #tpu.core_type<tc>, window_params = [{transform_indices = @transform_0, window_bounds = array<i64: 1, 1, 18, 8>}, {pipeline_mode = #tpu.pipeline_mode<synchronous>, transform_indices = @transform_1, window_bounds = array<i64: 3, 24, 128>}, {pipeline_mode = #tpu.pipeline_mode<synchronous>, transform_indices = @transform_2, window_bounds = array<i64: 1, 128>}, {pipeline_mode = #tpu.pipeline_mode<synchronous>, transform_indices = @transform_3, window_bounds = array<i64: 1, 128>}, {transform_indices = @transform_4, window_bounds = array<i64: 1, 1, 16, 128>}]} {
    %c0_i32 = arith.constant 0 : i32
    %0 = arith.cmpi eq, %arg2, %c0_i32 : i32
    %1 = arith.extui %0 : i1 to i32
    %c0_i32_0 = arith.constant 0 : i32
    %2 = arith.cmpi ne, %1, %c0_i32_0 : i32
    scf.if %2 {
      %cst_17 = arith.constant 0.000000e+00 : f32
      %28 = vector.broadcast %cst_17 : f32 to vector<16x128xf32>
      %c0_18 = arith.constant 0 : index
      %c0_19 = arith.constant 0 : index
      %c0_20 = arith.constant 0 : index
      %c0_21 = arith.constant 0 : index
      %29 = vector.load %arg7[%c0_18, %c0_19, %c0_20, %c0_21] : memref<1x1x16x128xf32, #tpu.memory_space<vmem>>, vector<1x1x16x128xf32>
      %30 = vector.shape_cast %29 : vector<1x1x16x128xf32> to vector<16x128xf32>
      %31 = vector.shape_cast %28 : vector<16x128xf32> to vector<1x1x16x128xf32>
      tpu.vector_store %arg7[%c0_18, %c0_19, %c0_20, %c0_21], %31 {strides = array<i32>} : memref<1x1x16x128xf32, #tpu.memory_space<vmem>>, vector<1x1x16x128xf32>,
    } else {
    }
    %c0 = arith.constant 0 : index
    %c0_1 = arith.constant 0 : index
    %c0_2 = arith.constant 0 : index
    %c0_3 = arith.constant 0 : index
    %3 = vector.load %arg3[%c0, %c0_1, %c0_2, %c0_3] : memref<1x1x18x8xbf16, #tpu.memory_space<vmem>>, vector<1x1x18x8xbf16>
    %4 = vector.shape_cast %3 : vector<1x1x18x8xbf16> to vector<18x8xbf16>
    %5 = arith.index_cast %arg2 : i32 to index
    %c0_4 = arith.constant 0 : index
    %c0_5 = arith.constant 0 : index
    %6 = vector.load %arg4[%5, %c0_4, %c0_5] : memref<3x24x128xbf16, #tpu.memory_space<vmem>>, vector<1x24x128xbf16>
    %7 = vector.shape_cast %6 : vector<1x24x128xbf16> to vector<24x128xbf16>
    %c0_6 = arith.constant 0 : index
    %c0_7 = arith.constant 0 : index
    %c0_8 = arith.constant 0 : index
    %c0_9 = arith.constant 0 : index
    %8 = vector.load %arg7[%c0_6, %c0_7, %c0_8, %c0_9] : memref<1x1x16x128xf32, #tpu.memory_space<vmem>>, vector<1x1x16x128xf32>
    %9 = vector.shape_cast %8 : vector<1x1x16x128xf32> to vector<16x128xf32>
    %10 = vector.extract_strided_slice %4 {offsets = [0, 0], sizes = [16, 8], strides = [1, 1]} : vector<18x8xbf16> to vector<16x8xbf16>
    %11 = vector.extract_strided_slice %7 {offsets = [0, 0], sizes = [8, 128], strides = [1, 1]} : vector<24x128xbf16> to vector<8x128xbf16>
    %cst = arith.constant dense<0.000000e+00> : vector<16x128xf32>
    %12 = tpu.matmul %10, %11, %cst {dimension_numbers = #tpu.dot_dimension_numbers<[1], [0], [0], [1], [0, 0, 1, 1], [], []>} : vector<16x8xbf16>, vector<8x128xbf16>, vector<16x128xf32> -> vector<16x128xf32>
    %13 = arith.addf %9, %12 : vector<16x128xf32>
    %14 = vector.extract_strided_slice %4 {offsets = [1, 0], sizes = [16, 8], strides = [1, 1]} : vector<18x8xbf16> to vector<16x8xbf16>
    %15 = vector.extract_strided_slice %7 {offsets = [8, 0], sizes = [8, 128], strides = [1, 1]} : vector<24x128xbf16> to vector<8x128xbf16>
    %cst_10 = arith.constant dense<0.000000e+00> : vector<16x128xf32>
    %16 = tpu.matmul %14, %15, %cst_10 {dimension_numbers = #tpu.dot_dimension_numbers<[1], [0], [0], [1], [0, 0, 1, 1], [], []>} : vector<16x8xbf16>, vector<8x128xbf16>, vector<16x128xf32> -> vector<16x128xf32>
    %17 = arith.addf %13, %16 : vector<16x128xf32>
    %18 = vector.extract_strided_slice %4 {offsets = [2, 0], sizes = [16, 8], strides = [1, 1]} : vector<18x8xbf16> to vector<16x8xbf16>
    %19 = vector.extract_strided_slice %7 {offsets = [16, 0], sizes = [8, 128], strides = [1, 1]} : vector<24x128xbf16> to vector<8x128xbf16>
    %cst_11 = arith.constant dense<0.000000e+00> : vector<16x128xf32>
    %20 = tpu.matmul %18, %19, %cst_11 {dimension_numbers = #tpu.dot_dimension_numbers<[1], [0], [0], [1], [0, 0, 1, 1], [], []>} : vector<16x8xbf16>, vector<8x128xbf16>, vector<16x128xf32> -> vector<16x128xf32>
    %21 = arith.addf %17, %20 : vector<16x128xf32>
    %c0_12 = arith.constant 0 : index
    %c0_13 = arith.constant 0 : index
    %c0_14 = arith.constant 0 : index
    %c0_15 = arith.constant 0 : index
    %22 = vector.load %arg7[%c0_12, %c0_13, %c0_14, %c0_15] : memref<1x1x16x128xf32, #tpu.memory_space<vmem>>, vector<1x1x16x128xf32>
    %23 = vector.shape_cast %22 : vector<1x1x16x128xf32> to vector<16x128xf32>
    %24 = vector.shape_cast %21 : vector<16x128xf32> to vector<1x1x16x128xf32>
    tpu.vector_store %arg7[%c0_12, %c0_13, %c0_14, %c0_15], %24 {strides = array<i32>} : memref<1x1x16x128xf32, #tpu.memory_space<vmem>>, vector<1x1x16x128xf32>,
    %c2_i32 = arith.constant 2 : i32
    %25 = arith.cmpi eq, %arg2, %c2_i32 : i32
    %26 = arith.extui %25 : i1 to i32
    %c0_i32_16 = arith.constant 0 : i32
    %27 = arith.cmpi ne, %26, %c0_i32_16 : i32
    scf.if %27 {
      %c0_17 = arith.constant 0 : index
      %c0_18 = arith.constant 0 : index
      %c0_19 = arith.constant 0 : index
      %c0_20 = arith.constant 0 : index
      %28 = vector.load %arg7[%c0_17, %c0_18, %c0_19, %c0_20] : memref<1x1x16x128xf32, #tpu.memory_space<vmem>>, vector<1x1x16x128xf32>
      %29 = vector.shape_cast %28 : vector<1x1x16x128xf32> to vector<16x128xf32>
      %c0_21 = arith.constant 0 : index
      %c0_22 = arith.constant 0 : index
      %30 = vector.load %arg5[%c0_21, %c0_22] : memref<1x128xf32, #tpu.memory_space<vmem>>, vector<1x128xf32>
      %31 = vector.broadcast %30 : vector<1x128xf32> to vector<16x128xf32>
      %32 = arith.addf %29, %31 : vector<16x128xf32>
      %c0_23 = arith.constant 0 : index
      %c0_24 = arith.constant 0 : index
      %c0_25 = arith.constant 0 : index
      %c0_26 = arith.constant 0 : index
      %33 = vector.load %arg7[%c0_23, %c0_24, %c0_25, %c0_26] : memref<1x1x16x128xf32, #tpu.memory_space<vmem>>, vector<1x1x16x128xf32>
      %34 = vector.shape_cast %33 : vector<1x1x16x128xf32> to vector<16x128xf32>
      %35 = vector.shape_cast %32 : vector<16x128xf32> to vector<1x1x16x128xf32>
      tpu.vector_store %arg7[%c0_23, %c0_24, %c0_25, %c0_26], %35 {strides = array<i32>} : memref<1x1x16x128xf32, #tpu.memory_space<vmem>>, vector<1x1x16x128xf32>,
    } else {
    }
    return
  }
  func.func @transform_0(%arg0: i32, %arg1: i32, %arg2: i32) -> (i32, i32, i32, i32) {
    %0 = arith.addi %arg1, %arg2 : i32
    %c0_i32 = arith.constant 0 : i32
    %c0_i32_0 = arith.constant 0 : i32
    %c0_i32_1 = arith.constant 0 : i32
    return %arg0, %0, %c0_i32, %c0_i32_0 : i32, i32, i32, i32
  }
  func.func @transform_1(%arg0: i32, %arg1: i32, %arg2: i32) -> (i32, i32, i32) {
    %c0_i32 = arith.constant 0 : i32
    %c0_i32_0 = arith.constant 0 : i32
    %c0_i32_1 = arith.constant 0 : i32
    %c0_i32_2 = arith.constant 0 : i32
    return %c0_i32, %c0_i32_0, %c0_i32_1 : i32, i32, i32
  }
  func.func @transform_2(%arg0: i32, %arg1: i32, %arg2: i32) -> (i32, i32) {
    %c0_i32 = arith.constant 0 : i32
    %c0_i32_0 = arith.constant 0 : i32
    %c0_i32_1 = arith.constant 0 : i32
    return %c0_i32, %c0_i32_0 : i32, i32
  }
  func.func @transform_3(%arg0: i32, %arg1: i32, %arg2: i32) -> (i32, i32) {
    %c0_i32 = arith.constant 0 : i32
    %c0_i32_0 = arith.constant 0 : i32
    %c0_i32_1 = arith.constant 0 : i32
    return %c0_i32, %c0_i32_0 : i32, i32
  }
  func.func @transform_4(%arg0: i32, %arg1: i32, %arg2: i32) -> (i32, i32, i32, i32) {
    %c0_i32 = arith.constant 0 : i32
    %c0_i32_0 = arith.constant 0 : i32
    %c0_i32_1 = arith.constant 0 : i32
    return %arg0, %arg1, %c0_i32, %c0_i32_0 : i32, i32, i32, i32
  }
}

module attributes {stable_mosaic.version = 11 : i64} {
  func.func @_convex_upsample_kernel(%arg0: i32, %arg1: i32, %arg2: memref<1x9x4x64xf32, #tpu.memory_space<vmem>>, %arg3: memref<1x2x9x64xf32, #tpu.memory_space<vmem>>, %arg4: memref<1x2x4x64xf32, #tpu.memory_space<vmem>>) attributes {dimension_semantics = [#tpu.dimension_semantics<parallel>, #tpu.dimension_semantics<parallel>], iteration_bounds = array<i64: 2, 1>, scalar_prefetch = 0 : i64, scratch_operands = 0 : i64, tpu.core_type = #tpu.core_type<tc>, window_params = [{transform_indices = @transform_0, window_bounds = array<i64: 1, 9, 4, 64>}, {transform_indices = @transform_1, window_bounds = array<i64: 1, 2, 9, 64>}, {transform_indices = @transform_2, window_bounds = array<i64: 1, 2, 4, 64>}]} {
    %c0 = arith.constant 0 : index
    %c0_0 = arith.constant 0 : index
    %c0_1 = arith.constant 0 : index
    %c0_2 = arith.constant 0 : index
    %0 = vector.load %arg2[%c0, %c0_0, %c0_1, %c0_2] : memref<1x9x4x64xf32, #tpu.memory_space<vmem>>, vector<1x9x4x64xf32>
    %1 = vector.shape_cast %0 : vector<1x9x4x64xf32> to vector<9x4x64xf32>
    %cst = arith.constant dense<0xFF800000> : vector<4x64xf32>
    %2 = vector.multi_reduction <maximumf>, %1, %cst [0] : vector<9x4x64xf32> to vector<4x64xf32>
    %3 = vector.shape_cast %2 : vector<4x64xf32> to vector<1x4x64xf32>
    %4 = vector.broadcast %3 : vector<1x4x64xf32> to vector<9x4x64xf32>
    %5 = arith.subf %1, %4 : vector<9x4x64xf32>
    %6 = math.exp %5 : vector<9x4x64xf32>
    %cst_3 = arith.constant dense<0.000000e+00> : vector<4x64xf32>
    %7 = vector.multi_reduction <add>, %6, %cst_3 [0] : vector<9x4x64xf32> to vector<4x64xf32>
    %8 = vector.shape_cast %7 : vector<4x64xf32> to vector<1x4x64xf32>
    %9 = tpu.reciprocal %8 {approx = true} : vector<1x4x64xf32> -> vector<1x4x64xf32>
    %10 = vector.broadcast %9 : vector<1x4x64xf32> to vector<9x4x64xf32>
    %11 = arith.mulf %6, %10 : vector<9x4x64xf32>
    %c0_4 = arith.constant 0 : index
    %c0_5 = arith.constant 0 : index
    %c0_6 = arith.constant 0 : index
    %c0_7 = arith.constant 0 : index
    %12 = vector.load %arg3[%c0_4, %c0_5, %c0_6, %c0_7] : memref<1x2x9x64xf32, #tpu.memory_space<vmem>>, vector<1x2x9x64xf32>
    %13 = vector.shape_cast %12 : vector<1x2x9x64xf32> to vector<2x9x64xf32>
    %14 = vector.shape_cast %11 : vector<9x4x64xf32> to vector<1x9x4x64xf32>
    %15 = vector.shape_cast %13 : vector<2x9x64xf32> to vector<2x9x1x64xf32>
    %16 = vector.broadcast %14 : vector<1x9x4x64xf32> to vector<2x9x4x64xf32>
    %17 = vector.broadcast %15 : vector<2x9x1x64xf32> to vector<2x9x4x64xf32>
    %18 = arith.mulf %16, %17 : vector<2x9x4x64xf32>
    %cst_8 = arith.constant dense<0.000000e+00> : vector<2x4x64xf32>
    %19 = vector.multi_reduction <add>, %18, %cst_8 [1] : vector<2x9x4x64xf32> to vector<2x4x64xf32>
    %c0_9 = arith.constant 0 : index
    %c0_10 = arith.constant 0 : index
    %c0_11 = arith.constant 0 : index
    %c0_12 = arith.constant 0 : index
    %20 = vector.load %arg4[%c0_9, %c0_10, %c0_11, %c0_12] : memref<1x2x4x64xf32, #tpu.memory_space<vmem>>, vector<1x2x4x64xf32>
    %21 = vector.shape_cast %20 : vector<1x2x4x64xf32> to vector<2x4x64xf32>
    %22 = vector.shape_cast %19 : vector<2x4x64xf32> to vector<1x2x4x64xf32>
    tpu.vector_store %arg4[%c0_9, %c0_10, %c0_11, %c0_12], %22 {strides = array<i32>} : memref<1x2x4x64xf32, #tpu.memory_space<vmem>>, vector<1x2x4x64xf32>,
    return
  }
  func.func @transform_0(%arg0: i32, %arg1: i32) -> (i32, i32, i32, i32) {
    %c0_i32 = arith.constant 0 : i32
    %c0_i32_0 = arith.constant 0 : i32
    %c0_i32_1 = arith.constant 0 : i32
    return %arg0, %c0_i32, %c0_i32_0, %arg1 : i32, i32, i32, i32
  }
  func.func @transform_1(%arg0: i32, %arg1: i32) -> (i32, i32, i32, i32) {
    %c0_i32 = arith.constant 0 : i32
    %c0_i32_0 = arith.constant 0 : i32
    %c0_i32_1 = arith.constant 0 : i32
    return %arg0, %c0_i32, %c0_i32_0, %arg1 : i32, i32, i32, i32
  }
  func.func @transform_2(%arg0: i32, %arg1: i32) -> (i32, i32, i32, i32) {
    %c0_i32 = arith.constant 0 : i32
    %c0_i32_0 = arith.constant 0 : i32
    %c0_i32_1 = arith.constant 0 : i32
    return %arg0, %c0_i32, %c0_i32_0, %arg1 : i32, i32, i32, i32
  }
}

</mosaic_0001>

<bundles_post_ra>
// kernel: caun_forward.11
= control target key start
LH: loop header
LB: loop body
LE: loop exit
PB: predicated region body
PF: predicated region fallthrough
CT: control target
= control target key end

     0   :  { %s785_s15 = smov 0   ;;  %s787_s16 = smov 0   ;;  %s884_s0 = inlined_call_operand.vmem [shape: bf16[2,10,10,32], index: 0, kind: input, shape index: {}]   ;;  %s885_s1 = inlined_call_operand.vmem [shape: bf16[3,96,128], index: 1, kind: input, shape index: {}]   ;;  %s886_s2 = inlined_call_operand.vmem [shape: f32[1,128], index: 2, kind: input, shape index: {}]   ;;  %s887_s3 = inlined_call_operand.vmem [shape: f32[1,128], index: 3, kind: input, shape index: {}]   ;;  %s888_s4 = inlined_call_operand.vmem [shape: f32[2,8,8,128], index: 4, kind: output, shape index: {}]  }
   0x1   :  { %s789_s17 = smov 0   ;;  %s791_s18 = smov 0  }
   0x2   :  { %s793_s19 = smov 0   ;;  %s795_s20 = smov 0  }
   0x3   :  { %s797_s21 = smov 0  }
   0x4 LB: > { %s26_s22 = sadd.s32 1, %s743_s18  ;;  %s29_s23 = sadd.s32 1, %s747_s19  ;;  %s755_s21 = sphi %s797_s21, %s14_s21   ;;  %s751_s20 = sphi %s795_s20, %s894_s20   ;;  %s747_s19 = sphi %s793_s19, %s893_s19   ;;  %s743_s18 = sphi %s791_s18, %s892_s18   ;;  %s739_s17 = sphi %s789_s17, %s891_s17   ;;  %s735_s16 = sphi %s787_s16, %s890_s16   ;;  %s731_s15 = sphi %s785_s15, %s889_s15  }
   0x5   : > { %p27_p0 = scmp.ge.s32.totalorder %s26_s22, 3  ;;  %p578_p1 = scmp.ge.s32.totalorder %s755_s21, 1 }
   0x6   : > { %p193_p2 = scmp.lt.s32.totalorder %s755_s21, 49  ;;  %s33_s24 = sadd.s32 1, %s751_s20 }
   0x7   : > { %s896_s22 = smov (%p27_p0, %s26_s22), 0  ;;  %s898_s23 = smov (!%p27_p0, %s29_s23), %s747_s19 }
   0x8   : > { %p194_p3 = pnand %p578_p1, %p193_p2  ;;  %p31_p4 = scmp.ge.s32.totalorder %s898_s23, 8 }
   0x9   : > { %s227_s25 = sadd.s32 (!%p194_p3), %s731_s15, %s735_s16  ;;  %p228_p6 = scmp.lt.s32.totalorder (!%p194_p3), %s739_s17, 1 }
   0xa   : > { %s900_s23 = smov (%p31_p4, %s898_s23), 0  ;;  %s902_s24 = smov (!%p31_p4, %s33_s24), %s751_s20 }
   0xb   : > { %p35_p5 = scmp.ge.s32.totalorder %s902_s24, 2  ;;  %197 = sbr.rel (%p194_p3) target bundleno = 257 (0x101), region = 36 }
   0xc   : > { %p230_p7 = scmp.lt.s32.totalorder (!%p194_p3), %s227_s25, 9  ;;  %p240_p8 = scmp.lt.s32.totalorder (!%p194_p3), %s735_s16, 7 }
   0xd   : > { %s904_s24 = smov (%p35_p5, %s902_s24), 0  ;;  %p583_p9 = scmp.ne.s32.totalorder (!%p194_p3), %s731_s15, 0 }
  0x10   : > { %s906_s17 = smov (!%p228_p6, %s739_s17), 1  ;;  %s908_s25 = smov (!%p230_p7, %s227_s25), 9 }
  0x11   : > { %s634_s26 = smul.u32 20, %s906_s17  ;;  %s579_s27 = sshll.u32 %s908_s25, 1 }
  0x12   : > { %s581_s7 = sshll.u32 %s906_s17, 3  ;;  %s910_s16 = smov (!%p240_p8, %s735_s16), 7 }
  0x13   : > { %s234_s28 = sadd.s32 %s634_s26, %s579_s27  ;;  %s243_s8 = sadd.s32 %s581_s7, %s910_s16 }
  0x14   : > { %s580_s29 = sshll.u32 %s234_s28, 2  ;;  %s582_s9 = sshll.u32 %s243_s8, 3 }
  0x15   : > { %s236_s6 = scalar_lea.vmem %s884_s0, %s580_s29  ;;  %s841_s12 = scalar_lea.vmem %s888_s4, %s582_s9 }
  0x16   : > { %250 = sbr.rel (%p583_p9) target bundleno = 29 (0x1d), region = 40 }
  0x1b   : > { %v757_v0 = vmov 0.0  }
  0x1c   : > { %251 = vst [vmem:[%s841_s12] sm:$0xff] %v757_v0 }
  0x1d PF: > { %s600_s13 = smul.u32 48, %s731_s15  ;;  %v252_v1 = vld [vmem:[%s236_s6] sm:$0xf]  ;;  %v758_v2 = vmov 0.0   ;;  %v253_v3 = vld [vmem:[%s236_s6 + $0x4] sm:$0x1] }
  0x1e   : > { %610 = vmatprep.subr.bf16.mxu0 %v758_v2  ;;  %618 = vmatprep.subr.bf16.mxu1 %v758_v2  ;;  %vm759_vm0 = vmmov 0   ;;  %v588_v4 = vcombine.low %v252_v1, %v253_v3  ;;  %vm282_vm1 = vcmask 261120   ;;  %p595_p10 = scmp.ne.s32.totalorder %s731_s15, 2 }
  0x1f   : > { %s256_s17 = scalar_lea.vmem %s885_s1, %s600_s13  ;;  %614 = vmatprep.mubr.msk.bf16.mxu0 %vm759_vm0, %v758_v2  ;;  %622 = vmatprep.mubr.msk.bf16.mxu1 %vm759_vm0, %v758_v2 }
  0x20   : > { %v694_v5 = vld [vmem:[%s256_s17 + $0x8] sm:$0xff]   ;;  %v695_v6 = vld [vmem:[%s256_s17 + $0x18] sm:$0xff]   ;;  %v333_v7 = vshrl.u32 %v588_v4, 16  ;;  %v696_v8 = vld [vmem:[%s256_s17] sm:$0xff]   ;;  %v335_v9 = vshll.u32 %v588_v4, 16  ;;  %v395_v15 = vrot.slane %v588_v4, 1 }
  0x21   : > { %611 = vmatpush3.bf16.msra.mxu0 %v694_v5  ;;  %619 = vmatpush3.bf16.msra.mxu1 %v695_v6  ;;  %v698_v10 = vld [vmem:[%s256_s17 + $0x10] sm:$0xff]   ;;  %v699_v12 = vld [vmem:[%s256_s17 + $0x28] sm:$0xff]   ;;  %v700_v14 = vld [vmem:[%s256_s17 + $0x20] sm:$0xff]  }
  0x22   : > { %612 = vmatprep.subr.bf16.mxu0 %v758_v2  ;;  %620 = vmatprep.subr.bf16.mxu1 %v758_v2  ;;  %v337_v11 = vrot.slane %v335_v9, 1 }
  0x23   : > { %v269_v16 = vld [vmem:[%s841_s12] sm:$0xff] }
  0x24   : > { %v338_v13 = vor.u32 %v337_v11, %v333_v7 }
  0x25   : > { %613 = vmatpush3.bf16.msra.mxu0 %v696_v8  ;;  %621 = vmatpush3.bf16.msra.mxu1 %v698_v10 }
  0x26   : > { %626 = vmatprep.subr.bf16.mxu0 %v758_v2 }
  0x28   : > { %615 = vmatmul.mubr.msk.bf16.vlgmr.msra.gmra.mxu0 %vm282_vm1, %v252_v1  ;;  %623 = vmatmul.mubr.msk.bf16.vlgmr.msra.gmra.mxu1 %vm282_vm1, %v338_v13 }
  0x29   : > { %627 = vmatpush3.bf16.msra.mxu0 %v699_v12  ;;  %630 = vmatprep.mubr.msk.bf16.mxu0 %vm759_vm0, %v758_v2 }
  0x2a   : > { %628 = vmatprep.subr.bf16.mxu0 %v758_v2 }
  0x2d   : > { %629 = vmatpush3.bf16.msra.mxu0 %v700_v14 }
  0x30   : > { %631 = vmatmul.mubr.msk.bf16.vlgmr.msra.gmra.mxu0 %vm282_vm1, %v395_v15 }
  0xe8   : > { %v320_v17 = vpop.f32.mrf.mxu0  ;;  %v388_v18 = vpop.f32.mrf.mxu1 }
  0xe9   : > { %v326_v20 = vadd.f32 %v320_v17, %v269_v16 }
  0xea   : > { %v616_v19 = vpop.f32.mrf.mxu0  ;;  %v624_v21 = vpop.f32.mrf.mxu1 }
  0xeb   : > { %v394_v25 = vadd.f32 %v388_v18, %v326_v20 }
  0xec   : > { %v323_v22 = vpop.f32.mrf.mxu0  ;;  %v391_v23 = vpop.f32.mrf.mxu1 }
  0xee   : > { %v617_v24 = vpop.f32.mrf.mxu0  ;;  %v625_v26 = vpop.f32.mrf.mxu1 }
  0xf0   : > { %v445_v27 = vpop.f32.mrf.mxu0 }
  0xf1   : > { %v451_v28 = vadd.f32 %v445_v27, %v394_v25 }
  0xf2   : > { %v632_v29 = vpop.f32.mrf.mxu0  ;;  %456 = sbr.rel (%p595_p10) target bundleno = 257 (0x101), region = 44 }
  0xf3   : > { %452 = vst [vmem:[%s841_s12] sm:$0xff] %v451_v28 }
  0xf4   : > { %v448_v30 = vpop.f32.mrf.mxu0 }
  0xf6   : > { %v633_v31 = vpop.f32.mrf.mxu0 }
  0xf7   : > { %v596_v33 = vld [vmem:[%s886_s2] ss:$0 sm:$0xff] }
  0xf8   : > { %v597_v34 = vld [vmem:[%s887_s3] ss:$0 sm:$0xff] }
  0xfa   : > { %v457_v32 = vld [vmem:[%s841_s12] sm:$0xff] }
  0xfb   : > { %v465_v35 = vadd.f32 %v596_v33, %v457_v32 }
  0xfd   : > { %vm466_vm2 = vcmp.ge.f32.partialorder %v465_v35, 0.0  ;;  %v474_v36 = vmul.f32 %v597_v34, %v465_v35 }
  0xff   : > { %v475_v37 = vsel %vm466_vm2, %v465_v35, %v474_v36 }
 0x100   : > { %476 = vst [vmem:[%s841_s12] sm:$0xff] %v475_v37 }
 0x101 PF: > { %s14_s21 = sadd.s32 1, %s755_s21   ;;  %s889_s15 = smov %s743_s18 }
 0x102   : > { %p11_p11 = scmp.ge.s32.totalorder %s14_s21, 50   ;;  %s890_s16 = smov %s747_s19 }
 0x103   : > { %s891_s17 = smov %s751_s20  ;;  %s892_s18 = smov %s896_s22 }
 0x104   : > { %s893_s19 = smov %s900_s23  ;;  %s894_s20 = smov %s904_s24 }
 0x105   :  { %13 = sbr.rel (!%p11_p11) target bundleno = 4 (0x4), region = 75 }

// kernel: caun_forward.12
= control target key start
LH: loop header
LB: loop body
LE: loop exit
PB: predicated region body
PF: predicated region fallthrough
CT: control target
= control target key end

     0   :  { %s823_s15 = smov 0   ;;  %s825_s16 = smov 0   ;;  %s945_s0 = inlined_call_operand.vmem [shape: bf16[2,18,18,20], index: 0, kind: input, shape index: {}]   ;;  %s946_s1 = inlined_call_operand.vmem [shape: bf16[3,60,128], index: 1, kind: input, shape index: {}]   ;;  %s947_s2 = inlined_call_operand.vmem [shape: f32[1,128], index: 2, kind: input, shape index: {}]   ;;  %s948_s3 = inlined_call_operand.vmem [shape: f32[1,128], index: 3, kind: input, shape index: {}]   ;;  %s949_s4 = inlined_call_operand.vmem [shape: f32[2,16,16,128], index: 4, kind: output, shape index: {}]  }
   0x1   :  { %s827_s17 = smov 0   ;;  %s829_s18 = smov 0  }
   0x2   :  { %s831_s19 = smov 0   ;;  %s833_s20 = smov 0  }
   0x3   :  { %s835_s21 = smov 0  }
   0x4 LB: > { %s26_s22 = sadd.s32 1, %s781_s18  ;;  %s29_s23 = sadd.s32 1, %s785_s19  ;;  %s793_s21 = sphi %s835_s21, %s14_s21   ;;  %s789_s20 = sphi %s833_s20, %s955_s20   ;;  %s785_s19 = sphi %s831_s19, %s954_s19   ;;  %s781_s18 = sphi %s829_s18, %s953_s18   ;;  %s777_s17 = sphi %s827_s17, %s952_s17   ;;  %s773_s16 = sphi %s825_s16, %s951_s16   ;;  %s769_s15 = sphi %s823_s15, %s950_s15  }
   0x5   : > { %p27_p0 = scmp.ge.s32.totalorder %s26_s22, 3  ;;  %p612_p1 = scmp.ge.s32.totalorder %s793_s21, 1 }
   0x6   : > { %p193_p2 = scmp.lt.s32.totalorder %s793_s21, 97  ;;  %s33_s24 = sadd.s32 1, %s789_s20 }
   0x7   : > { %s957_s22 = smov (%p27_p0, %s26_s22), 0  ;;  %s959_s23 = smov (!%p27_p0, %s29_s23), %s785_s19 }
   0x8   : > { %p194_p3 = pnand %p612_p1, %p193_p2  ;;  %p31_p4 = scmp.ge.s32.totalorder %s959_s23, 16 }
   0x9   : > { %s228_s25 = sadd.s32 (!%p194_p3), %s769_s15, %s773_s16  ;;  %p229_p6 = scmp.lt.s32.totalorder (!%p194_p3), %s777_s17, 1 }
   0xa   : > { %s961_s23 = smov (%p31_p4, %s959_s23), 0  ;;  %s963_s24 = smov (!%p31_p4, %s33_s24), %s789_s20 }
   0xb   : > { %p35_p5 = scmp.ge.s32.totalorder %s963_s24, 2  ;;  %197 = sbr.rel (%p194_p3) target bundleno = 260 (0x104), region = 36 }
   0xc   : > { %p231_p7 = scmp.lt.s32.totalorder (!%p194_p3), %s228_s25, 17  ;;  %p241_p8 = scmp.lt.s32.totalorder (!%p194_p3), %s773_s16, 15 }
   0xd   : > { %s965_s24 = smov (%p35_p5, %s963_s24), 0  ;;  %p617_p9 = scmp.ne.s32.totalorder (!%p194_p3), %s769_s15, 0 }
  0x10   : > { %s967_s17 = smov (!%p229_p6, %s777_s17), 1  ;;  %s969_s25 = smov (!%p231_p7, %s228_s25), 17 }
  0x11   : > { %s671_s26 = smul.u32 54, %s967_s17  ;;  %s615_s28 = sshll.u32 %s967_s17, 5 }
  0x12   : > { %s670_s27 = smul.u32 3, %s969_s25  ;;  %s971_s16 = smov (!%p241_p8, %s773_s16), 15 }
  0x13   : > { %s614_s5 = sshll.u32 %s971_s16, 1  ;;  %252 = sbr.rel (%p617_p9) target bundleno = 26 (0x1a), region = 40 }
  0x14   : > { %s235_s29 = sadd.s32 %s671_s26, %s670_s27  ;;  %s245_s9 = sadd.s32 %s615_s28, %s614_s5 }
  0x15   : > { %s613_s30 = sshll.u32 %s235_s29, 2  ;;  %s616_s10 = sshll.u32 %s245_s9, 3 }
  0x16   : > { %s876_s8 = scalar_lea.vmem %s945_s0, %s613_s30  ;;  %s881_s13 = scalar_lea.vmem %s949_s4, %s616_s10 }
  0x18   : > { %v795_v0 = vmov 0.0  }
  0x19   : > { %253 = vst [vmem:[%s881_s13] sm:$0xff] %v795_v0  ;;  %254 = vst [vmem:[%s881_s13 + $0x8] sm:$0xff] %v795_v0 }
  0x1a PF: > { %s636_s14 = sshll.u32 %s769_s15, 5  ;;  %v796_v1 = vmov 0.0   ;;  %vm289_vm0 = vcmask 1041408   ;;  %v735_v2 = vld [vmem:[%s876_s8] sm:$0xff]   ;;  %vm797_vm1 = vmmov 0   ;;  %vm357_vm2 = vcmask 1045504  }
  0x1b   : > { %646 = vmatprep.subr.bf16.mxu0 %v796_v1  ;;  %s890_s25 = scalar_lea.vmem %s946_s1, %s636_s14  ;;  %654 = vmatprep.subr.bf16.mxu1 %v796_v1  ;;  %v737_v13 = vld [vmem:[%s876_s8 + $0x8] ss:$0 sps:$4 sm:$0x11]   ;;  %v340_v14 = vshrl.u32 %v735_v2, 16  ;;  %v342_v16 = vshll.u32 %v735_v2, 16  ;;  %vm285_vm3 = vcmask 162816  }
  0x1c   : > { %v263_v3 = vld [vmem:[%s890_s25 + $0x8] sm:$0xf]  ;;  %v264_v4 = vld [vmem:[%s890_s25 + $0xc] sm:$0xf]  ;;  %650 = vmatprep.mubr.msk.bf16.mxu0 %vm797_vm1, %v796_v1  ;;  %658 = vmatprep.mubr.msk.bf16.mxu1 %vm797_vm1, %v796_v1  ;;  %v733_v7 = vld [vmem:[%s890_s25 + $0x10] ss:$0 sps:$4 sm:$0xff]  }
  0x1d   : > { %v622_v5 = vcombine.low %v263_v3, %v263_v3  ;;  %v625_v6 = vcombine.low %v263_v3, %v264_v4  ;;  %v359_v10 = vrot.slane %v733_v7, 2  ;;  %v736_v11 = vld [vmem:[%s890_s25 + $0x1c] ss:$0 sps:$4 sm:$0x33]   ;;  %v734_v12 = vld [vmem:[%s890_s25] sm:$0xff]   ;;  %v347_v17 = vshll.u32 %v737_v13, 16 }
  0x1e   : > { %v344_v19 = vrot.slane %v342_v16, 1  ;;  %vm339_vm4 = vsmask.f32 7424  ;;  %v428_v21 = vsel %vm289_vm0, %v736_v11, 0  ;;  %v738_v24 = vld [vmem:[%s890_s25 + $0x14] sm:$0xff]   ;;  %v412_v25 = vrot.slane %v735_v2, 1 }
  0x1f   : > { %v291_v8 = vsel %vm289_vm0, %v622_v5, 0  ;;  %v358_v9 = vrot.slane %v625_v6, 2  ;;  %v366_v15 = vsel %vm289_vm0, %v359_v10, 0  ;;  %v349_v20 = vrot.slane %v347_v17, 1  ;;  %p631_p10 = scmp.ne.s32.totalorder %s769_s15, 2 }
  0x20   : > { %647 = vmatpush3.bf16.msra.mxu0 %v291_v8  ;;  %655 = vmatpush3.bf16.msra.mxu1 %v366_v15  ;;  %v345_v22 = vor.u32 %v344_v19, %v340_v14  ;;  %v413_v26 = vrot.slane %v737_v13, 1  ;;  %vm411_vm5 = vcmask 1046528   ;;  %v269_v28 = vld [vmem:[%s881_s13] sm:$0xff]  ;;  %v270_v33 = vld [vmem:[%s881_s13 + $0x8] sm:$0xff] }
  0x21   : > { %648 = vmatprep.subr.bf16.mxu0 %v796_v1  ;;  %656 = vmatprep.subr.bf16.mxu1 %v796_v1  ;;  %v360_v18 = vsel %vm357_vm2, %v358_v9, %v359_v10 }
  0x22   : > { %v350_v23 = vsel %vm339_vm4, %v345_v22, %v349_v20  ;;  %v414_v27 = vsel %vm411_vm5, %v412_v25, %v413_v26 }
  0x24   : > { %649 = vmatpush3.bf16.msra.mxu0 %v734_v12  ;;  %657 = vmatpush3.bf16.msra.mxu1 %v360_v18 }
  0x25   : > { %662 = vmatprep.subr.bf16.mxu0 %v796_v1 }
  0x27   : > { %651 = vmatmul.mubr.msk.bf16.vlgmr.msra.gmra.mxu0 %vm285_vm3, %v735_v2  ;;  %659 = vmatmul.mubr.msk.bf16.vlgmr.msra.gmra.mxu1 %vm285_vm3, %v350_v23 }
  0x28   : > { %663 = vmatpush3.bf16.msra.mxu0 %v428_v21  ;;  %666 = vmatprep.mubr.msk.bf16.mxu0 %vm797_vm1, %v796_v1 }
  0x29   : > { %664 = vmatprep.subr.bf16.mxu0 %v796_v1 }
  0x2c   : > { %665 = vmatpush3.bf16.msra.mxu0 %v738_v24 }
  0x2f   : > { %667 = vmatmul.mubr.msk.bf16.vlgmr.msra.gmra.mxu0 %vm285_vm3, %v414_v27 }
  0xe7   : > { %v327_v29 = vpop.f32.mrf.mxu0  ;;  %v402_v31 = vpop.f32.mrf.mxu1 }
  0xe8   : > { %v334_v32 = vadd.f32 %v327_v29, %v269_v28 }
  0xe9   : > { %v652_v30 = vpop.f32.mrf.mxu0  ;;  %v660_v35 = vpop.f32.mrf.mxu1 }
  0xea   : > { %v409_v38 = vadd.f32 %v402_v31, %v334_v32 }
  0xeb   : > { %v330_v34 = vpop.f32.mrf.mxu0  ;;  %v405_v37 = vpop.f32.mrf.mxu1 }
  0xec   : > { %v335_v39 = vadd.f32 %v330_v34, %v270_v33 }
  0xed   : > { %v653_v36 = vpop.f32.mrf.mxu0  ;;  %v661_v40 = vpop.f32.mrf.mxu1 }
  0xee   : > { %v410_v44 = vadd.f32 %v405_v37, %v335_v39 }
  0xef   : > { %v464_v41 = vpop.f32.mrf.mxu0 }
  0xf0   : > { %v471_v42 = vadd.f32 %v464_v41, %v409_v38 }
  0xf1   : > { %v668_v43 = vpop.f32.mrf.mxu0 }
  0xf2   : > { %473 = vst [vmem:[%s881_s13] sm:$0xff] %v471_v42  ;;  %478 = sbr.rel (%p631_p10) target bundleno = 260 (0x104), region = 44 }
  0xf3   : > { %v467_v45 = vpop.f32.mrf.mxu0 }
  0xf4   : > { %v472_v46 = vadd.f32 %v467_v45, %v410_v44 }
  0xf5   : > { %v669_v47 = vpop.f32.mrf.mxu0 }
  0xf6   : > { %474 = vst [vmem:[%s881_s13 + $0x8] sm:$0xff] %v472_v46 }
  0xf7   : > { %v632_v49 = vld [vmem:[%s947_s2] ss:$0 sm:$0xff] }
  0xf8   : > { %v633_v50 = vld [vmem:[%s948_s3] ss:$0 sm:$0xff] }
  0xf9   : > { %v479_v48 = vld [vmem:[%s881_s13] sm:$0xff] }
  0xfa   : > { %v488_v51 = vadd.f32 %v632_v49, %v479_v48 }
  0xfc   : > { %vm490_vm6 = vcmp.ge.f32.partialorder %v488_v51, 0.0  ;;  %v499_v54 = vmul.f32 %v633_v50, %v488_v51 }
  0xfd   : > { %v480_v52 = vld [vmem:[%s881_s13 + $0x8] sm:$0xff] }
  0xfe   : > { %v489_v53 = vadd.f32 %v632_v49, %v480_v52  ;;  %v501_v56 = vsel %vm490_vm6, %v488_v51, %v499_v54 }
  0xff   : > { %503 = vst [vmem:[%s881_s13] sm:$0xff] %v501_v56 }
 0x100   : > { %vm491_vm7 = vcmp.ge.f32.partialorder %v489_v53, 0.0  ;;  %v500_v55 = vmul.f32 %v633_v50, %v489_v53 }
 0x102   : > { %v502_v57 = vsel %vm491_vm7, %v489_v53, %v500_v55 }
 0x103   : > { %504 = vst [vmem:[%s881_s13 + $0x8] sm:$0xff] %v502_v57 }
 0x104 PF: > { %s14_s21 = sadd.s32 1, %s793_s21   ;;  %s950_s15 = smov %s781_s18 }
 0x105   : > { %p11_p11 = scmp.ge.s32.totalorder %s14_s21, 98   ;;  %s951_s16 = smov %s785_s19 }
 0x106   : > { %s952_s17 = smov %s789_s20  ;;  %s953_s18 = smov %s957_s22 }
 0x107   : > { %s954_s19 = smov %s961_s23  ;;  %s955_s20 = smov %s965_s24 }
 0x108   :  { %13 = sbr.rel (!%p11_p11) target bundleno = 4 (0x4), region = 75 }

// kernel: caun_forward.13
= control target key start
LH: loop header
LB: loop body
LE: loop exit
PB: predicated region body
PF: predicated region fallthrough
CT: control target
= control target key end

     0   :  { %s869_s15 = smov 0   ;;  %s871_s16 = smov 0   ;;  %s999_s0 = inlined_call_operand.vmem [shape: bf16[2,34,34,12], index: 0, kind: input, shape index: {}]   ;;  %s1000_s1 = inlined_call_operand.vmem [shape: bf16[3,36,128], index: 1, kind: input, shape index: {}]   ;;  %s1001_s2 = inlined_call_operand.vmem [shape: f32[1,128], index: 2, kind: input, shape index: {}]   ;;  %s1002_s3 = inlined_call_operand.vmem [shape: f32[1,128], index: 3, kind: input, shape index: {}]   ;;  %s1003_s4 = inlined_call_operand.vmem [shape: f32[2,32,32,128], index: 4, kind: output, shape index: {}]  }
   0x1   :  { %s873_s17 = smov 0   ;;  %s875_s18 = smov 0  }
   0x2   :  { %s877_s19 = smov 0   ;;  %s879_s20 = smov 0  }
   0x3   :  { %s881_s21 = smov 0  }
   0x4 LB: > { %s26_s22 = sadd.s32 1, %s829_s18  ;;  %s29_s23 = sadd.s32 1, %s833_s19  ;;  %s841_s21 = sphi %s881_s21, %s14_s21   ;;  %s837_s20 = sphi %s879_s20, %s1009_s20   ;;  %s833_s19 = sphi %s877_s19, %s1008_s19   ;;  %s829_s18 = sphi %s875_s18, %s1007_s18   ;;  %s825_s17 = sphi %s873_s17, %s1006_s17   ;;  %s821_s16 = sphi %s871_s16, %s1005_s16   ;;  %s817_s15 = sphi %s869_s15, %s1004_s15  }
   0x5   : > { %p27_p0 = scmp.ge.s32.totalorder %s26_s22, 3  ;;  %p667_p1 = scmp.ge.s32.totalorder %s841_s21, 1 }
   0x6   : > { %p193_p2 = scmp.lt.s32.totalorder %s841_s21, 193  ;;  %s33_s24 = sadd.s32 1, %s837_s20 }
   0x7   : > { %s1011_s22 = smov (%p27_p0, %s26_s22), 0  ;;  %s1013_s23 = smov (!%p27_p0, %s29_s23), %s833_s19 }
   0x8   : > { %p194_p3 = pnand %p667_p1, %p193_p2  ;;  %p31_p4 = scmp.ge.s32.totalorder %s1013_s23, 32 }
   0x9   : > { %s228_s25 = sadd.s32 (!%p194_p3), %s817_s15, %s821_s16  ;;  %p229_p6 = scmp.lt.s32.totalorder (!%p194_p3), %s825_s17, 1 }
   0xa   : > { %s1015_s23 = smov (%p31_p4, %s1013_s23), 0  ;;  %s1017_s24 = smov (!%p31_p4, %s33_s24), %s837_s20 }
   0xb   : > { %p35_p5 = scmp.ge.s32.totalorder %s1017_s24, 2  ;;  %197 = sbr.rel (%p194_p3) target bundleno = 260 (0x104), region = 36 }
   0xc   : > { %p231_p7 = scmp.lt.s32.totalorder (!%p194_p3), %s228_s25, 33  ;;  %p241_p8 = scmp.lt.s32.totalorder (!%p194_p3), %s821_s16, 31 }
   0xd   : > { %s1019_s24 = smov (%p35_p5, %s1017_s24), 0  ;;  %p672_p9 = scmp.ne.s32.totalorder (!%p194_p3), %s817_s15, 0 }
  0x10   : > { %s1021_s17 = smov (!%p229_p6, %s825_s17), 1  ;;  %s1023_s25 = smov (!%p231_p7, %s228_s25), 33 }
  0x11   : > { %s723_s26 = smul.u32 170, %s1021_s17  ;;  %s670_s28 = sshll.u32 %s1021_s17, 7 }
  0x12   : > { %s722_s27 = smul.u32 5, %s1023_s25  ;;  %s1025_s16 = smov (!%p241_p8, %s821_s16), 31 }
  0x13   : > { %s669_s5 = sshll.u32 %s1025_s16, 2  ;;  %252 = sbr.rel (%p672_p9) target bundleno = 27 (0x1b), region = 40 }
  0x14   : > { %s235_s29 = sadd.s32 %s723_s26, %s722_s27  ;;  %s245_s9 = sadd.s32 %s670_s28, %s669_s5 }
  0x15   : > { %s668_s30 = sshll.u32 %s235_s29, 2  ;;  %s671_s10 = sshll.u32 %s245_s9, 3 }
  0x16   : > { %s922_s8 = scalar_lea.vmem %s999_s0, %s668_s30  ;;  %s927_s13 = scalar_lea.vmem %s1003_s4, %s671_s10 }
  0x18   : > { %v843_v0 = vmov 0.0  }
  0x19   : > { %253 = vst [vmem:[%s927_s13] sm:$0xff] %v843_v0  ;;  %254 = vst [vmem:[%s927_s13 + $0x8] sm:$0xff] %v843_v0 }
  0x1a   : > { %255 = vst [vmem:[%s927_s13 + $0x10] sm:$0xff] %v843_v0  ;;  %256 = vst [vmem:[%s927_s13 + $0x18] sm:$0xff] %v843_v0 }
  0x1b PF: > { %s691_s14 = smul.u32 20, %s817_s15  ;;  %v783_v1 = vld [vmem:[%s922_s8] sm:$0xff]   ;;  %vm289_vm0 = vcmask 97280   ;;  %vm296_vm1 = vcmask 1045504   ;;  %v784_v2 = vld [vmem:[%s922_s8 + $0x8] sm:$0xff]   ;;  %vm441_vm2 = vcmask 1046528  }
  0x1c   : > { %703 = vmatprep.mubr.msk.bf16.mxu0 %vm289_vm0, %v783_v1  ;;  %v357_v9 = vshrl.u32 %v783_v1, 16  ;;  %v359_v10 = vshll.u32 %v783_v1, 16  ;;  %v363_v11 = vshll.u32 %v784_v2, 16  ;;  %v367_v12 = vshrl.u32 %v784_v2, 16  ;;  %p686_p10 = scmp.ne.s32.totalorder %s817_s15, 2 }
  0x1d   : > { %s264_s25 = scalar_lea.vmem %s1000_s1, %s691_s14  ;;  %v786_v15 = vld [vmem:[%s922_s8 + $0x10] ss:$0 sps:$4 sm:$0x11]   ;;  %v442_v18 = vrot.slane %v783_v1, 1  ;;  %v443_v19 = vrot.slane %v784_v2, 1 }
  0x1e   : > { %v265_v3 = vld [vmem:[%s264_s25] sm:$0xf]  ;;  %v266_v4 = vld [vmem:[%s264_s25 + $0x4] sm:$0xf]  ;;  %v267_v5 = vld [vmem:[%s264_s25 + $0x8] sm:$0xf] }
  0x1f   : > { %v676_v6 = vcombine.low %v265_v3, %v266_v4  ;;  %v680_v7 = vcombine.low %v266_v4, %v267_v5  ;;  %v785_v8 = vld [vmem:[%s264_s25 + $0xc] sm:$0x3f]   ;;  %v361_v16 = vrot.slane %v359_v10, 1  ;;  %v365_v17 = vrot.slane %v363_v11, 1 }
  0x20   : > { %vm356_vm3 = vsmask.f32 7424  ;;  %v459_v21 = vsel %vm296_vm1, %v785_v8, 0  ;;  %v371_v22 = vshll.u32 %v786_v15, 16  ;;  %v444_v25 = vsel %vm441_vm2, %v442_v18, %v443_v19  ;;  %v270_v33 = vld [vmem:[%s927_s13] sm:$0xff]  ;;  %v271_v41 = vld [vmem:[%s927_s13 + $0x8] sm:$0xff] }
  0x21   : > { %719 = vmatprep.subr.msk.bf16.mxu0 %vm296_vm1, %v676_v6  ;;  %v298_v13 = vsel %vm296_vm1, %v676_v6, 0  ;;  %v378_v14 = vrot.slane %v680_v7, 2  ;;  %v362_v23 = vor.u32 %v361_v16, %v357_v9  ;;  %v369_v24 = vor.u32 %v367_v12, %v365_v17  ;;  %v272_v31 = vld [vmem:[%s927_s13 + $0x10] sm:$0xff]  ;;  %v273_v37 = vld [vmem:[%s927_s13 + $0x18] sm:$0xff] }
  0x22   : > { %702 = vmatpush3.bf16.msra.mxu0 %v298_v13  ;;  %v373_v26 = vrot.slane %v371_v22, 1  ;;  %v445_v28 = vrot.slane %v786_v15, 1 }
  0x23   : > { %720 = vmatprep.subr.msk.bf16.mxu1 %vm296_vm1, %v378_v14  ;;  %v386_v20 = vsel %vm296_vm1, %v378_v14, 0  ;;  %721 = vmatprep.subr.msk.bf16.mxu0 %vm296_vm1, %v785_v8  ;;  %v366_v27 = vsel %vm356_vm3, %v362_v23, %v365_v17 }
  0x24   : > { %708 = vmatpush3.bf16.msra.mxu1 %v386_v20  ;;  %709 = vmatprep.mubr.msk.bf16.mxu1 %vm289_vm0, %v366_v27  ;;  %v374_v29 = vsel %vm356_vm3, %v369_v24, %v373_v26  ;;  %v446_v30 = vsel %vm441_vm2, %v443_v19, %v445_v28 }
  0x25   : > { %704 = vmatmul.mubr.msk.bf16.vlgmr.msra.gmra.mxu0 %vm289_vm0, %v784_v2 }
  0x26   : > { %714 = vmatpush3.bf16.msra.mxu0 %v459_v21  ;;  %715 = vmatprep.mubr.msk.bf16.mxu0 %vm289_vm0, %v444_v25 }
  0x27   : > { %710 = vmatmul.mubr.msk.bf16.vlgmr.msra.gmra.mxu1 %vm289_vm0, %v374_v29 }
  0x2d   : > { %716 = vmatmul.mubr.msk.bf16.vlgmr.msra.gmra.mxu0 %vm289_vm0, %v446_v30 }
  0xe5   : > { %v705_v32 = vpop.f32.mrf.mxu0 }
  0xe6   : > { %v351_v35 = vadd.f32 %v705_v32, %v272_v31 }
  0xe7   : > { %v334_v34 = vpop.f32.mrf.mxu0  ;;  %v711_v36 = vpop.f32.mrf.mxu1 }
  0xe8   : > { %v349_v39 = vadd.f32 %v334_v34, %v270_v33  ;;  %v439_v43 = vadd.f32 %v711_v36, %v351_v35 }
  0xe9   : > { %v706_v38 = vpop.f32.mrf.mxu0  ;;  %v422_v40 = vpop.f32.mrf.mxu1 }
  0xea   : > { %v352_v44 = vadd.f32 %v706_v38, %v273_v37  ;;  %v437_v47 = vadd.f32 %v422_v40, %v349_v39 }
  0xeb   : > { %v337_v42 = vpop.f32.mrf.mxu0  ;;  %v712_v45 = vpop.f32.mrf.mxu1 }
  0xec   : > { %v350_v48 = vadd.f32 %v337_v42, %v271_v41  ;;  %v440_v52 = vadd.f32 %v712_v45, %v352_v44 }
  0xed   : > { %v717_v46 = vpop.f32.mrf.mxu0  ;;  %v425_v50 = vpop.f32.mrf.mxu1 }
  0xee   : > { %v512_v49 = vadd.f32 %v717_v46, %v439_v43  ;;  %v438_v55 = vadd.f32 %v425_v50, %v350_v48 }
  0xef   : > { %v495_v51 = vpop.f32.mrf.mxu0 }
  0xf0   : > { %516 = vst [vmem:[%s927_s13 + $0x10] sm:$0xff] %v512_v49  ;;  %v510_v53 = vadd.f32 %v495_v51, %v437_v47 }
  0xf1   : > { %v718_v54 = vpop.f32.mrf.mxu0 }
  0xf2   : > { %514 = vst [vmem:[%s927_s13] sm:$0xff] %v510_v53  ;;  %v513_v56 = vadd.f32 %v718_v54, %v440_v52  ;;  %521 = sbr.rel (%p686_p10) target bundleno = 260 (0x104), region = 44 }
  0xf3   : > { %v498_v57 = vpop.f32.mrf.mxu0 }
  0xf4   : > { %517 = vst [vmem:[%s927_s13 + $0x18] sm:$0xff] %v513_v56  ;;  %v511_v58 = vadd.f32 %v498_v57, %v438_v55 }
  0xf6   : > { %515 = vst [vmem:[%s927_s13 + $0x8] sm:$0xff] %v511_v58 }
  0xf7   : > { %v687_v60 = vld [vmem:[%s1001_s2] ss:$0 sm:$0xff]  ;;  %v524_v0 = vld [vmem:[%s927_s13 + $0x10] sm:$0xff] }
  0xf8   : > { %v688_v61 = vld [vmem:[%s1002_s3] ss:$0 sm:$0xff]  ;;  %v535_v3 = vadd.f32 %v687_v60, %v524_v0 }
  0xf9   : > { %v522_v59 = vld [vmem:[%s927_s13] sm:$0xff] }
  0xfa   : > { %v533_v62 = vadd.f32 %v687_v60, %v522_v59  ;;  %vm539_vm6 = vcmp.ge.f32.partialorder %v535_v3, 0.0  ;;  %v550_v7 = vmul.f32 %v688_v61, %v535_v3 }
  0xfb   : > { %v525_v1 = vld [vmem:[%s927_s13 + $0x18] sm:$0xff] }
  0xfc   : > { %v536_v4 = vadd.f32 %v687_v60, %v525_v1  ;;  %vm537_vm4 = vcmp.ge.f32.partialorder %v533_v62, 0.0  ;;  %v548_v5 = vmul.f32 %v688_v61, %v533_v62  ;;  %v554_v11 = vsel %vm539_vm6, %v535_v3, %v550_v7 }
  0xfd   : > { %v523_v63 = vld [vmem:[%s927_s13 + $0x8] sm:$0xff]  ;;  %558 = vst [vmem:[%s927_s13 + $0x10] sm:$0xff] %v554_v11 }
  0xfe   : > { %v534_v2 = vadd.f32 %v687_v60, %v523_v63  ;;  %v552_v8 = vsel %vm537_vm4, %v533_v62, %v548_v5  ;;  %vm540_vm7 = vcmp.ge.f32.partialorder %v536_v4, 0.0  ;;  %v551_v9 = vmul.f32 %v688_v61, %v536_v4 }
  0xff   : > { %556 = vst [vmem:[%s927_s13] sm:$0xff] %v552_v8 }
 0x100   : > { %vm538_vm5 = vcmp.ge.f32.partialorder %v534_v2, 0.0  ;;  %v549_v6 = vmul.f32 %v688_v61, %v534_v2  ;;  %v555_v12 = vsel %vm540_vm7, %v536_v4, %v551_v9 }
 0x101   : > { %559 = vst [vmem:[%s927_s13 + $0x18] sm:$0xff] %v555_v12 }
 0x102   : > { %v553_v10 = vsel %vm538_vm5, %v534_v2, %v549_v6 }
 0x103   : > { %557 = vst [vmem:[%s927_s13 + $0x8] sm:$0xff] %v553_v10 }
 0x104 PF: > { %s14_s21 = sadd.s32 1, %s841_s21   ;;  %s1004_s15 = smov %s829_s18 }
 0x105   : > { %p11_p11 = scmp.ge.s32.totalorder %s14_s21, 194   ;;  %s1005_s16 = smov %s833_s19 }
 0x106   : > { %s1006_s17 = smov %s837_s20  ;;  %s1007_s18 = smov %s1011_s22 }
 0x107   : > { %s1008_s19 = smov %s1015_s23  ;;  %s1009_s20 = smov %s1019_s24 }
 0x108   :  { %13 = sbr.rel (!%p11_p11) target bundleno = 4 (0x4), region = 75 }

// kernel: caun_forward.16
= control target key start
LH: loop header
LB: loop body
LE: loop exit
PB: predicated region body
PF: predicated region fallthrough
CT: control target
= control target key end

     0   :  { %s853_s15 = smov 0   ;;  %s855_s16 = smov 0   ;;  %s983_s0 = inlined_call_operand.vmem [shape: bf16[2,34,34,4], index: 0, kind: input, shape index: {}]   ;;  %s984_s1 = inlined_call_operand.vmem [shape: bf16[3,12,128], index: 1, kind: input, shape index: {}]   ;;  %s985_s2 = inlined_call_operand.vmem [shape: f32[1,128], index: 2, kind: input, shape index: {}]   ;;  %s986_s3 = inlined_call_operand.vmem [shape: f32[1,128], index: 3, kind: input, shape index: {}]   ;;  %s987_s4 = inlined_call_operand.vmem [shape: f32[2,32,32,128], index: 4, kind: output, shape index: {}]  }
   0x1   :  { %s857_s17 = smov 0   ;;  %s859_s18 = smov 0  }
   0x2   :  { %s861_s19 = smov 0   ;;  %s863_s20 = smov 0  }
   0x3   :  { %s865_s21 = smov 0  }
   0x4 LB: > { %s26_s22 = sadd.s32 1, %s813_s18  ;;  %s29_s23 = sadd.s32 1, %s817_s19  ;;  %s825_s21 = sphi %s865_s21, %s14_s21   ;;  %s821_s20 = sphi %s863_s20, %s993_s20   ;;  %s817_s19 = sphi %s861_s19, %s992_s19   ;;  %s813_s18 = sphi %s859_s18, %s991_s18   ;;  %s809_s17 = sphi %s857_s17, %s990_s17   ;;  %s805_s16 = sphi %s855_s16, %s989_s16   ;;  %s801_s15 = sphi %s853_s15, %s988_s15  }
   0x5   : > { %p27_p0 = scmp.ge.s32.totalorder %s26_s22, 3  ;;  %p654_p1 = scmp.ge.s32.totalorder %s825_s21, 1 }
   0x6   : > { %p193_p2 = scmp.lt.s32.totalorder %s825_s21, 193  ;;  %s33_s24 = sadd.s32 1, %s821_s20 }
   0x7   : > { %s995_s22 = smov (%p27_p0, %s26_s22), 0  ;;  %s997_s23 = smov (!%p27_p0, %s29_s23), %s817_s19 }
   0x8   : > { %p194_p3 = pnand %p654_p1, %p193_p2  ;;  %p31_p4 = scmp.ge.s32.totalorder %s997_s23, 32 }
   0x9   : > { %s228_s25 = sadd.s32 (!%p194_p3), %s801_s15, %s805_s16  ;;  %p229_p6 = scmp.lt.s32.totalorder (!%p194_p3), %s809_s17, 1 }
   0xa   : > { %s999_s23 = smov (%p31_p4, %s997_s23), 0  ;;  %s1001_s24 = smov (!%p31_p4, %s33_s24), %s821_s20 }
   0xb   : > { %p35_p5 = scmp.ge.s32.totalorder %s1001_s24, 2  ;;  %197 = sbr.rel (%p194_p3) target bundleno = 257 (0x101), region = 36 }
   0xc   : > { %p231_p7 = scmp.lt.s32.totalorder (!%p194_p3), %s228_s25, 33  ;;  %p241_p8 = scmp.lt.s32.totalorder (!%p194_p3), %s805_s16, 31 }
   0xd   : > { %s1003_s24 = smov (%p35_p5, %s1001_s24), 0  ;;  %p659_p9 = scmp.ne.s32.totalorder (!%p194_p3), %s801_s15, 0 }
  0x10   : > { %s1005_s17 = smov (!%p229_p6, %s809_s17), 1  ;;  %s1007_s25 = smov (!%p231_p7, %s228_s25), 33 }
  0x11   : > { %s709_s26 = smul.u32 170, %s1005_s17  ;;  %s657_s28 = sshll.u32 %s1005_s17, 7 }
  0x12   : > { %s708_s27 = smul.u32 5, %s1007_s25  ;;  %s1009_s16 = smov (!%p241_p8, %s805_s16), 31 }
  0x13   : > { %s656_s5 = sshll.u32 %s1009_s16, 2  ;;  %252 = sbr.rel (%p659_p9) target bundleno = 27 (0x1b), region = 40 }
  0x14   : > { %s235_s29 = sadd.s32 %s709_s26, %s708_s27  ;;  %s245_s9 = sadd.s32 %s657_s28, %s656_s5 }
  0x15   : > { %s655_s30 = sshll.u32 %s235_s29, 2  ;;  %s658_s10 = sshll.u32 %s245_s9, 3 }
  0x16   : > { %s906_s8 = scalar_lea.vmem %s983_s0, %s655_s30  ;;  %s911_s13 = scalar_lea.vmem %s987_s4, %s658_s10 }
  0x18   : > { %v827_v0 = vmov 0.0  }
  0x19   : > { %253 = vst [vmem:[%s911_s13] sm:$0xff] %v827_v0  ;;  %254 = vst [vmem:[%s911_s13 + $0x8] sm:$0xff] %v827_v0 }
  0x1a   : > { %255 = vst [vmem:[%s911_s13 + $0x10] sm:$0xff] %v827_v0  ;;  %256 = vst [vmem:[%s911_s13 + $0x18] sm:$0xff] %v827_v0 }
  0x1b PF: > { %s677_s14 = sshll.u32 %s801_s15, 3  ;;  %vm288_vm0 = vcmask 1041408   ;;  %v767_v1 = vld [vmem:[%s906_s8] sm:$0xff]   ;;  %vm281_vm1 = vcmask 31744   ;;  %v768_v3 = vld [vmem:[%s906_s8 + $0x8] sm:$0xff]   ;;  %vm433_vm2 = vcmask 1046528  }
  0x1c   : > { %s264_s25 = scalar_lea.vmem %s984_s1, %s677_s14  ;;  %689 = vmatprep.mubr.msk.bf16.mxu0 %vm281_vm1, %v767_v1  ;;  %v349_v8 = vshrl.u32 %v767_v1, 16  ;;  %v351_v9 = vshll.u32 %v767_v1, 16  ;;  %v355_v10 = vshll.u32 %v768_v3, 16  ;;  %v359_v11 = vshrl.u32 %v768_v3, 16  ;;  %p672_p10 = scmp.ne.s32.totalorder %s801_s15, 2 }
  0x1d   : > { %v265_v2 = vld [vmem:[%s264_s25] sm:$0xf]  ;;  %v266_v4 = vld [vmem:[%s264_s25 + $0x4] sm:$0x3]  ;;  %v434_v14 = vrot.slane %v767_v1, 1  ;;  %v435_v15 = vrot.slane %v768_v3, 1 }
  0x1e   : > { %705 = vmatprep.subr.msk.bf16.mxu0 %vm288_vm0, %v265_v2  ;;  %v290_v5 = vsel %vm288_vm0, %v265_v2, 0  ;;  %v667_v6 = vcombine.low %v265_v2, %v265_v2  ;;  %v446_v7 = vsel %vm288_vm0, %v266_v4, 0  ;;  %v770_v13 = vld [vmem:[%s906_s8 + $0x10] ss:$0 sps:$4 sm:$0x11]   ;;  %v353_v16 = vrot.slane %v351_v9, 1 }
  0x1f   : > { %688 = vmatpush3.bf16.msra.mxu0 %v290_v5  ;;  %v357_v17 = vrot.slane %v355_v10, 1  ;;  %vm348_vm3 = vsmask.f32 7424  ;;  %v363_v19 = vshll.u32 %v770_v13, 16  ;;  %v436_v20 = vsel %vm433_vm2, %v434_v14, %v435_v15 }
  0x20   : > { %v370_v12 = vrot.slane %v667_v6, 2  ;;  %707 = vmatprep.subr.msk.bf16.mxu0 %vm288_vm0, %v266_v4  ;;  %v354_v21 = vor.u32 %v353_v16, %v349_v8  ;;  %v437_v23 = vrot.slane %v770_v13, 1  ;;  %v267_v31 = vld [vmem:[%s911_s13] sm:$0xff]  ;;  %v268_v40 = vld [vmem:[%s911_s13 + $0x8] sm:$0xff] }
  0x21   : > { %v361_v22 = vor.u32 %v359_v11, %v357_v17  ;;  %v365_v24 = vrot.slane %v363_v19, 1  ;;  %v269_v29 = vld [vmem:[%s911_s13 + $0x10] sm:$0xff]  ;;  %v270_v35 = vld [vmem:[%s911_s13 + $0x18] sm:$0xff] }
  0x22   : > { %690 = vmatmul.mubr.msk.bf16.vlgmr.msra.gmra.mxu0 %vm281_vm1, %v768_v3  ;;  %706 = vmatprep.subr.msk.bf16.mxu1 %vm288_vm0, %v370_v12  ;;  %v378_v18 = vsel %vm288_vm0, %v370_v12, 0  ;;  %v358_v25 = vsel %vm348_vm3, %v354_v21, %v357_v17  ;;  %v438_v27 = vsel %vm433_vm2, %v435_v15, %v437_v23 }
  0x23   : > { %694 = vmatpush3.bf16.msra.mxu1 %v378_v18  ;;  %700 = vmatpush3.bf16.msra.mxu0 %v446_v7  ;;  %v366_v26 = vsel %vm348_vm3, %v361_v22, %v365_v24 }
  0x24   : > { %701 = vmatprep.mubr.msk.bf16.mxu0 %vm281_vm1, %v436_v20  ;;  %695 = vmatprep.mubr.msk.bf16.mxu1 %vm281_vm1, %v358_v25 }
  0x26   : > { %696 = vmatmul.mubr.msk.bf16.vlgmr.msra.gmra.mxu1 %vm281_vm1, %v366_v26 }
  0x2a   : > { %702 = vmatmul.mubr.msk.bf16.vlgmr.msra.gmra.mxu0 %vm281_vm1, %v438_v27 }
  0xe2   : > { %v691_v28 = vpop.f32.mrf.mxu0 }
  0xe3   : > { %v343_v33 = vadd.f32 %v691_v28, %v269_v29 }
  0xe4   : > { %v326_v30 = vpop.f32.mrf.mxu0 }
  0xe5   : > { %v341_v37 = vadd.f32 %v326_v30, %v267_v31 }
  0xe6   : > { %v692_v32 = vpop.f32.mrf.mxu0  ;;  %v697_v34 = vpop.f32.mrf.mxu1 }
  0xe7   : > { %v431_v38 = vadd.f32 %v697_v34, %v343_v33  ;;  %v344_v42 = vadd.f32 %v692_v32, %v270_v35 }
  0xe8   : > { %v329_v36 = vpop.f32.mrf.mxu0  ;;  %v414_v39 = vpop.f32.mrf.mxu1 }
  0xe9   : > { %v429_v43 = vadd.f32 %v414_v39, %v341_v37  ;;  %v342_v47 = vadd.f32 %v329_v36, %v268_v40 }
  0xea   : > { %v703_v41 = vpop.f32.mrf.mxu0  ;;  %v698_v44 = vpop.f32.mrf.mxu1 }
  0xeb   : > { %v499_v45 = vadd.f32 %v703_v41, %v431_v38  ;;  %v432_v48 = vadd.f32 %v698_v44, %v344_v42 }
  0xec   : > { %v482_v46 = vpop.f32.mrf.mxu0  ;;  %v417_v49 = vpop.f32.mrf.mxu1 }
  0xed   : > { %503 = vst [vmem:[%s911_s13 + $0x10] sm:$0xff] %v499_v45  ;;  %v497_v50 = vadd.f32 %v482_v46, %v429_v43  ;;  %v430_v52 = vadd.f32 %v417_v49, %v342_v47 }
  0xee   : > { %v704_v51 = vpop.f32.mrf.mxu0 }
  0xef   : > { %501 = vst [vmem:[%s911_s13] sm:$0xff] %v497_v50  ;;  %v500_v53 = vadd.f32 %v704_v51, %v432_v48  ;;  %508 = sbr.rel (%p672_p10) target bundleno = 257 (0x101), region = 44 }
  0xf0   : > { %v485_v54 = vpop.f32.mrf.mxu0 }
  0xf1   : > { %504 = vst [vmem:[%s911_s13 + $0x18] sm:$0xff] %v500_v53  ;;  %v498_v55 = vadd.f32 %v485_v54, %v430_v52 }
  0xf3   : > { %502 = vst [vmem:[%s911_s13 + $0x8] sm:$0xff] %v498_v55 }
  0xf4   : > { %v673_v57 = vld [vmem:[%s985_s2] ss:$0 sm:$0xff]  ;;  %v511_v61 = vld [vmem:[%s911_s13 + $0x10] sm:$0xff] }
  0xf5   : > { %v674_v58 = vld [vmem:[%s986_s3] ss:$0 sm:$0xff]  ;;  %v522_v0 = vadd.f32 %v673_v57, %v511_v61 }
  0xf6   : > { %v509_v56 = vld [vmem:[%s911_s13] sm:$0xff] }
  0xf7   : > { %v520_v59 = vadd.f32 %v673_v57, %v509_v56  ;;  %vm526_vm6 = vcmp.ge.f32.partialorder %v522_v0, 0.0  ;;  %v537_v4 = vmul.f32 %v674_v58, %v522_v0 }
  0xf8   : > { %v512_v62 = vld [vmem:[%s911_s13 + $0x18] sm:$0xff] }
  0xf9   : > { %v523_v1 = vadd.f32 %v673_v57, %v512_v62  ;;  %vm524_vm4 = vcmp.ge.f32.partialorder %v520_v59, 0.0  ;;  %v535_v2 = vmul.f32 %v674_v58, %v520_v59  ;;  %v541_v8 = vsel %vm526_vm6, %v522_v0, %v537_v4 }
  0xfa   : > { %v510_v60 = vld [vmem:[%s911_s13 + $0x8] sm:$0xff]  ;;  %545 = vst [vmem:[%s911_s13 + $0x10] sm:$0xff] %v541_v8 }
  0xfb   : > { %v521_v63 = vadd.f32 %v673_v57, %v510_v60  ;;  %v539_v5 = vsel %vm524_vm4, %v520_v59, %v535_v2  ;;  %vm527_vm7 = vcmp.ge.f32.partialorder %v523_v1, 0.0  ;;  %v538_v6 = vmul.f32 %v674_v58, %v523_v1 }
  0xfc   : > { %543 = vst [vmem:[%s911_s13] sm:$0xff] %v539_v5 }
  0xfd   : > { %vm525_vm5 = vcmp.ge.f32.partialorder %v521_v63, 0.0  ;;  %v536_v3 = vmul.f32 %v674_v58, %v521_v63  ;;  %v542_v9 = vsel %vm527_vm7, %v523_v1, %v538_v6 }
  0xfe   : > { %546 = vst [vmem:[%s911_s13 + $0x18] sm:$0xff] %v542_v9 }
  0xff   : > { %v540_v7 = vsel %vm525_vm5, %v521_v63, %v536_v3 }
 0x100   : > { %544 = vst [vmem:[%s911_s13 + $0x8] sm:$0xff] %v540_v7 }
 0x101 PF: > { %s14_s21 = sadd.s32 1, %s825_s21   ;;  %s988_s15 = smov %s813_s18 }
 0x102   : > { %p11_p11 = scmp.ge.s32.totalorder %s14_s21, 194   ;;  %s989_s16 = smov %s817_s19 }
 0x103   : > { %s990_s17 = smov %s821_s20  ;;  %s991_s18 = smov %s995_s22 }
 0x104   : > { %s992_s19 = smov %s999_s23  ;;  %s993_s20 = smov %s1003_s24 }
 0x105   :  { %13 = sbr.rel (!%p11_p11) target bundleno = 4 (0x4), region = 75 }

// kernel: caun_forward.17
= control target key start
LH: loop header
LB: loop body
LE: loop exit
PB: predicated region body
PF: predicated region fallthrough
CT: control target
= control target key end

     0   :  { %s833_s15 = smov 0   ;;  %s835_s16 = smov 0   ;;  %s960_s0 = inlined_call_operand.vmem [shape: bf16[2,34,34,4], index: 0, kind: input, shape index: {}]   ;;  %s961_s1 = inlined_call_operand.vmem [shape: bf16[3,12,128], index: 1, kind: input, shape index: {}]   ;;  %s962_s2 = inlined_call_operand.vmem [shape: f32[1,128], index: 2, kind: input, shape index: {}]   ;;  %s963_s3 = inlined_call_operand.vmem [shape: f32[1,128], index: 3, kind: input, shape index: {}]   ;;  %s964_s4 = inlined_call_operand.vmem [shape: f32[2,32,32,128], index: 4, kind: output, shape index: {}]  }
   0x1   :  { %s837_s17 = smov 0   ;;  %s839_s18 = smov 0  }
   0x2   :  { %s841_s19 = smov 0   ;;  %s843_s20 = smov 0  }
   0x3   :  { %s845_s21 = smov 0  }
   0x4 LB: > { %s26_s3 = sadd.s32 1, %s793_s18  ;;  %s29_s22 = sadd.s32 1, %s797_s19  ;;  %s805_s21 = sphi %s845_s21, %s14_s21   ;;  %s801_s20 = sphi %s843_s20, %s970_s20   ;;  %s797_s19 = sphi %s841_s19, %s969_s19   ;;  %s793_s18 = sphi %s839_s18, %s968_s18   ;;  %s789_s17 = sphi %s837_s17, %s967_s17   ;;  %s785_s16 = sphi %s835_s16, %s966_s16   ;;  %s781_s15 = sphi %s833_s15, %s965_s15  }
   0x5   : > { %p27_p0 = scmp.ge.s32.totalorder %s26_s3, 3  ;;  %p635_p1 = scmp.ge.s32.totalorder %s805_s21, 1 }
   0x6   : > { %p193_p2 = scmp.lt.s32.totalorder %s805_s21, 193  ;;  %s33_s23 = sadd.s32 1, %s801_s20 }
   0x7   : > { %s972_s3 = smov (%p27_p0, %s26_s3), 0  ;;  %s974_s22 = smov (!%p27_p0, %s29_s22), %s797_s19 }
   0x8   : > { %p194_p3 = pnand %p635_p1, %p193_p2  ;;  %p31_p4 = scmp.ge.s32.totalorder %s974_s22, 32 }
   0x9   : > { %s228_s24 = sadd.s32 (!%p194_p3), %s781_s15, %s785_s16  ;;  %p229_p6 = scmp.lt.s32.totalorder (!%p194_p3), %s789_s17, 1 }
   0xa   : > { %s976_s22 = smov (%p31_p4, %s974_s22), 0  ;;  %s978_s23 = smov (!%p31_p4, %s33_s23), %s801_s20 }
   0xb   : > { %p35_p5 = scmp.ge.s32.totalorder %s978_s23, 2  ;;  %197 = sbr.rel (%p194_p3) target bundleno = 254 (0xfe), region = 36 }
   0xc   : > { %p231_p7 = scmp.lt.s32.totalorder (!%p194_p3), %s228_s24, 33  ;;  %p241_p8 = scmp.lt.s32.totalorder (!%p194_p3), %s785_s16, 31 }
   0xd   : > { %s980_s23 = smov (%p35_p5, %s978_s23), 0  ;;  %p640_p9 = scmp.ne.s32.totalorder (!%p194_p3), %s781_s15, 0 }
  0x10   : > { %s982_s17 = smov (!%p229_p6, %s789_s17), 1  ;;  %s984_s24 = smov (!%p231_p7, %s228_s24), 33 }
  0x11   : > { %s689_s25 = smul.u32 170, %s982_s17  ;;  %s638_s27 = sshll.u32 %s982_s17, 7 }
  0x12   : > { %s688_s26 = smul.u32 5, %s984_s24  ;;  %s986_s16 = smov (!%p241_p8, %s785_s16), 31 }
  0x13   : > { %s637_s30 = sshll.u32 %s986_s16, 2  ;;  %252 = sbr.rel (%p640_p9) target bundleno = 27 (0x1b), region = 40 }
  0x14   : > { %s235_s28 = sadd.s32 %s689_s25, %s688_s26  ;;  %s245_s8 = sadd.s32 %s638_s27, %s637_s30 }
  0x15   : > { %s636_s29 = sshll.u32 %s235_s28, 2  ;;  %s639_s9 = sshll.u32 %s245_s8, 3 }
  0x16   : > { %s886_s7 = scalar_lea.vmem %s960_s0, %s636_s29  ;;  %s891_s12 = scalar_lea.vmem %s964_s4, %s639_s9 }
  0x18   : > { %v807_v0 = vmov 0.0  }
  0x19   : > { %253 = vst [vmem:[%s891_s12] sm:$0xff] %v807_v0  ;;  %254 = vst [vmem:[%s891_s12 + $0x8] sm:$0xff] %v807_v0 }
  0x1a   : > { %255 = vst [vmem:[%s891_s12 + $0x10] sm:$0xff] %v807_v0  ;;  %256 = vst [vmem:[%s891_s12 + $0x18] sm:$0xff] %v807_v0 }
  0x1b PF: > { %s657_s13 = sshll.u32 %s781_s15, 3  ;;  %vm288_vm0 = vcmask 1041408   ;;  %v747_v1 = vld [vmem:[%s886_s7] sm:$0xff]   ;;  %vm281_vm1 = vcmask 31744   ;;  %v748_v3 = vld [vmem:[%s886_s7 + $0x8] sm:$0xff]   ;;  %vm433_vm2 = vcmask 1046528  }
  0x1c   : > { %s264_s17 = scalar_lea.vmem %s961_s1, %s657_s13  ;;  %669 = vmatprep.mubr.msk.bf16.mxu0 %vm281_vm1, %v747_v1  ;;  %v349_v8 = vshrl.u32 %v747_v1, 16  ;;  %v351_v9 = vshll.u32 %v747_v1, 16  ;;  %v355_v10 = vshll.u32 %v748_v3, 16  ;;  %v359_v11 = vshrl.u32 %v748_v3, 16  ;;  %p653_p10 = scmp.ne.s32.totalorder %s781_s15, 2 }
  0x1d   : > { %v265_v2 = vld [vmem:[%s264_s17] sm:$0xf]  ;;  %v266_v4 = vld [vmem:[%s264_s17 + $0x4] sm:$0x3]  ;;  %v434_v14 = vrot.slane %v747_v1, 1  ;;  %v435_v15 = vrot.slane %v748_v3, 1 }
  0x1e   : > { %685 = vmatprep.subr.msk.bf16.mxu0 %vm288_vm0, %v265_v2  ;;  %v290_v5 = vsel %vm288_vm0, %v265_v2, 0  ;;  %v648_v6 = vcombine.low %v265_v2, %v265_v2  ;;  %v446_v7 = vsel %vm288_vm0, %v266_v4, 0  ;;  %v750_v13 = vld [vmem:[%s886_s7 + $0x10] ss:$0 sps:$4 sm:$0x11]   ;;  %v353_v16 = vrot.slane %v351_v9, 1 }
  0x1f   : > { %668 = vmatpush3.bf16.msra.mxu0 %v290_v5  ;;  %v357_v17 = vrot.slane %v355_v10, 1  ;;  %vm348_vm3 = vsmask.f32 7424  ;;  %v363_v19 = vshll.u32 %v750_v13, 16  ;;  %v436_v20 = vsel %vm433_vm2, %v434_v14, %v435_v15 }
  0x20   : > { %v370_v12 = vrot.slane %v648_v6, 2  ;;  %687 = vmatprep.subr.msk.bf16.mxu0 %vm288_vm0, %v266_v4  ;;  %v354_v21 = vor.u32 %v353_v16, %v349_v8  ;;  %v437_v23 = vrot.slane %v750_v13, 1  ;;  %v267_v31 = vld [vmem:[%s891_s12] sm:$0xff]  ;;  %v268_v40 = vld [vmem:[%s891_s12 + $0x8] sm:$0xff] }
  0x21   : > { %v361_v22 = vor.u32 %v359_v11, %v357_v17  ;;  %v365_v24 = vrot.slane %v363_v19, 1  ;;  %v269_v29 = vld [vmem:[%s891_s12 + $0x10] sm:$0xff]  ;;  %v270_v35 = vld [vmem:[%s891_s12 + $0x18] sm:$0xff] }
  0x22   : > { %670 = vmatmul.mubr.msk.bf16.vlgmr.msra.gmra.mxu0 %vm281_vm1, %v748_v3  ;;  %686 = vmatprep.subr.msk.bf16.mxu1 %vm288_vm0, %v370_v12  ;;  %v378_v18 = vsel %vm288_vm0, %v370_v12, 0  ;;  %v358_v25 = vsel %vm348_vm3, %v354_v21, %v357_v17  ;;  %v438_v27 = vsel %vm433_vm2, %v435_v15, %v437_v23 }
  0x23   : > { %674 = vmatpush3.bf16.msra.mxu1 %v378_v18  ;;  %680 = vmatpush3.bf16.msra.mxu0 %v446_v7  ;;  %v366_v26 = vsel %vm348_vm3, %v361_v22, %v365_v24 }
  0x24   : > { %681 = vmatprep.mubr.msk.bf16.mxu0 %vm281_vm1, %v436_v20  ;;  %675 = vmatprep.mubr.msk.bf16.mxu1 %vm281_vm1, %v358_v25 }
  0x26   : > { %676 = vmatmul.mubr.msk.bf16.vlgmr.msra.gmra.mxu1 %vm281_vm1, %v366_v26 }
  0x2a   : > { %682 = vmatmul.mubr.msk.bf16.vlgmr.msra.gmra.mxu0 %vm281_vm1, %v438_v27 }
  0xe2   : > { %v671_v28 = vpop.f32.mrf.mxu0 }
  0xe3   : > { %v343_v33 = vadd.f32 %v671_v28, %v269_v29 }
  0xe4   : > { %v326_v30 = vpop.f32.mrf.mxu0 }
  0xe5   : > { %v341_v37 = vadd.f32 %v326_v30, %v267_v31 }
  0xe6   : > { %v672_v32 = vpop.f32.mrf.mxu0  ;;  %v677_v34 = vpop.f32.mrf.mxu1 }
  0xe7   : > { %v431_v38 = vadd.f32 %v677_v34, %v343_v33  ;;  %v344_v42 = vadd.f32 %v672_v32, %v270_v35 }
  0xe8   : > { %v329_v36 = vpop.f32.mrf.mxu0  ;;  %v414_v39 = vpop.f32.mrf.mxu1 }
  0xe9   : > { %v429_v43 = vadd.f32 %v414_v39, %v341_v37  ;;  %v342_v47 = vadd.f32 %v329_v36, %v268_v40 }
  0xea   : > { %v683_v41 = vpop.f32.mrf.mxu0  ;;  %v678_v44 = vpop.f32.mrf.mxu1 }
  0xeb   : > { %v499_v45 = vadd.f32 %v683_v41, %v431_v38  ;;  %v432_v48 = vadd.f32 %v678_v44, %v344_v42 }
  0xec   : > { %v482_v46 = vpop.f32.mrf.mxu0  ;;  %v417_v49 = vpop.f32.mrf.mxu1 }
  0xed   : > { %503 = vst [vmem:[%s891_s12 + $0x10] sm:$0xff] %v499_v45  ;;  %v497_v50 = vadd.f32 %v482_v46, %v429_v43  ;;  %v430_v52 = vadd.f32 %v417_v49, %v342_v47 }
  0xee   : > { %v684_v51 = vpop.f32.mrf.mxu0 }
  0xef   : > { %501 = vst [vmem:[%s891_s12] sm:$0xff] %v497_v50  ;;  %v500_v53 = vadd.f32 %v684_v51, %v432_v48  ;;  %508 = sbr.rel (%p653_p10) target bundleno = 254 (0xfe), region = 44 }
  0xf0   : > { %v485_v54 = vpop.f32.mrf.mxu0 }
  0xf1   : > { %504 = vst [vmem:[%s891_s12 + $0x18] sm:$0xff] %v500_v53  ;;  %v498_v55 = vadd.f32 %v485_v54, %v430_v52 }
  0xf3   : > { %502 = vst [vmem:[%s891_s12 + $0x8] sm:$0xff] %v498_v55 }
  0xf4   : > { %v654_v57 = vld [vmem:[%s962_s2] ss:$0 sm:$0xff]  ;;  %v511_v61 = vld [vmem:[%s891_s12 + $0x10] sm:$0xff] }
  0xf5   : > { %v522_v63 = vadd.f32 %v654_v57, %v511_v61 }
  0xf6   : > { %v509_v56 = vld [vmem:[%s891_s12] sm:$0xff] }
  0xf7   : > { %v520_v59 = vadd.f32 %v654_v57, %v509_v56  ;;  %526 = vst [vmem:[%s891_s12 + $0x10] sm:$0xff] %v522_v63 }
  0xf8   : > { %v512_v62 = vld [vmem:[%s891_s12 + $0x18] sm:$0xff] }
  0xf9   : > { %v523_v0 = vadd.f32 %v654_v57, %v512_v62  ;;  %524 = vst [vmem:[%s891_s12] sm:$0xff] %v520_v59 }
  0xfa   : > { %v510_v58 = vld [vmem:[%s891_s12 + $0x8] sm:$0xff] }
  0xfb   : > { %v521_v60 = vadd.f32 %v654_v57, %v510_v58  ;;  %527 = vst [vmem:[%s891_s12 + $0x18] sm:$0xff] %v523_v0 }
  0xfd   : > { %525 = vst [vmem:[%s891_s12 + $0x8] sm:$0xff] %v521_v60 }
  0xfe PF: > { %s14_s21 = sadd.s32 1, %s805_s21   ;;  %s965_s15 = smov %s793_s18 }
  0xff   : > { %p11_p11 = scmp.ge.s32.totalorder %s14_s21, 194   ;;  %s966_s16 = smov %s797_s19 }
 0x100   : > { %s967_s17 = smov %s801_s20  ;;  %s968_s18 = smov %s972_s3 }
 0x101   : > { %s969_s19 = smov %s976_s22  ;;  %s970_s20 = smov %s980_s23 }
 0x102   :  { %13 = sbr.rel (!%p11_p11) target bundleno = 4 (0x4), region = 75 }

// kernel: caun_forward.21
= control target key start
LH: loop header
LB: loop body
LE: loop exit
PB: predicated region body
PF: predicated region fallthrough
CT: control target
= control target key end

     0   :  { %s924_s9 = smov 0   ;;  %s926_s10 = smov 0   ;;  %s1237_s0 = inlined_call_operand.vmem [shape: f32[2,9,16,64], index: 0, kind: input, shape index: {}]   ;;  %s1238_s1 = inlined_call_operand.vmem [shape: f32[2,2,9,64], index: 1, kind: input, shape index: {}]   ;;  %s1239_s2 = inlined_call_operand.vmem [shape: f32[2,2,16,64], index: 2, kind: output, shape index: {}]  }
   0x1   :  { %s928_s11 = smov 0  }
   0x2 LB: > { %s24_s12 = sadd.s32 1, %s902_s10  ;;  %p804_p0 = scmp.ge.s32.totalorder %s906_s11, 1  ;;  %s906_s11 = sphi %s928_s11, %s12_s11   ;;  %s902_s10 = sphi %s926_s10, %s1241_s10   ;;  %s898_s9 = sphi %s924_s9, %s1240_s9  }
   0x3   : > { %p26_p1 = scmp.ge.s32.totalorder %s24_s12, 2  ;;  %p146_p2 = scmp.lt.s32.totalorder %s906_s11, 3 }
   0x5   : > { %s1243_s12 = smov (%p26_p1, %s24_s12), 0  ;;  %p147_p3 = pnand %p804_p0, %p146_p2 }
   0x6   : > { %p182_p4 = scmp.lt.s32.totalorder (!%p147_p3), %s898_s9, 1 }
   0x7   : > { %150 = sbr.rel (%p147_p3) target bundleno = 118 (0x76), region = 28 }
   0xc   : > { %s1245_s9 = smov (!%p182_p4, %s898_s9), 1  ;;  %vm224_vm0 = vcmask 523264  }
   0xd   : > { %s816_s13 = smul.u32 144, %s1245_s9  ;;  %s814_s17 = sshll.u32 %s1245_s9, 5 }
   0xe   : > { %s1092_s20 = scalar_lea.vmem %s1238_s1, %s814_s17  ;;  %s205_s23 = scalar_lea.vmem %s1239_s2, %s814_s17 }
   0xf   : > { %s948_s16 = scalar_lea.vmem %s1237_s0, %s816_s13 }
  0x10   : > { %v206_v0 = vld [vmem:[%s948_s16] sm:$0xff]  ;;  %v207_v1 = vld [vmem:[%s948_s16 + $0x8] sm:$0xff]  ;;  %v208_v2 = vld [vmem:[%s948_s16 + $0x10] sm:$0xff] }
  0x11   : > { %v209_v3 = vld [vmem:[%s948_s16 + $0x18] sm:$0xff]  ;;  %v210_v4 = vld [vmem:[%s948_s16 + $0x20] sm:$0xff]  ;;  %v956_v5 = vld [vmem:[%s948_s16 + $0x28] sm:$0xff]  ;;  %v225_v6 = vsel %vm224_vm0, %v206_v0, -inf  ;;  %v226_v7 = vsel %vm224_vm0, %v208_v2, -inf  ;;  %v242_v8 = vsel %vm224_vm0, %v207_v1, -inf }
  0x12   : > { %v962_v9 = vld [vmem:[%s948_s16 + $0x30] sm:$0xff]  ;;  %v965_v10 = vld [vmem:[%s948_s16 + $0x38] sm:$0xff]  ;;  %v968_v11 = vld [vmem:[%s948_s16 + $0x40] sm:$0xff]  ;;  %v227_v12 = vsel %vm224_vm0, %v210_v4, -inf  ;;  %v243_v13 = vsel %vm224_vm0, %v209_v3, -inf  ;;  %v244_v14 = vsel %vm224_vm0, %v956_v5, -inf }
  0x13   : > { %v975_v15 = vld [vmem:[%s948_s16 + $0x48] sm:$0xff]  ;;  %v978_v16 = vld [vmem:[%s948_s16 + $0x50] sm:$0xff]  ;;  %v981_v17 = vld [vmem:[%s948_s16 + $0x58] sm:$0xff]  ;;  %v228_v18 = vmax.f32 %v225_v6, %v227_v12  ;;  %v229_v19 = vsel %vm224_vm0, %v962_v9, -inf  ;;  %v231_v20 = vsel %vm224_vm0, %v968_v11, -inf  ;;  %v245_v21 = vmax.f32 %v242_v8, %v244_v14 }
  0x14   : > { %v988_v22 = vld [vmem:[%s948_s16 + $0x60] sm:$0xff]  ;;  %v991_v23 = vld [vmem:[%s948_s16 + $0x68] sm:$0xff]  ;;  %v994_v24 = vld [vmem:[%s948_s16 + $0x70] sm:$0xff]  ;;  %v230_v25 = vmax.f32 %v226_v7, %v229_v19  ;;  %v233_v26 = vsel %vm224_vm0, %v978_v16, -inf  ;;  %v246_v27 = vsel %vm224_vm0, %v965_v10, -inf  ;;  %v248_v28 = vsel %vm224_vm0, %v975_v15, -inf }
  0x15   : > { %v1003_v29 = vld [vmem:[%s948_s16 + $0x78] sm:$0xff]  ;;  %v1006_v30 = vld [vmem:[%s948_s16 + $0x80] sm:$0xff]  ;;  %v1009_v31 = vld [vmem:[%s948_s16 + $0x88] sm:$0xff]  ;;  %v232_v32 = vmax.f32 %v228_v18, %v231_v20  ;;  %v235_v33 = vsel %vm224_vm0, %v988_v22, -inf  ;;  %v237_v34 = vsel %vm224_vm0, %v994_v24, -inf  ;;  %v247_v35 = vmax.f32 %v243_v13, %v246_v27 }
  0x16   : > { %v234_v36 = vmax.f32 %v230_v25, %v233_v26  ;;  %v239_v37 = vsel %vm224_vm0, %v1006_v30, -inf  ;;  %v249_v38 = vmax.f32 %v245_v21, %v248_v28  ;;  %v250_v39 = vsel %vm224_vm0, %v981_v17, -inf }
  0x17   : > { %v236_v40 = vmax.f32 %v232_v32, %v235_v33  ;;  %v251_v41 = vmax.f32 %v247_v35, %v250_v39  ;;  %v252_v42 = vsel %vm224_vm0, %v991_v23, -inf  ;;  %v254_v43 = vsel %vm224_vm0, %v1003_v29, -inf }
  0x18   : > { %v238_v44 = vmax.f32 %v234_v36, %v237_v34  ;;  %v253_v45 = vmax.f32 %v249_v38, %v252_v42  ;;  %v256_v46 = vsel %vm224_vm0, %v1009_v31, -inf }
  0x19   : > { %v240_v47 = vmax.f32 %v236_v40, %v239_v37  ;;  %v255_v48 = vmax.f32 %v251_v41, %v254_v43  ;;  %v908_v43 = vmov 1966171168  }
  0x1a   : > { %v257_v49 = vmax.f32 %v253_v45, %v256_v46  ;;  %v379_v45 = vlaneseq }
  0x1b   : > { %v241_v50 = vmax.f32 %v240_v47, %v238_v44  ;;  %v377_v44 = vunpack.c.l.s4 %v908_v43 }
  0x1c   : > { %v258_v51 = vmax.f32 %v257_v49, %v255_v48 }
  0x1d   : > { %v259_v52 = vsub.f32 %v206_v0, %v241_v50  ;;  %v261_v54 = vsub.f32 %v208_v2, %v241_v50  ;;  %v263_v56 = vsub.f32 %v210_v4, %v241_v50  ;;  %v265_v58 = vsub.f32 %v962_v9, %v241_v50 }
  0x1e   : > { %v260_v53 = vsub.f32 %v207_v1, %v258_v51  ;;  %v262_v55 = vsub.f32 %v209_v3, %v258_v51  ;;  %v264_v57 = vsub.f32 %v956_v5, %v258_v51  ;;  %v266_v61 = vsub.f32 %v965_v10, %v258_v51 }
  0x1f   : > { %v277_v59 = vmul.f32 1.442695, %v259_v52  ;;  %v281_v62 = vmul.f32 1.442695, %v261_v54  ;;  %v267_v6 = vsub.f32 %v968_v11, %v241_v50  ;;  %v285_v7 = vmul.f32 1.442695, %v263_v56 }
  0x20   : > { %v279_v60 = vmul.f32 1.442695, %v260_v53  ;;  %v283_v63 = vmul.f32 1.442695, %v262_v55  ;;  %v268_v0 = vsub.f32 %v975_v15, %v258_v51  ;;  %v287_v1 = vmul.f32 1.442695, %v264_v57 }
  0x21   : > { %844 = vpow2.f32 %v277_v59  ;;  %v269_v2 = vsub.f32 %v978_v16, %v241_v50  ;;  %v289_v3 = vmul.f32 1.442695, %v265_v58  ;;  %v270_v4 = vsub.f32 %v981_v17, %v258_v51 }
  0x22   : > { %846 = vpow2.f32 %v279_v60  ;;  %v291_v5 = vmul.f32 1.442695, %v266_v61  ;;  %v271_v8 = vsub.f32 %v988_v22, %v241_v50  ;;  %v293_v9 = vmul.f32 1.442695, %v267_v6 }
  0x23   : > { %848 = vpow2.f32 %v281_v62  ;;  %v272_v10 = vsub.f32 %v991_v23, %v258_v51  ;;  %v295_v11 = vmul.f32 1.442695, %v268_v0  ;;  %v273_v12 = vsub.f32 %v994_v24, %v241_v50 }
  0x24   : > { %850 = vpow2.f32 %v283_v63  ;;  %v297_v13 = vmul.f32 1.442695, %v269_v2  ;;  %v274_v14 = vsub.f32 %v1003_v29, %v258_v51  ;;  %v299_v15 = vmul.f32 1.442695, %v270_v4 }
  0x25   : > { %852 = vpow2.f32 %v285_v7  ;;  %v275_v16 = vsub.f32 %v1006_v30, %v241_v50  ;;  %v301_v17 = vmul.f32 1.442695, %v271_v8  ;;  %v276_v18 = vsub.f32 %v1009_v31, %v258_v51  ;;  %v367_v8 = vld [vmem:[%s1092_s20] sm:$0xff] }
  0x26   : > { %854 = vpow2.f32 %v287_v1  ;;  %v303_v19 = vmul.f32 1.442695, %v272_v10  ;;  %v305_v20 = vmul.f32 1.442695, %v273_v12  ;;  %v307_v21 = vmul.f32 1.442695, %v274_v14 }
  0x27   : > { %856 = vpow2.f32 %v289_v3  ;;  %v309_v22 = vmul.f32 1.442695, %v275_v16  ;;  %v311_v24 = vmul.f32 1.442695, %v276_v18  ;;  %v378_v58 = vunpack.c.0.s8 %v377_v44 }
  0x28   : > { %858 = vpow2.f32 %v291_v5  ;;  %v380_v59 = vshrl.u32 %v379_v45, 7 }
  0x29   : > { %860 = vpow2.f32 %v293_v9 }
  0x2a   : > { %862 = vpow2.f32 %v295_v11  ;;  %v1109_v9 = vsub.s32 %v378_v58, %v380_v59  ;;  %v503_v45 = vsub.s32 0, %v380_v59 }
  0x2b   : > { %864 = vpow2.f32 %v297_v13  ;;  %v375_v13 = vcombine.high %v367_v8, %v367_v8 }
  0x2c   : > { %866 = vpow2.f32 %v299_v15 }
  0x2d   : > { %868 = vpow2.f32 %v301_v17  ;;  %v369_v17 = vld [vmem:[%s1092_s20 + $0x10] sm:$0xff] }
  0x2e   : > { %v1038_v23 = vpop.eup %844  ;;  %870 = vpow2.f32 %v303_v19 }
  0x2f   : > { %v1040_v25 = vpop.eup %846  ;;  %872 = vpow2.f32 %v305_v20  ;;  %v313_v26 = vsel %vm224_vm0, %v1038_v23, 0.0  ;;  %v438_v20 = vcombine.high %v369_v17, %v369_v17 }
  0x30   : > { %v1044_v27 = vpop.eup %848  ;;  %874 = vpow2.f32 %v307_v21  ;;  %v330_v28 = vsel %vm224_vm0, %v1040_v25, 0.0 }
  0x31   : > { %v1048_v29 = vpop.eup %850  ;;  %876 = vpow2.f32 %v309_v22  ;;  %v314_v30 = vsel %vm224_vm0, %v1044_v27, 0.0  ;;  %v382_v22 = vrot.slane %v367_v8, %v1109_v9 }
  0x32   : > { %v1052_v31 = vpop.eup %852  ;;  %878 = vpow2.f32 %v311_v24  ;;  %v315_v32 = vadd.f32 %v314_v30, %v313_v26  ;;  %v331_v33 = vsel %vm224_vm0, %v1048_v29, 0.0  ;;  %v389_v24 = vrot.slane %v375_v13, %v1109_v9 }
  0x33   : > { %v1056_v34 = vpop.eup %854  ;;  %v316_v35 = vsel %vm224_vm0, %v1052_v31, 0.0  ;;  %v332_v36 = vadd.f32 %v331_v33, %v330_v28  ;;  %v445_v26 = vrot.slane %v369_v17, %v1109_v9  ;;  %v452_v28 = vrot.slane %v438_v20, %v1109_v9 }
  0x34   : > { %v1060_v37 = vpop.eup %856  ;;  %v317_v38 = vadd.f32 %v316_v35, %v315_v32  ;;  %v333_v39 = vsel %vm224_vm0, %v1056_v34, 0.0  ;;  %v390_v30 = vcombine.high %v382_v22, %v382_v22  ;;  %v391_v32 = vcombine.high %v389_v24, %v389_v24 }
  0x35   : > { %v1064_v40 = vpop.eup %858  ;;  %v318_v41 = vsel %vm224_vm0, %v1060_v37, 0.0  ;;  %v334_v42 = vadd.f32 %v333_v39, %v332_v36  ;;  %v398_v33 = vrot.slane %v382_v22, %v1109_v9  ;;  %v453_v35 = vcombine.high %v445_v26, %v445_v26  ;;  %v810_v36 = vld.sshfl [vmem:[%s1092_s20 + $0x8] sm:$0x1 pattern:$0x75316420] }
  0x36   : > { %v1068_v46 = vpop.eup %860  ;;  %v319_v47 = vadd.f32 %v318_v41, %v317_v38  ;;  %v335_v48 = vsel %vm224_vm0, %v1064_v40, 0.0  ;;  %v454_v38 = vcombine.high %v452_v28, %v452_v28  ;;  %v412_v39 = vrot.slane %v390_v30, %v1109_v9 }
  0x37   : > { %v1072_v49 = vpop.eup %862  ;;  %v320_v50 = vsel %vm224_vm0, %v1068_v46, 0.0  ;;  %v336_v51 = vadd.f32 %v335_v48, %v334_v42  ;;  %v461_v41 = vrot.slane %v445_v26, %v1109_v9  ;;  %v811_v42 = vld.sshfl [vmem:[%s1092_s20 + $0x18] sm:$0x1 pattern:$0x75316420]  ;;  %v405_v43 = vrot.slane %v389_v24, %v1109_v9 }
  0x38   : > { %v1077_v52 = vpop.eup %864  ;;  %v321_v53 = vadd.f32 %v320_v50, %v319_v47  ;;  %v337_v54 = vsel %vm224_vm0, %v1072_v49, 0.0  ;;  %v419_v44 = vrot.slane %v391_v32, %v1109_v9  ;;  %v420_v47 = vcombine.high %v398_v33, %v398_v33 }
  0x39   : > { %v1081_v55 = vpop.eup %866  ;;  %v322_v56 = vsel %vm224_vm0, %v1077_v52, 0.0  ;;  %v338_v57 = vadd.f32 %v337_v54, %v336_v51  ;;  %v422_v48 = vcombine.high %v412_v39, %v412_v39  ;;  %v437_v50 = vrot.slane %v810_v36, %v1109_v9 }
  0x3a   : > { %v1085_v60 = vpop.eup %868  ;;  %v323_v61 = vadd.f32 %v322_v56, %v321_v53  ;;  %v339_v62 = vsel %vm224_vm0, %v1081_v55, 0.0  ;;  %v475_v51 = vrot.slane %v453_v35, %v1109_v9  ;;  %v421_v53 = vcombine.high %v405_v43, %v405_v43 }
  0x3b   : > { %v1096_v63 = vpop.eup %870  ;;  %v324_v6 = vsel %vm224_vm0, %v1085_v60, 0.0  ;;  %v340_v7 = vadd.f32 %v339_v62, %v338_v57  ;;  %v423_v54 = vcombine.high %v419_v44, %v419_v44  ;;  %v468_v56 = vrot.slane %v452_v28, %v1109_v9 }
  0x3c   : > { %v1100_v0 = vpop.eup %872  ;;  %v325_v1 = vadd.f32 %v324_v6, %v323_v61  ;;  %v341_v2 = vsel %vm224_vm0, %v1096_v63, 0.0  ;;  %v482_v57 = vrot.slane %v454_v38, %v1109_v9  ;;  %v483_v58 = vcombine.high %v461_v41, %v461_v41 }
  0x3d   : > { %v1104_v3 = vpop.eup %874  ;;  %v326_v4 = vsel %vm224_vm0, %v1100_v0, 0.0  ;;  %v342_v5 = vadd.f32 %v341_v2, %v340_v7  ;;  %v485_v61 = vcombine.high %v475_v51, %v475_v51  ;;  %v500_v62 = vrot.slane %v811_v42, %v1109_v9 }
  0x3e   : > { %v1111_v10 = vpop.eup %876  ;;  %v327_v11 = vadd.f32 %v326_v4, %v325_v1  ;;  %v343_v12 = vsel %vm224_vm0, %v1104_v3, 0.0  ;;  %v484_v6 = vcombine.high %v468_v56, %v468_v56  ;;  %v486_v7 = vcombine.high %v482_v57, %v482_v57 }
  0x3f   : > { %v1115_v14 = vpop.eup %878  ;;  %v328_v15 = vsel %vm224_vm0, %v1111_v10, 0.0  ;;  %v344_v16 = vadd.f32 %v343_v12, %v342_v5  ;;  %v504_v1 = vrot.slane %v398_v33, %v503_v45  ;;  %v508_v59 = vrot.slane %v412_v39, %v503_v45 }
  0x40   : > { %v329_v18 = vadd.f32 %v328_v15, %v327_v11  ;;  %v345_v19 = vsel %vm224_vm0, %v1115_v14, 0.0  ;;  %v512_v4 = vrot.slane %v420_v47, %v503_v45  ;;  %v516_v5 = vrot.slane %v422_v48, %v503_v45 }
  0x41   : > { %v346_v21 = vadd.f32 %v345_v19, %v344_v16  ;;  %v520_v8 = vrot.slane %v405_v43, %v503_v45  ;;  %v524_v11 = vrot.slane %v419_v44, %v503_v45  ;;  %v528_v13 = vrot.slane %v421_v53, %v503_v45 }
  0x42   : > { %880 = vrcp.f32 %v329_v18  ;;  %v532_v15 = vrot.slane %v423_v54, %v503_v45  ;;  %v536_v16 = vrot.slane %v437_v50, %v503_v45  ;;  %v540_v17 = vrot.slane %v461_v41, %v503_v45 }
  0x43   : > { %882 = vrcp.f32 %v346_v21  ;;  %v544_v18 = vrot.slane %v475_v51, %v503_v45  ;;  %v548_v19 = vrot.slane %v483_v58, %v503_v45  ;;  %v552_v20 = vrot.slane %v485_v61, %v503_v45 }
  0x44   : > { %v556_v21 = vrot.slane %v468_v56, %v503_v45  ;;  %v560_v22 = vrot.slane %v482_v57, %v503_v45  ;;  %v1138_v9 = vrot.slane %v484_v6, %v503_v45  ;;  %v1140_v24 = vrot.slane %v486_v7, %v503_v45 }
  0x45   : > { %v1142_v26 = vrot.slane %v500_v62, %v503_v45 }
  0x4f   : > { %v881_v2 = vpop.eup %880 }
  0x50   : > { %v883_v12 = vpop.eup %882  ;;  %v349_v28 = vmul.f32 %v881_v2, %v1038_v23  ;;  %v351_v32 = vmul.f32 %v881_v2, %v1044_v27  ;;  %v353_v33 = vmul.f32 %v881_v2, %v1052_v31  ;;  %v355_v38 = vmul.f32 %v881_v2, %v1060_v37 }
  0x51   : > { %v350_v30 = vmul.f32 %v883_v12, %v1040_v25  ;;  %v352_v35 = vmul.f32 %v883_v12, %v1048_v29  ;;  %v354_v36 = vmul.f32 %v883_v12, %v1056_v34  ;;  %v356_v39 = vmul.f32 %v883_v12, %v1064_v40 }
  0x52   : > { %v357_v41 = vmul.f32 %v881_v2, %v1068_v46  ;;  %v358_v42 = vmul.f32 %v883_v12, %v1072_v49  ;;  %v359_v23 = vmul.f32 %v881_v2, %v1077_v52  ;;  %v360_v25 = vmul.f32 %v883_v12, %v1081_v55 }
  0x53   : > { %v361_v27 = vmul.f32 %v881_v2, %v1085_v60  ;;  %v362_v31 = vmul.f32 %v883_v12, %v1096_v63  ;;  %v363_v29 = vmul.f32 %v881_v2, %v1100_v0  ;;  %v1160_v34 = vmul.f32 %v883_v12, %v1104_v3 }
  0x54   : > { %v1163_v37 = vmul.f32 %v881_v2, %v1111_v10  ;;  %v1166_v40 = vmul.f32 %v883_v12, %v1115_v14  ;;  %v591_v46 = vmul.f32 %v504_v1, %v349_v28  ;;  %v592_v49 = vmul.f32 %v504_v1, %v350_v30 }
  0x55   : > { %v593_v52 = vmul.f32 %v508_v59, %v351_v32  ;;  %v594_v43 = vmul.f32 %v508_v59, %v352_v35  ;;  %v595_v55 = vmul.f32 %v512_v4, %v353_v33  ;;  %v596_v44 = vmul.f32 %v512_v4, %v354_v36 }
  0x56   : > { %v597_v60 = vmul.f32 %v516_v5, %v355_v38  ;;  %v598_v45 = vmul.f32 %v516_v5, %v356_v39  ;;  %v599_v63 = vmul.f32 %v520_v8, %v357_v41  ;;  %v600_v47 = vmul.f32 %v520_v8, %v358_v42 }
  0x57   : > { %v601_v0 = vmul.f32 %v524_v11, %v359_v23  ;;  %v602_v48 = vmul.f32 %v524_v11, %v360_v25  ;;  %v603_v3 = vmul.f32 %v528_v13, %v361_v27  ;;  %v604_v50 = vmul.f32 %v528_v13, %v362_v31 }
  0x58   : > { %v605_v51 = vmul.f32 %v532_v15, %v363_v29  ;;  %v606_v10 = vmul.f32 %v532_v15, %v1160_v34  ;;  %v607_v14 = vmul.f32 %v536_v16, %v1163_v37  ;;  %v1171_v53 = vmul.f32 %v536_v16, %v1166_v40 }
  0x59   : > { %v609_v54 = vmul.f32 %v540_v17, %v349_v28  ;;  %v610_v56 = vmul.f32 %v540_v17, %v350_v30  ;;  %v611_v57 = vmul.f32 %v544_v18, %v351_v32  ;;  %v612_v58 = vmul.f32 %v544_v18, %v352_v35 }
  0x5a   : > { %v613_v61 = vmul.f32 %v548_v19, %v353_v33  ;;  %v614_v62 = vmul.f32 %v548_v19, %v354_v36  ;;  %v627_v6 = vsel %vm224_vm0, %v591_v46, 0.0  ;;  %v628_v7 = vsel %vm224_vm0, %v593_v52, 0.0 }
  0x5b   : > { %v615_v1 = vmul.f32 %v552_v20, %v355_v38  ;;  %v616_v59 = vmul.f32 %v552_v20, %v356_v39  ;;  %v629_v2 = vadd.f32 %v628_v7, %v627_v6  ;;  %v630_v4 = vsel %vm224_vm0, %v595_v55, 0.0 }
  0x5c   : > { %v617_v5 = vmul.f32 %v556_v21, %v357_v41  ;;  %v618_v8 = vmul.f32 %v556_v21, %v358_v42  ;;  %v619_v11 = vmul.f32 %v560_v22, %v359_v23  ;;  %v632_v12 = vsel %vm224_vm0, %v597_v60, 0.0 }
  0x5d   : > { %v631_v13 = vadd.f32 %v630_v4, %v629_v2  ;;  %v644_v15 = vsel %vm224_vm0, %v592_v49, 0.0  ;;  %v645_v16 = vsel %vm224_vm0, %v594_v43, 0.0  ;;  %v647_v17 = vsel %vm224_vm0, %v596_v44, 0.0 }
  0x5e   : > { %v620_v18 = vmul.f32 %v560_v22, %v360_v25  ;;  %v621_v19 = vmul.f32 %v1138_v9, %v361_v27  ;;  %v634_v20 = vsel %vm224_vm0, %v599_v63, 0.0  ;;  %v646_v28 = vadd.f32 %v645_v16, %v644_v15 }
  0x5f   : > { %v622_v30 = vmul.f32 %v1138_v9, %v362_v31  ;;  %v633_v32 = vadd.f32 %v632_v12, %v631_v13  ;;  %v636_v21 = vsel %vm224_vm0, %v601_v0, 0.0  ;;  %v649_v33 = vsel %vm224_vm0, %v598_v45, 0.0 }
  0x60   : > { %v648_v35 = vadd.f32 %v647_v17, %v646_v28  ;;  %v661_v36 = vsel %vm224_vm0, %v609_v54, 0.0  ;;  %v662_v38 = vsel %vm224_vm0, %v611_v57, 0.0  ;;  %v664_v39 = vsel %vm224_vm0, %v613_v61, 0.0 }
  0x61   : > { %v623_v22 = vmul.f32 %v1140_v24, %v363_v29  ;;  %v635_v41 = vadd.f32 %v634_v20, %v633_v32  ;;  %v651_v42 = vsel %vm224_vm0, %v600_v47, 0.0  ;;  %v663_v23 = vadd.f32 %v662_v38, %v661_v36 }
  0x62   : > { %v638_v9 = vsel %vm224_vm0, %v603_v3, 0.0  ;;  %v640_v25 = vsel %vm224_vm0, %v605_v51, 0.0  ;;  %v650_v27 = vadd.f32 %v649_v33, %v648_v35  ;;  %v666_v31 = vsel %vm224_vm0, %v615_v1, 0.0 }
  0x63   : > { %v637_v46 = vadd.f32 %v636_v21, %v635_v41  ;;  %v653_v49 = vsel %vm224_vm0, %v602_v48, 0.0  ;;  %v665_v52 = vadd.f32 %v664_v39, %v663_v23  ;;  %v678_v43 = vsel %vm224_vm0, %v610_v56, 0.0 }
  0x64   : > { %v652_v55 = vadd.f32 %v651_v42, %v650_v27  ;;  %v668_v29 = vsel %vm224_vm0, %v617_v5, 0.0  ;;  %v679_v44 = vsel %vm224_vm0, %v612_v58, 0.0  ;;  %v681_v60 = vsel %vm224_vm0, %v614_v62, 0.0 }
  0x65   : > { %v639_v45 = vadd.f32 %v638_v9, %v637_v46  ;;  %v655_v63 = vsel %vm224_vm0, %v604_v50, 0.0  ;;  %v667_v47 = vadd.f32 %v666_v31, %v665_v52  ;;  %v680_v0 = vadd.f32 %v679_v44, %v678_v43 }
  0x66   : > { %v642_v3 = vsel %vm224_vm0, %v607_v14, 0.0  ;;  %v654_v51 = vadd.f32 %v653_v49, %v652_v55  ;;  %v670_v48 = vsel %vm224_vm0, %v619_v11, 0.0  ;;  %v683_v54 = vsel %vm224_vm0, %v616_v59, 0.0 }
  0x67   : > { %v641_v56 = vadd.f32 %v640_v25, %v639_v45  ;;  %v657_v57 = vsel %vm224_vm0, %v606_v10, 0.0  ;;  %v669_v61 = vadd.f32 %v668_v29, %v667_v47  ;;  %v682_v6 = vadd.f32 %v681_v60, %v680_v0 }
  0x68   : > { %v625_v50 = vmul.f32 %v1142_v26, %v1163_v37  ;;  %v656_v58 = vadd.f32 %v655_v63, %v654_v51  ;;  %v672_v14 = vsel %vm224_vm0, %v621_v19, 0.0  ;;  %v685_v62 = vsel %vm224_vm0, %v618_v8, 0.0 }
  0x69   : > { %v643_v7 = vadd.f32 %v642_v3, %v641_v56  ;;  %v659_v1 = vsel %vm224_vm0, %v1171_v53, 0.0  ;;  %v671_v10 = vadd.f32 %v670_v48, %v669_v61  ;;  %v684_v59 = vadd.f32 %v683_v54, %v682_v6 }
  0x6a   : > { %v624_v2 = vmul.f32 %v1140_v24, %v1160_v34  ;;  %v658_v4 = vadd.f32 %v657_v57, %v656_v58  ;;  %v674_v5 = vsel %vm224_vm0, %v623_v22, 0.0  ;;  %v687_v11 = vsel %vm224_vm0, %v620_v18, 0.0 }
  0x6b   : > { %v673_v37 = vadd.f32 %v672_v14, %v671_v10  ;;  %v686_v12 = vadd.f32 %v685_v62, %v684_v59  ;;  %695 = vst.msk [vmem:[%s205_s23] sm:$0xff] %vm224_vm0, %v643_v7  ;;  %v626_v8 = vmul.f32 %v1142_v26, %v1166_v40  ;;  %v676_v53 = vsel %vm224_vm0, %v625_v50, 0.0 }
  0x6c   : > { %v660_v13 = vadd.f32 %v659_v1, %v658_v4  ;;  %v689_v15 = vsel %vm224_vm0, %v622_v30, 0.0  ;;  %v691_v24 = vsel %vm224_vm0, %v624_v2, 0.0 }
  0x6d   : > { %v675_v16 = vadd.f32 %v674_v5, %v673_v37  ;;  %v688_v17 = vadd.f32 %v687_v11, %v686_v12  ;;  %v693_v19 = vsel %vm224_vm0, %v626_v8, 0.0 }
  0x6e   : > { %696 = vst.msk [vmem:[%s205_s23 + $0x8] sm:$0xff] %vm224_vm0, %v660_v13 }
  0x6f   : > { %v677_v34 = vadd.f32 %v676_v53, %v675_v16  ;;  %v690_v18 = vadd.f32 %v689_v15, %v688_v17 }
  0x71   : > { %v692_v20 = vadd.f32 %v691_v24, %v690_v18  ;;  %697 = vst.msk [vmem:[%s205_s23 + $0x10] sm:$0xff] %vm224_vm0, %v677_v34 }
  0x73   : > { %v694_v28 = vadd.f32 %v693_v19, %v692_v20 }
  0x75   : > { %698 = vst.msk [vmem:[%s205_s23 + $0x18] sm:$0xff] %vm224_vm0, %v694_v28 }
  0x76 PF: > { %s12_s11 = sadd.s32 1, %s906_s11   ;;  %s1240_s9 = smov %s902_s10 }
  0x77   : > { %p9_p5 = scmp.ge.s32.totalorder %s12_s11, 4   ;;  %s1241_s10 = smov %s1243_s12 }
  0x79   :  { %11 = sbr.rel (!%p9_p5) target bundleno = 2 (0x2), region = 61 }

// kernel: caun_forward.14
= control target key start
LH: loop header
LB: loop body
LE: loop exit
PB: predicated region body
PF: predicated region fallthrough
CT: control target
= control target key end

     0   :  { %s784_s15 = smov 0   ;;  %s786_s16 = smov 0   ;;  %s891_s0 = inlined_call_operand.vmem [shape: bf16[2,18,18,16], index: 0, kind: input, shape index: {}]   ;;  %s892_s1 = inlined_call_operand.vmem [shape: bf16[3,48,128], index: 1, kind: input, shape index: {}]   ;;  %s893_s2 = inlined_call_operand.vmem [shape: f32[1,128], index: 2, kind: input, shape index: {}]   ;;  %s894_s3 = inlined_call_operand.vmem [shape: f32[1,128], index: 3, kind: input, shape index: {}]   ;;  %s895_s4 = inlined_call_operand.vmem [shape: f32[2,16,16,128], index: 4, kind: output, shape index: {}]  }
   0x1   :  { %s788_s17 = smov 0   ;;  %s790_s18 = smov 0  }
   0x2   :  { %s792_s19 = smov 0   ;;  %s794_s20 = smov 0  }
   0x3   :  { %s796_s21 = smov 0  }
   0x4 LB: > { %s26_s22 = sadd.s32 1, %s742_s18  ;;  %s29_s23 = sadd.s32 1, %s746_s19  ;;  %s754_s21 = sphi %s796_s21, %s14_s21   ;;  %s750_s20 = sphi %s794_s20, %s901_s20   ;;  %s746_s19 = sphi %s792_s19, %s900_s19   ;;  %s742_s18 = sphi %s790_s18, %s899_s18   ;;  %s738_s17 = sphi %s788_s17, %s898_s17   ;;  %s734_s16 = sphi %s786_s16, %s897_s16   ;;  %s730_s15 = sphi %s784_s15, %s896_s15  }
   0x5   : > { %p27_p0 = scmp.ge.s32.totalorder %s26_s22, 3  ;;  %p589_p1 = scmp.ge.s32.totalorder %s754_s21, 1 }
   0x6   : > { %p193_p2 = scmp.lt.s32.totalorder %s754_s21, 97  ;;  %s33_s24 = sadd.s32 1, %s750_s20 }
   0x7   : > { %s903_s22 = smov (%p27_p0, %s26_s22), 0  ;;  %s905_s23 = smov (!%p27_p0, %s29_s23), %s746_s19 }
   0x8   : > { %p194_p3 = pnand %p589_p1, %p193_p2  ;;  %p31_p4 = scmp.ge.s32.totalorder %s905_s23, 16 }
   0x9   : > { %s228_s25 = sadd.s32 (!%p194_p3), %s730_s15, %s734_s16  ;;  %p229_p6 = scmp.lt.s32.totalorder (!%p194_p3), %s738_s17, 1 }
   0xa   : > { %s907_s23 = smov (%p31_p4, %s905_s23), 0  ;;  %s909_s24 = smov (!%p31_p4, %s33_s24), %s750_s20 }
   0xb   : > { %p35_p5 = scmp.ge.s32.totalorder %s909_s24, 2  ;;  %197 = sbr.rel (%p194_p3) target bundleno = 254 (0xfe), region = 36 }
   0xc   : > { %p231_p7 = scmp.lt.s32.totalorder (!%p194_p3), %s228_s25, 17  ;;  %p241_p8 = scmp.lt.s32.totalorder (!%p194_p3), %s734_s16, 15 }
   0xd   : > { %s911_s24 = smov (%p35_p5, %s909_s24), 0  ;;  %p594_p9 = scmp.ne.s32.totalorder (!%p194_p3), %s730_s15, 0 }
  0x10   : > { %s913_s17 = smov (!%p229_p6, %s738_s17), 1  ;;  %s915_s25 = smov (!%p231_p7, %s228_s25), 17 }
  0x11   : > { %s635_s26 = smul.u32 54, %s913_s17  ;;  %s592_s28 = sshll.u32 %s913_s17, 5 }
  0x12   : > { %s634_s27 = smul.u32 3, %s915_s25  ;;  %s917_s16 = smov (!%p241_p8, %s734_s16), 15 }
  0x13   : > { %s591_s5 = sshll.u32 %s917_s16, 1  ;;  %252 = sbr.rel (%p594_p9) target bundleno = 26 (0x1a), region = 40 }
  0x14   : > { %s235_s29 = sadd.s32 %s635_s26, %s634_s27  ;;  %s245_s9 = sadd.s32 %s592_s28, %s591_s5 }
  0x15   : > { %s590_s30 = sshll.u32 %s235_s29, 2  ;;  %s593_s10 = sshll.u32 %s245_s9, 3 }
  0x16   : > { %s237_s8 = scalar_lea.vmem %s891_s0, %s590_s30  ;;  %s840_s13 = scalar_lea.vmem %s895_s4, %s593_s10 }
  0x18   : > { %v756_v0 = vmov 0.0  }
  0x19   : > { %253 = vst [vmem:[%s840_s13] sm:$0xff] %v756_v0  ;;  %254 = vst [vmem:[%s840_s13 + $0x8] sm:$0xff] %v756_v0 }
  0x1a PF: > { %s609_s14 = smul.u32 24, %s730_s15  ;;  %v697_v1 = vld [vmem:[%s237_s8] sm:$0xff]   ;;  %v757_v2 = vmov 0.0   ;;  %vm758_vm0 = vmmov 0   ;;  %vm280_vm1 = vcmask 130048   ;;  %vm394_vm3 = vcmask 1046528  }
  0x1b   : > { %616 = vmatprep.subr.bf16.mxu0 %v757_v2  ;;  %622 = vmatprep.subr.bf16.mxu1 %v757_v2  ;;  %v698_v3 = vld [vmem:[%s237_s8 + $0x8] ss:$0 sps:$4 sm:$0x11]   ;;  %v331_v4 = vshrl.u32 %v697_v1, 16  ;;  %v333_v6 = vshll.u32 %v697_v1, 16  ;;  %v395_v14 = vrot.slane %v697_v1, 1 }
  0x1c   : > { %s260_s25 = scalar_lea.vmem %s892_s1, %s609_s14  ;;  %618 = vmatprep.mubr.msk.bf16.mxu0 %vm758_vm0, %v757_v2  ;;  %624 = vmatprep.mubr.msk.bf16.mxu1 %vm758_vm0, %v757_v2  ;;  %v338_v8 = vshll.u32 %v698_v3, 16  ;;  %vm330_vm2 = vsmask.f32 7424  ;;  %v396_v15 = vrot.slane %v698_v3, 1  ;;  %p604_p10 = scmp.ne.s32.totalorder %s730_s15, 2 }
  0x1d   : > { %v695_v5 = vld [vmem:[%s260_s25] sm:$0xff]   ;;  %v696_v7 = vld [vmem:[%s260_s25 + $0x8] sm:$0xff]   ;;  %v335_v9 = vrot.slane %v333_v6, 1  ;;  %v699_v10 = vld [vmem:[%s260_s25 + $0x10] sm:$0xff]  }
  0x1e   : > { %617 = vmatpush3.bf16.msra.mxu0 %v695_v5  ;;  %623 = vmatpush3.bf16.msra.mxu1 %v696_v7  ;;  %v340_v11 = vrot.slane %v338_v8, 1  ;;  %v397_v16 = vsel %vm394_vm3, %v395_v14, %v396_v15 }
  0x1f   : > { %628 = vmatprep.subr.bf16.mxu0 %v757_v2  ;;  %v336_v12 = vor.u32 %v335_v9, %v331_v4 }
  0x20   : > { %v267_v17 = vld [vmem:[%s840_s13] sm:$0xff]  ;;  %v268_v23 = vld [vmem:[%s840_s13 + $0x8] sm:$0xff] }
  0x21   : > { %619 = vmatmul.mubr.msk.bf16.vlgmr.msra.gmra.mxu0 %vm280_vm1, %v697_v1  ;;  %v341_v13 = vsel %vm330_vm2, %v336_v12, %v340_v11 }
  0x22   : > { %629 = vmatpush3.bf16.msra.mxu0 %v699_v10  ;;  %630 = vmatprep.mubr.msk.bf16.mxu0 %vm758_vm0, %v757_v2 }
  0x23   : > { %625 = vmatmul.mubr.msk.bf16.vlgmr.msra.gmra.mxu1 %vm280_vm1, %v341_v13 }
  0x29   : > { %631 = vmatmul.mubr.msk.bf16.vlgmr.msra.gmra.mxu0 %vm280_vm1, %v397_v16 }
  0xe1   : > { %v318_v18 = vpop.f32.mrf.mxu0 }
  0xe2   : > { %v325_v21 = vadd.f32 %v318_v18, %v267_v17 }
  0xe3   : > { %v385_v19 = vpop.f32.mrf.mxu1  ;;  %v620_v20 = vpop.f32.mrf.mxu0 }
  0xe4   : > { %v392_v27 = vadd.f32 %v385_v19, %v325_v21 }
  0xe5   : > { %v626_v22 = vpop.f32.mrf.mxu1  ;;  %v321_v24 = vpop.f32.mrf.mxu0 }
  0xe6   : > { %v326_v28 = vadd.f32 %v321_v24, %v268_v23 }
  0xe7   : > { %v388_v25 = vpop.f32.mrf.mxu1  ;;  %v621_v26 = vpop.f32.mrf.mxu0 }
  0xe8   : > { %v393_v33 = vadd.f32 %v388_v25, %v326_v28 }
  0xe9   : > { %v627_v29 = vpop.f32.mrf.mxu1  ;;  %v441_v30 = vpop.f32.mrf.mxu0 }
  0xea   : > { %v448_v31 = vadd.f32 %v441_v30, %v392_v27 }
  0xeb   : > { %v632_v32 = vpop.f32.mrf.mxu0 }
  0xec   : > { %450 = vst [vmem:[%s840_s13] sm:$0xff] %v448_v31  ;;  %455 = sbr.rel (%p604_p10) target bundleno = 254 (0xfe), region = 44 }
  0xed   : > { %v444_v34 = vpop.f32.mrf.mxu0 }
  0xee   : > { %v449_v35 = vadd.f32 %v444_v34, %v393_v33 }
  0xef   : > { %v633_v36 = vpop.f32.mrf.mxu0 }
  0xf0   : > { %451 = vst [vmem:[%s840_s13 + $0x8] sm:$0xff] %v449_v35 }
  0xf1   : > { %v605_v38 = vld [vmem:[%s893_s2] ss:$0 sm:$0xff] }
  0xf2   : > { %v606_v39 = vld [vmem:[%s894_s3] ss:$0 sm:$0xff] }
  0xf3   : > { %v456_v37 = vld [vmem:[%s840_s13] sm:$0xff] }
  0xf4   : > { %v465_v40 = vadd.f32 %v605_v38, %v456_v37 }
  0xf6   : > { %vm467_vm4 = vcmp.ge.f32.partialorder %v465_v40, 0.0  ;;  %v476_v43 = vmul.f32 %v606_v39, %v465_v40 }
  0xf7   : > { %v457_v41 = vld [vmem:[%s840_s13 + $0x8] sm:$0xff] }
  0xf8   : > { %v466_v42 = vadd.f32 %v605_v38, %v457_v41  ;;  %v478_v45 = vsel %vm467_vm4, %v465_v40, %v476_v43 }
  0xf9   : > { %480 = vst [vmem:[%s840_s13] sm:$0xff] %v478_v45 }
  0xfa   : > { %vm468_vm5 = vcmp.ge.f32.partialorder %v466_v42, 0.0  ;;  %v477_v44 = vmul.f32 %v606_v39, %v466_v42 }
  0xfc   : > { %v479_v46 = vsel %vm468_vm5, %v466_v42, %v477_v44 }
  0xfd   : > { %481 = vst [vmem:[%s840_s13 + $0x8] sm:$0xff] %v479_v46 }
  0xfe PF: > { %s14_s21 = sadd.s32 1, %s754_s21   ;;  %s896_s15 = smov %s742_s18 }
  0xff   : > { %p11_p11 = scmp.ge.s32.totalorder %s14_s21, 98   ;;  %s897_s16 = smov %s746_s19 }
 0x100   : > { %s898_s17 = smov %s750_s20  ;;  %s899_s18 = smov %s903_s22 }
 0x101   : > { %s900_s19 = smov %s907_s23  ;;  %s901_s20 = smov %s911_s24 }
 0x102   :  { %13 = sbr.rel (!%p11_p11) target bundleno = 4 (0x4), region = 75 }

// kernel: caun_forward.15
= control target key start
LH: loop header
LB: loop body
LE: loop exit
PB: predicated region body
PF: predicated region fallthrough
CT: control target
= control target key end

     0   :  { %s753_s15 = smov 0   ;;  %s755_s16 = smov 0   ;;  %s860_s0 = inlined_call_operand.vmem [shape: bf16[2,18,18,8], index: 0, kind: input, shape index: {}]   ;;  %s861_s1 = inlined_call_operand.vmem [shape: bf16[3,24,128], index: 1, kind: input, shape index: {}]   ;;  %s862_s2 = inlined_call_operand.vmem [shape: f32[1,128], index: 2, kind: input, shape index: {}]   ;;  %s863_s3 = inlined_call_operand.vmem [shape: f32[1,128], index: 3, kind: input, shape index: {}]   ;;  %s864_s4 = inlined_call_operand.vmem [shape: f32[2,16,16,128], index: 4, kind: output, shape index: {}]  }
   0x1   :  { %s757_s17 = smov 0   ;;  %s759_s18 = smov 0  }
   0x2   :  { %s761_s19 = smov 0   ;;  %s763_s20 = smov 0  }
   0x3   :  { %s765_s21 = smov 0  }
   0x4 LB: > { %s26_s3 = sadd.s32 1, %s711_s18  ;;  %s29_s22 = sadd.s32 1, %s715_s19  ;;  %s723_s21 = sphi %s765_s21, %s14_s21   ;;  %s719_s20 = sphi %s763_s20, %s870_s20   ;;  %s715_s19 = sphi %s761_s19, %s869_s19   ;;  %s711_s18 = sphi %s759_s18, %s868_s18   ;;  %s707_s17 = sphi %s757_s17, %s867_s17   ;;  %s703_s16 = sphi %s755_s16, %s866_s16   ;;  %s699_s15 = sphi %s753_s15, %s865_s15  }
   0x5   : > { %p27_p0 = scmp.ge.s32.totalorder %s26_s3, 3  ;;  %p565_p1 = scmp.ge.s32.totalorder %s723_s21, 1 }
   0x6   : > { %p193_p2 = scmp.lt.s32.totalorder %s723_s21, 97  ;;  %s33_s23 = sadd.s32 1, %s719_s20 }
   0x7   : > { %s872_s3 = smov (%p27_p0, %s26_s3), 0  ;;  %s874_s22 = smov (!%p27_p0, %s29_s22), %s715_s19 }
   0x8   : > { %p194_p3 = pnand %p565_p1, %p193_p2  ;;  %p31_p4 = scmp.ge.s32.totalorder %s874_s22, 16 }
   0x9   : > { %s228_s24 = sadd.s32 (!%p194_p3), %s699_s15, %s703_s16  ;;  %p229_p6 = scmp.lt.s32.totalorder (!%p194_p3), %s707_s17, 1 }
   0xa   : > { %s876_s22 = smov (%p31_p4, %s874_s22), 0  ;;  %s878_s23 = smov (!%p31_p4, %s33_s23), %s719_s20 }
   0xb   : > { %p35_p5 = scmp.ge.s32.totalorder %s878_s23, 2  ;;  %197 = sbr.rel (%p194_p3) target bundleno = 252 (0xfc), region = 36 }
   0xc   : > { %p231_p7 = scmp.lt.s32.totalorder (!%p194_p3), %s228_s24, 17  ;;  %p241_p8 = scmp.lt.s32.totalorder (!%p194_p3), %s703_s16, 15 }
   0xd   : > { %s880_s23 = smov (%p35_p5, %s878_s23), 0  ;;  %p570_p9 = scmp.ne.s32.totalorder (!%p194_p3), %s699_s15, 0 }
  0x10   : > { %s882_s17 = smov (!%p229_p6, %s707_s17), 1  ;;  %s884_s24 = smov (!%p231_p7, %s228_s24), 17 }
  0x11   : > { %s607_s25 = smul.u32 54, %s882_s17  ;;  %s568_s27 = sshll.u32 %s882_s17, 5 }
  0x12   : > { %s606_s26 = smul.u32 3, %s884_s24  ;;  %s886_s16 = smov (!%p241_p8, %s703_s16), 15 }
  0x13   : > { %s567_s30 = sshll.u32 %s886_s16, 1  ;;  %252 = sbr.rel (%p570_p9) target bundleno = 26 (0x1a), region = 40 }
  0x14   : > { %s235_s28 = sadd.s32 %s607_s25, %s606_s26  ;;  %s245_s8 = sadd.s32 %s568_s27, %s567_s30 }
  0x15   : > { %s566_s29 = sshll.u32 %s235_s28, 2  ;;  %s569_s9 = sshll.u32 %s245_s8, 3 }
  0x16   : > { %s237_s7 = scalar_lea.vmem %s860_s0, %s566_s29  ;;  %s809_s12 = scalar_lea.vmem %s864_s4, %s569_s9 }
  0x18   : > { %v725_v0 = vmov 0.0  }
  0x19   : > { %253 = vst [vmem:[%s809_s12] sm:$0xff] %v725_v0  ;;  %254 = vst [vmem:[%s809_s12 + $0x8] sm:$0xff] %v725_v0 }
  0x1a PF: > { %s581_s13 = smul.u32 12, %s699_s15  ;;  %v726_v1 = vmov 0.0   ;;  %vm275_vm0 = vcmask 1043456   ;;  %v667_v2 = vld [vmem:[%s237_s7] sm:$0xff]   ;;  %vm727_vm1 = vmmov 0   ;;  %vm271_vm2 = vcmask 64512  }
  0x1b   : > { %588 = vmatprep.subr.bf16.mxu0 %v726_v1  ;;  %594 = vmatprep.subr.bf16.mxu1 %v726_v1  ;;  %v668_v3 = vld [vmem:[%s237_s7 + $0x8] ss:$0 sps:$4 sm:$0x11]   ;;  %v326_v9 = vshrl.u32 %v667_v2, 16  ;;  %v328_v10 = vshll.u32 %v667_v2, 16  ;;  %v387_v16 = vrot.slane %v667_v2, 1 }
  0x1c   : > { %s260_s17 = scalar_lea.vmem %s861_s1, %s581_s13  ;;  %590 = vmatprep.mubr.msk.bf16.mxu0 %vm727_vm1, %v726_v1  ;;  %596 = vmatprep.mubr.msk.bf16.mxu1 %vm727_vm1, %v726_v1  ;;  %v333_v11 = vshll.u32 %v668_v3, 16  ;;  %vm325_vm3 = vsmask.f32 7424  ;;  %v388_v17 = vrot.slane %v668_v3, 1  ;;  %vm386_vm4 = vcmask 1046528   ;;  %p577_p10 = scmp.ne.s32.totalorder %s699_s15, 2 }
  0x1d   : > { %v261_v4 = vld [vmem:[%s260_s17] sm:$0xf]  ;;  %v262_v5 = vld [vmem:[%s260_s17 + $0x4] sm:$0xf]  ;;  %v263_v6 = vld [vmem:[%s260_s17 + $0x8] sm:$0xf] }
  0x1e   : > { %v277_v7 = vsel %vm275_vm0, %v261_v4, 0  ;;  %v341_v8 = vsel %vm275_vm0, %v262_v5, 0  ;;  %v394_v12 = vsel %vm275_vm0, %v263_v6, 0  ;;  %v330_v13 = vrot.slane %v328_v10, 1 }
  0x1f   : > { %589 = vmatpush3.bf16.msra.mxu0 %v277_v7  ;;  %595 = vmatpush3.bf16.msra.mxu1 %v341_v8  ;;  %v335_v14 = vrot.slane %v333_v11, 1  ;;  %v389_v19 = vsel %vm386_vm4, %v387_v16, %v388_v17 }
  0x20   : > { %600 = vmatprep.subr.bf16.mxu0 %v726_v1  ;;  %v331_v15 = vor.u32 %v330_v13, %v326_v9  ;;  %v264_v20 = vld [vmem:[%s809_s12] sm:$0xff]  ;;  %v265_v25 = vld [vmem:[%s809_s12 + $0x8] sm:$0xff] }
  0x22   : > { %591 = vmatmul.mubr.msk.bf16.vlgmr.msra.gmra.mxu0 %vm271_vm2, %v667_v2  ;;  %v336_v18 = vsel %vm325_vm3, %v331_v15, %v335_v14 }
  0x23   : > { %601 = vmatpush3.bf16.msra.mxu0 %v394_v12  ;;  %602 = vmatprep.mubr.msk.bf16.mxu0 %vm727_vm1, %v726_v1 }
  0x24   : > { %597 = vmatmul.mubr.msk.bf16.vlgmr.msra.gmra.mxu1 %vm271_vm2, %v336_v18 }
  0x2a   : > { %603 = vmatmul.mubr.msk.bf16.vlgmr.msra.gmra.mxu0 %vm271_vm2, %v389_v19 }
  0xe2   : > { %v313_v21 = vpop.f32.mrf.mxu0 }
  0xe3   : > { %v320_v23 = vadd.f32 %v313_v21, %v264_v20 }
  0xe4   : > { %v592_v22 = vpop.f32.mrf.mxu0  ;;  %v377_v24 = vpop.f32.mrf.mxu1 }
  0xe5   : > { %v384_v29 = vadd.f32 %v377_v24, %v320_v23 }
  0xe6   : > { %v316_v26 = vpop.f32.mrf.mxu0  ;;  %v598_v27 = vpop.f32.mrf.mxu1 }
  0xe7   : > { %v321_v30 = vadd.f32 %v316_v26, %v265_v25 }
  0xe8   : > { %v593_v28 = vpop.f32.mrf.mxu0  ;;  %v380_v31 = vpop.f32.mrf.mxu1 }
  0xe9   : > { %v385_v36 = vadd.f32 %v380_v31, %v321_v30 }
  0xea   : > { %v430_v32 = vpop.f32.mrf.mxu0  ;;  %v599_v34 = vpop.f32.mrf.mxu1 }
  0xeb   : > { %v437_v33 = vadd.f32 %v430_v32, %v384_v29 }
  0xec   : > { %v604_v35 = vpop.f32.mrf.mxu0 }
  0xed   : > { %439 = vst [vmem:[%s809_s12] sm:$0xff] %v437_v33  ;;  %444 = sbr.rel (%p577_p10) target bundleno = 252 (0xfc), region = 44 }
  0xee   : > { %v433_v37 = vpop.f32.mrf.mxu0 }
  0xef   : > { %v438_v38 = vadd.f32 %v433_v37, %v385_v36 }
  0xf0   : > { %v605_v39 = vpop.f32.mrf.mxu0 }
  0xf1   : > { %440 = vst [vmem:[%s809_s12 + $0x8] sm:$0xff] %v438_v38 }
  0xf2   : > { %v578_v41 = vld [vmem:[%s862_s2] ss:$0 sm:$0xff] }
  0xf4   : > { %v445_v40 = vld [vmem:[%s809_s12] sm:$0xff] }
  0xf5   : > { %v454_v43 = vadd.f32 %v578_v41, %v445_v40 }
  0xf7   : > { %456 = vst [vmem:[%s809_s12] sm:$0xff] %v454_v43 }
  0xf8   : > { %v446_v42 = vld [vmem:[%s809_s12 + $0x8] sm:$0xff] }
  0xf9   : > { %v455_v44 = vadd.f32 %v578_v41, %v446_v42 }
  0xfb   : > { %457 = vst [vmem:[%s809_s12 + $0x8] sm:$0xff] %v455_v44 }
  0xfc PF: > { %s14_s21 = sadd.s32 1, %s723_s21   ;;  %s865_s15 = smov %s711_s18 }
  0xfd   : > { %p11_p11 = scmp.ge.s32.totalorder %s14_s21, 98   ;;  %s866_s16 = smov %s715_s19 }
  0xfe   : > { %s867_s17 = smov %s719_s20  ;;  %s868_s18 = smov %s872_s3 }
  0xff   : > { %s869_s19 = smov %s876_s22  ;;  %s870_s20 = smov %s880_s23 }
 0x100   :  { %13 = sbr.rel (!%p11_p11) target bundleno = 4 (0x4), region = 75 }

// kernel: caun_forward.19
= control target key start
LH: loop header
LB: loop body
LE: loop exit
PB: predicated region body
PF: predicated region fallthrough
CT: control target
= control target key end

     0   :  { %s770_s9 = smov 0   ;;  %s772_s10 = smov 0   ;;  %s924_s0 = inlined_call_operand.vmem [shape: f32[2,9,4,64], index: 0, kind: input, shape index: {}]   ;;  %s925_s1 = inlined_call_operand.vmem [shape: f32[2,2,9,64], index: 1, kind: input, shape index: {}]   ;;  %s926_s2 = inlined_call_operand.vmem [shape: f32[2,2,4,64], index: 2, kind: output, shape index: {}]  }
   0x1   :  { %s774_s11 = smov 0  }
   0x2 LB: > { %s24_s12 = sadd.s32 1, %s748_s10  ;;  %p670_p0 = scmp.ge.s32.totalorder %s752_s11, 1  ;;  %s752_s11 = sphi %s774_s11, %s12_s11   ;;  %s748_s10 = sphi %s772_s10, %s928_s10   ;;  %s744_s9 = sphi %s770_s9, %s927_s9  }
   0x3   : > { %p26_p1 = scmp.ge.s32.totalorder %s24_s12, 2  ;;  %p146_p2 = scmp.lt.s32.totalorder %s752_s11, 3 }
   0x5   : > { %s930_s12 = smov (%p26_p1, %s24_s12), 0  ;;  %p147_p3 = pnand %p670_p0, %p146_p2 }
   0x6   : > { %p182_p4 = scmp.lt.s32.totalorder (!%p147_p3), %s744_s9, 1 }
   0x7   : > { %150 = sbr.rel (%p147_p3) target bundleno = 104 (0x68), region = 28 }
   0xc   : > { %s932_s9 = smov (!%p182_p4, %s744_s9), 1  ;;  %vm215_vm0 = vcmask 519168   ;;  %v754_v59 = vmov 1966171168   ;;  %v299_v61 = vlaneseq }
   0xd   : > { %s682_s13 = smul.u32 36, %s932_s9  ;;  %v297_v60 = vunpack.c.l.s4 %v754_v59  ;;  %s680_s17 = sshll.u32 %s932_s9, 5 }
   0xe   : > { %s197_s20 = scalar_lea.vmem %s925_s1, %s680_s17  ;;  %s681_s21 = sshll.u32 %s932_s9, 3 }
   0xf   : > { %s189_s16 = scalar_lea.vmem %s924_s0, %s682_s13  ;;  %s205_s24 = scalar_lea.vmem %s926_s2, %s681_s21 }
  0x10   : > { %v206_v0 = vld [vmem:[%s189_s16] sm:$0xf]  ;;  %v207_v1 = vld [vmem:[%s189_s16 + $0x4] sm:$0xf]  ;;  %v208_v2 = vld [vmem:[%s189_s16 + $0x8] sm:$0xf] }
  0x11   : > { %v209_v3 = vld [vmem:[%s189_s16 + $0xc] sm:$0xf]  ;;  %v210_v4 = vld [vmem:[%s189_s16 + $0x10] sm:$0xf]  ;;  %v211_v5 = vld [vmem:[%s189_s16 + $0x14] sm:$0xf] }
  0x12   : > { %v212_v6 = vld [vmem:[%s189_s16 + $0x18] sm:$0xf]  ;;  %v213_v7 = vld [vmem:[%s189_s16 + $0x1c] sm:$0xf]  ;;  %v214_v8 = vld [vmem:[%s189_s16 + $0x20] sm:$0xf] }
  0x13   : > { %v216_v9 = vsel %vm215_vm0, %v206_v0, -inf  ;;  %v217_v10 = vsel %vm215_vm0, %v207_v1, -inf  ;;  %v218_v11 = vsel %vm215_vm0, %v208_v2, -inf  ;;  %v219_v12 = vsel %vm215_vm0, %v209_v3, -inf }
  0x14   : > { %v220_v13 = vsel %vm215_vm0, %v210_v4, -inf  ;;  %v222_v14 = vsel %vm215_vm0, %v211_v5, -inf  ;;  %v224_v15 = vsel %vm215_vm0, %v212_v6, -inf  ;;  %v226_v16 = vsel %vm215_vm0, %v213_v7, -inf }
  0x15   : > { %v221_v17 = vmax.f32 %v216_v9, %v220_v13  ;;  %v223_v18 = vmax.f32 %v217_v10, %v222_v14  ;;  %v225_v19 = vmax.f32 %v218_v11, %v224_v15  ;;  %v227_v20 = vmax.f32 %v219_v12, %v226_v16  ;;  %v287_v11 = vld [vmem:[%s197_s20] sm:$0xff]  ;;  %v289_v13 = vld [vmem:[%s197_s20 + $0x10] sm:$0xff] }
  0x16   : > { %v228_v21 = vsel %vm215_vm0, %v214_v8, -inf  ;;  %v295_v14 = vcombine.high %v287_v11, %v287_v11  ;;  %v358_v15 = vcombine.high %v289_v13, %v289_v13 }
  0x17   : > { %v229_v22 = vmax.f32 %v221_v17, %v228_v21  ;;  %v231_v23 = vmax.f32 %v225_v19, %v227_v20 }
  0x19   : > { %v230_v24 = vmax.f32 %v229_v22, %v223_v18 }
  0x1b   : > { %v232_v25 = vmax.f32 %v230_v24, %v231_v23  ;;  %v676_v23 = vld.sshfl [vmem:[%s197_s20 + $0x8] sm:$0x1 pattern:$0x75316420] }
  0x1d   : > { %v233_v26 = vsub.f32 %v206_v0, %v232_v25  ;;  %v234_v27 = vsub.f32 %v207_v1, %v232_v25  ;;  %v235_v28 = vsub.f32 %v208_v2, %v232_v25  ;;  %v236_v29 = vsub.f32 %v209_v3, %v232_v25 }
  0x1e   : > { %v237_v30 = vsub.f32 %v210_v4, %v232_v25  ;;  %v238_v31 = vsub.f32 %v211_v5, %v232_v25  ;;  %v239_v35 = vsub.f32 %v212_v6, %v232_v25  ;;  %v240_v38 = vsub.f32 %v213_v7, %v232_v25 }
  0x1f   : > { %v242_v32 = vmul.f32 1.442695, %v233_v26  ;;  %v244_v33 = vmul.f32 1.442695, %v234_v27  ;;  %v246_v34 = vmul.f32 1.442695, %v235_v28  ;;  %v241_v40 = vsub.f32 %v214_v8, %v232_v25 }
  0x20   : > { %v248_v36 = vmul.f32 1.442695, %v236_v29  ;;  %v250_v37 = vmul.f32 1.442695, %v237_v30  ;;  %v252_v39 = vmul.f32 1.442695, %v238_v31  ;;  %v298_v4 = vunpack.c.0.s8 %v297_v60 }
  0x21   : > { %710 = vpow2.f32 %v242_v32  ;;  %v254_v41 = vmul.f32 1.442695, %v239_v35  ;;  %v256_v42 = vmul.f32 1.442695, %v240_v38  ;;  %v258_v43 = vmul.f32 1.442695, %v241_v40 }
  0x22   : > { %712 = vpow2.f32 %v244_v33  ;;  %v300_v5 = vshrl.u32 %v299_v61, 7  ;;  %v854_v29 = vld.sshfl [vmem:[%s197_s20 + $0x18] sm:$0x1 pattern:$0x75316420] }
  0x23   : > { %714 = vpow2.f32 %v246_v34 }
  0x24   : > { %716 = vpow2.f32 %v248_v36  ;;  %v843_v10 = vsub.s32 %v298_v4, %v300_v5  ;;  %v852_v28 = vsub.s32 0, %v300_v5 }
  0x25   : > { %718 = vpow2.f32 %v250_v37 }
  0x26   : > { %720 = vpow2.f32 %v252_v39  ;;  %v302_v16 = vrot.slane %v287_v11, %v843_v10  ;;  %v309_v17 = vrot.slane %v295_v14, %v843_v10  ;;  %v365_v18 = vrot.slane %v289_v13, %v843_v10 }
  0x27   : > { %722 = vpow2.f32 %v254_v41  ;;  %v372_v19 = vrot.slane %v358_v15, %v843_v10  ;;  %v357_v34 = vrot.slane %v676_v23, %v843_v10 }
  0x28   : > { %724 = vpow2.f32 %v256_v42  ;;  %v310_v20 = vcombine.high %v302_v16, %v302_v16  ;;  %v318_v21 = vrot.slane %v302_v16, %v843_v10  ;;  %v311_v22 = vcombine.high %v309_v17, %v309_v17 }
  0x29   : > { %726 = vpow2.f32 %v258_v43  ;;  %v373_v24 = vcombine.high %v365_v18, %v365_v18  ;;  %v374_v25 = vcombine.high %v372_v19, %v372_v19  ;;  %v381_v26 = vrot.slane %v365_v18, %v843_v10 }
  0x2a   : > { %v332_v27 = vrot.slane %v310_v20, %v843_v10  ;;  %v325_v30 = vrot.slane %v309_v17, %v843_v10  ;;  %v340_v31 = vcombine.high %v318_v21, %v318_v21  ;;  %v339_v32 = vrot.slane %v311_v22, %v843_v10 }
  0x2b   : > { %v388_v35 = vrot.slane %v372_v19, %v843_v10  ;;  %v395_v37 = vrot.slane %v373_v24, %v843_v10  ;;  %v402_v38 = vrot.slane %v374_v25, %v843_v10  ;;  %v403_v39 = vcombine.high %v381_v26, %v381_v26 }
  0x2c   : > { %v342_v33 = vcombine.high %v332_v27, %v332_v27  ;;  %v341_v36 = vcombine.high %v325_v30, %v325_v30  ;;  %v343_v40 = vcombine.high %v339_v32, %v339_v32  ;;  %v420_v42 = vrot.slane %v854_v29, %v843_v10 }
  0x2d   : > { %v404_v41 = vcombine.high %v388_v35, %v388_v35  ;;  %v424_v43 = vrot.slane %v318_v21, %v852_v28  ;;  %v460_v61 = vrot.slane %v381_v26, %v852_v28 }
  0x2e   : > { %v803_v44 = vpop.eup %710  ;;  %v436_v59 = vrot.slane %v342_v33, %v852_v28 }
  0x2f   : > { %v805_v45 = vpop.eup %712  ;;  %v260_v46 = vsel %vm215_vm0, %v803_v44, 0.0  ;;  %v484_v15 = vrot.slane %v404_v41, %v852_v28 }
  0x30   : > { %v809_v47 = vpop.eup %714  ;;  %v261_v48 = vsel %vm215_vm0, %v805_v45, 0.0 }
  0x31   : > { %v813_v49 = vpop.eup %716  ;;  %v262_v50 = vadd.f32 %v261_v48, %v260_v46  ;;  %v263_v51 = vsel %vm215_vm0, %v809_v47, 0.0  ;;  %v405_v48 = vcombine.high %v395_v37, %v395_v37 }
  0x32   : > { %v817_v52 = vpop.eup %718  ;;  %v265_v53 = vsel %vm215_vm0, %v813_v49, 0.0 }
  0x33   : > { %v821_v54 = vpop.eup %720  ;;  %v264_v55 = vadd.f32 %v263_v51, %v262_v50  ;;  %v267_v56 = vsel %vm215_vm0, %v817_v52, 0.0  ;;  %v406_v50 = vcombine.high %v402_v38, %v402_v38  ;;  %v428_v51 = vrot.slane %v332_v27, %v852_v28 }
  0x34   : > { %v825_v57 = vpop.eup %722  ;;  %v269_v62 = vsel %vm215_vm0, %v821_v54, 0.0 }
  0x35   : > { %v266_v58 = vadd.f32 %v265_v53, %v264_v55  ;;  %v829_v63 = vpop.eup %724  ;;  %v271_v1 = vsel %vm215_vm0, %v825_v57, 0.0  ;;  %v432_v53 = vrot.slane %v340_v31, %v852_v28  ;;  %v488_v29 = vrot.slane %v406_v50, %v852_v28 }
  0x36   : > { %v834_v2 = vpop.eup %726  ;;  %v273_v6 = vsel %vm215_vm0, %v829_v63, 0.0 }
  0x37   : > { %v268_v0 = vadd.f32 %v267_v56, %v266_v58  ;;  %v275_v8 = vsel %vm215_vm0, %v834_v2, 0.0 }
  0x39   : > { %v270_v3 = vadd.f32 %v269_v62, %v268_v0  ;;  %v464_v62 = vrot.slane %v395_v37, %v852_v28  ;;  %v468_v0 = vrot.slane %v403_v39, %v852_v28 }
  0x3b   : > { %v272_v7 = vadd.f32 %v271_v1, %v270_v3  ;;  %v440_v1 = vrot.slane %v325_v30, %v852_v28  ;;  %v444_v3 = vrot.slane %v339_v32, %v852_v28 }
  0x3d   : > { %v274_v9 = vadd.f32 %v273_v6, %v272_v7  ;;  %v452_v7 = vrot.slane %v343_v40, %v852_v28 }
  0x3f   : > { %v276_v12 = vadd.f32 %v275_v8, %v274_v9  ;;  %v456_v8 = vrot.slane %v357_v34, %v852_v28  ;;  %v476_v9 = vrot.slane %v388_v35, %v852_v28  ;;  %v492_v35 = vrot.slane %v420_v42, %v852_v28 }
  0x41   : > { %728 = vrcp.f32 %v276_v12 }
  0x4e   : > { %v729_v46 = vpop.eup %728 }
  0x4f   : > { %v278_v55 = vmul.f32 %v729_v46, %v803_v44  ;;  %v279_v56 = vmul.f32 %v729_v46, %v805_v45  ;;  %v280_v58 = vmul.f32 %v729_v46, %v809_v47  ;;  %v281_v60 = vmul.f32 %v729_v46, %v813_v49 }
  0x50   : > { %v448_v44 = vrot.slane %v341_v36, %v852_v28  ;;  %v282_v45 = vmul.f32 %v729_v46, %v817_v52  ;;  %v472_v47 = vrot.slane %v405_v48, %v852_v28  ;;  %v283_v49 = vmul.f32 %v729_v46, %v821_v54 }
  0x51   : > { %v511_v4 = vmul.f32 %v424_v43, %v278_v55  ;;  %v512_v5 = vmul.f32 %v428_v51, %v279_v56  ;;  %v513_v6 = vmul.f32 %v432_v53, %v280_v58  ;;  %v514_v10 = vmul.f32 %v436_v59, %v281_v60 }
  0x52   : > { %v520_v11 = vmul.f32 %v460_v61, %v278_v55  ;;  %v521_v12 = vmul.f32 %v464_v62, %v279_v56  ;;  %v522_v13 = vmul.f32 %v468_v0, %v280_v58  ;;  %v284_v14 = vmul.f32 %v729_v46, %v825_v57 }
  0x53   : > { %v480_v52 = vrot.slane %v402_v38, %v852_v28  ;;  %v529_v16 = vsel %vm215_vm0, %v511_v4, 0.0  ;;  %v515_v17 = vmul.f32 %v440_v1, %v282_v45  ;;  %v523_v54 = vmul.f32 %v472_v47, %v281_v60 }
  0x54   : > { %v530_v18 = vsel %vm215_vm0, %v512_v5, 0.0  ;;  %v532_v19 = vsel %vm215_vm0, %v513_v6, 0.0  ;;  %v285_v20 = vmul.f32 %v729_v46, %v829_v63  ;;  %v516_v21 = vmul.f32 %v444_v3, %v283_v49 }
  0x55   : > { %v524_v22 = vmul.f32 %v476_v9, %v282_v45  ;;  %v531_v23 = vadd.f32 %v530_v18, %v529_v16  ;;  %v534_v24 = vsel %vm215_vm0, %v514_v10, 0.0  ;;  %v546_v57 = vsel %vm215_vm0, %v520_v11, 0.0 }
  0x56   : > { %v547_v25 = vsel %vm215_vm0, %v521_v12, 0.0  ;;  %v549_v26 = vsel %vm215_vm0, %v522_v13, 0.0  ;;  %v286_v27 = vmul.f32 %v729_v46, %v834_v2  ;;  %v517_v32 = vmul.f32 %v448_v44, %v284_v14 }
  0x57   : > { %v533_v30 = vadd.f32 %v532_v19, %v531_v23  ;;  %v548_v31 = vadd.f32 %v547_v25, %v546_v57  ;;  %v525_v33 = vmul.f32 %v480_v52, %v283_v49  ;;  %v536_v63 = vsel %vm215_vm0, %v515_v17, 0.0 }
  0x58   : > { %v551_v34 = vsel %vm215_vm0, %v523_v54, 0.0  ;;  %v518_v38 = vmul.f32 %v452_v7, %v285_v20  ;;  %v526_v39 = vmul.f32 %v484_v15, %v284_v14  ;;  %v538_v40 = vsel %vm215_vm0, %v516_v21, 0.0 }
  0x59   : > { %v535_v36 = vadd.f32 %v534_v24, %v533_v30  ;;  %v550_v37 = vadd.f32 %v549_v26, %v548_v31  ;;  %v553_v2 = vsel %vm215_vm0, %v524_v22, 0.0  ;;  %v519_v46 = vmul.f32 %v456_v8, %v286_v27 }
  0x5a   : > { %v527_v48 = vmul.f32 %v488_v29, %v285_v20  ;;  %v540_v50 = vsel %vm215_vm0, %v517_v32, 0.0  ;;  %v555_v51 = vsel %vm215_vm0, %v525_v33, 0.0  ;;  %v528_v28 = vmul.f32 %v492_v35, %v286_v27 }
  0x5b   : > { %v537_v41 = vadd.f32 %v536_v63, %v535_v36  ;;  %v552_v43 = vadd.f32 %v551_v34, %v550_v37  ;;  %v542_v42 = vsel %vm215_vm0, %v518_v38, 0.0  ;;  %v557_v56 = vsel %vm215_vm0, %v526_v39, 0.0 }
  0x5c   : > { %v544_v60 = vsel %vm215_vm0, %v519_v46, 0.0  ;;  %v559_v61 = vsel %vm215_vm0, %v527_v48, 0.0  ;;  %v561_v1 = vsel %vm215_vm0, %v528_v28, 0.0 }
  0x5d   : > { %v539_v53 = vadd.f32 %v538_v40, %v537_v41  ;;  %v554_v55 = vadd.f32 %v553_v2, %v552_v43 }
  0x5f   : > { %v541_v58 = vadd.f32 %v540_v50, %v539_v53  ;;  %v556_v59 = vadd.f32 %v555_v51, %v554_v55 }
  0x61   : > { %v543_v62 = vadd.f32 %v542_v42, %v541_v58  ;;  %v558_v0 = vadd.f32 %v557_v56, %v556_v59 }
  0x63   : > { %v545_v3 = vadd.f32 %v544_v60, %v543_v62  ;;  %v560_v44 = vadd.f32 %v559_v61, %v558_v0 }
  0x65   : > { %v562_v4 = vadd.f32 %v561_v1, %v560_v44  ;;  %563 = vst.msk [vmem:[%s205_s24] sm:$0xf] %vm215_vm0, %v545_v3 }
  0x67   : > { %564 = vst.msk [vmem:[%s205_s24 + $0x4] sm:$0xf] %vm215_vm0, %v562_v4 }
  0x68 PF: > { %s12_s11 = sadd.s32 1, %s752_s11   ;;  %s927_s9 = smov %s748_s10 }
  0x69   : > { %p9_p5 = scmp.ge.s32.totalorder %s12_s11, 4   ;;  %s928_s10 = smov %s930_s12 }
  0x6b   :  { %11 = sbr.rel (!%p9_p5) target bundleno = 2 (0x2), region = 61 }

</bundles_post_ra>
